<compile_context>
chip_gen: v6e
topology: v6e:2x2x1
jax: 0.10.0
libtpu: 0.0.40
codegen_flags: <defaults>
</compile_context>

<pallas_src>
import jax
import jax.numpy as jnp
from jax.experimental import pallas as pl
from jax.experimental.pallas import tpu as pltpu

PAST_HISTORY = 16
FORWARD_LOOK = 1
STACK_DEPTH = 2
LAYER_UNITS = 32
BIAS = True
HIDDEN_SIZE = 8      # constructor arg only; forward uses hidden = FORWARD_LOOK
DROPOUT = 0          # unused in forward
LN_EPS = 1e-5

DEFAULT_TILE_B = 4096   # batch rows per grid step (must be a multiple of 1024)


def stockbot_kernel(x_ref, ln_g_ref, ln_b_ref, lstm_ref, head_ref, out_ref):
    """StockBot forward for one batch tile.

    x_ref    : (T, SB, 128) f32   input, batch dense over (sublane, lane)
    ln_g_ref : (T,)         f32   SMEM, LayerNorm gamma (torch shape (T,1))
    ln_b_ref : (T,)         f32   SMEM, LayerNorm beta
    lstm_ref : (STACK_DEPTH*12,)  SMEM, per layer [w_ih(4), w_hh(4), b_ih+b_hh(4)],
                                  gate order (i, f, g, o); hidden = input = 1
    head_ref : (T+1,)       f32   SMEM, fused head [w_fused(16), b_fused]
    out_ref  : (SB, 128)    f32   per-batch-element scalar output
    """
    T = PAST_HISTORY

    def load_t(t):
        return x_ref[t].astype(jnp.float32)          # (SB, 128) dense tile

    # ---- LayerNorm statistics over the (past_history, forward_look)=T elements ----
    s = load_t(0)
    for t in range(1, T):
        s = s + load_t(t)
    mu = s * (1.0 / T)                               # (SB, 128)
    ss = (load_t(0) - mu) ** 2
    for t in range(1, T):
        ss = ss + (load_t(t) - mu) ** 2
    inv_std = jax.lax.rsqrt(ss * (1.0 / T) + LN_EPS)  # (SB, 128)

    # ---- hoist all scalar parameter reads out of the time loop ----
    def read_layer(layer):
        base = layer * 12
        wi = [lstm_ref[base + g] for g in range(4)]
        wh = [lstm_ref[base + 4 + g] for g in range(4)]
        b = [lstm_ref[base + 8 + g] for g in range(4)]
        return wi, wh, b

    layer_params = [read_layer(layer) for layer in range(STACK_DEPTH)]
    w_head = [head_ref[t] for t in range(T)]
    b_head = head_ref[T]
    ln_g = [ln_g_ref[t] for t in range(T)]
    ln_b = [ln_b_ref[t] for t in range(T)]

    def cell(xt, h, c, wi, wh, b):
        i_g = jax.nn.sigmoid(wi[0] * xt + wh[0] * h + b[0])
        f_g = jax.nn.sigmoid(wi[1] * xt + wh[1] * h + b[1])
        g_g = jnp.tanh(wi[2] * xt + wh[2] * h + b[2])
        o_g = jax.nn.sigmoid(wi[3] * xt + wh[3] * h + b[3])
        c_new = f_g * c + i_g * g_g
        h_new = o_g * jnp.tanh(c_new)
        return h_new, c_new

    zeros = jnp.zeros_like(mu)
    h = [zeros] * STACK_DEPTH
    c = [zeros] * STACK_DEPTH
    acc = zeros                                      # fused ffn1@ffn2 accumulator

    # ---- stacked LSTM, both layers interleaved in one static time loop ----
    for t in range(T):
        xt = (load_t(t) - mu) * inv_std * ln_g[t] + ln_b[t]   # LayerNorm'd input
        inp = xt
        for layer in range(STACK_DEPTH):
            wi, wh, b = layer_params[layer]
            h[layer], c[layer] = cell(inp, h[layer], c[layer], wi, wh, b)
            inp = h[layer]
        acc = acc + w_head[t] * inp                  # fused (16->32->1) projection

    out_ref[...] = acc + b_head                      # (SB, 128), lane-dense store


def make_params():
    """Deterministic synthetic parameters (not a checkpoint)."""
    keys = jax.random.split(jax.random.PRNGKey(42), 6)
    return {
        # LayerNorm affine params, torch shape (T, 1) -> stored as (1, T)
        "ln_g": jnp.ones((1, PAST_HISTORY), jnp.float32)
                + 0.05 * jax.random.normal(keys[0], (1, PAST_HISTORY), jnp.float32),
        "ln_b": 0.05 * jax.random.normal(keys[1], (1, PAST_HISTORY), jnp.float32),
        # LSTM: per layer rows [w_ih, w_hh, b_ih, b_hh], gate order (i, f, g, o)
        "lstm": 0.2 * jax.random.normal(keys[2], (STACK_DEPTH, 4, 4), jnp.float32),
        # ffn1 (torch (LAYER_UNITS, T)) stored transposed as (T, LAYER_UNITS)
        "w1": 0.1 * jax.random.normal(keys[3], (PAST_HISTORY, LAYER_UNITS), jnp.float32),
        "b1": 0.1 * jax.random.normal(keys[4], (1, LAYER_UNITS), jnp.float32),
        # ffn2 (torch (1, LAYER_UNITS)) stored transposed as (LAYER_UNITS, 1)
        "w2": 0.1 * jax.random.normal(keys[5], (LAYER_UNITS, 1), jnp.float32),
        "b2": jnp.full((1, 1), 0.01, jnp.float32),
    }


def _round_up(a, m):
    return (a + m - 1) // m * m


def stockbot_forward(x, params, tile_b=DEFAULT_TILE_B):
    """x: (B, past_history, forward_look=1) -> (B,) like the torch module."""
    B, T, F = x.shape
    assert T == PAST_HISTORY and F == FORWARD_LOOK == 1

    # Batch tile: multiple of 1024 so the per-tile layout (tile_b//128, 128)
    # is made of full (8, 128) vreg tiles.  Shrink for tiny demo batches.
    tile_b = min(tile_b, _round_up(B, 1024))
    assert tile_b % 1024 == 0
    num_tiles = (B + tile_b - 1) // tile_b
    b_pad = num_tiles * tile_b
    sb = tile_b // 128          # sublane rows per tile
    nb = b_pad // 128           # total sublane rows

    # ---- layout plumbing (plain XLA): batch dense over (sublane, lane) ----
    x2 = x.reshape(B, T).astype(jnp.float32)
    if b_pad != B:
        x2 = jnp.pad(x2, ((0, b_pad - B), (0, 0)))
    x3 = x2.T.reshape(T, nb, 128)                    # element (b,t) -> x3[t, b//128, b%128]

    # ---- pack scalar params for SMEM ----
    lstm = params["lstm"].astype(jnp.float32)        # (L, 4, 4)
    lstm_packed = jnp.concatenate(
        [lstm[:, 0, :], lstm[:, 1, :], lstm[:, 2, :] + lstm[:, 3, :]],
        axis=1).reshape(-1)                          # (L*12,) = [wi(4), wh(4), b(4)] per layer

    # Fuse ffn1 -> ffn2 (Linear o Linear, no activation in between).
    w_fused = (params["w1"] @ params["w2"]).reshape(PAST_HISTORY)          # (T,)
    b_fused = (params["b1"] @ params["w2"] + params["b2"]).reshape(1)      # (1,)
    head = jnp.concatenate([w_fused, b_fused]).astype(jnp.float32)         # (T+1,)

    ln_g = params["ln_g"].reshape(PAST_HISTORY).astype(jnp.float32)
    ln_b = params["ln_b"].reshape(PAST_HISTORY).astype(jnp.float32)

    smem = pl.BlockSpec(memory_space=pltpu.MemorySpace.SMEM)
    out = pl.pallas_call(
        stockbot_kernel,
        out_shape=jax.ShapeDtypeStruct((nb, 128), jnp.float32),
        grid=(num_tiles,),
        in_specs=[
            pl.BlockSpec((PAST_HISTORY, sb, 128), lambda i: (0, i, 0)),
            smem, smem, smem, smem,
        ],
        out_specs=pl.BlockSpec((sb, 128), lambda i: (i, 0)),
        compiler_params=pltpu.CompilerParams(
            dimension_semantics=("parallel",)),
    )(x3, ln_g, ln_b, lstm_packed, head)

    y = out.reshape(b_pad)[:B]
    return jnp.squeeze(y)                            # matches final torch.squeeze


def reference_forward(x, params):
    """Pure-JAX reference (same math as the torch module, no Pallas, no fusion)."""
    B, T, _ = x.shape
    xx = x.reshape(B, T).astype(jnp.float32)
    mu = xx.mean(axis=1, keepdims=True)
    var = ((xx - mu) ** 2).mean(axis=1, keepdims=True)
    seq = (xx - mu) / jnp.sqrt(var + LN_EPS) * params["ln_g"] + params["ln_b"]
    for layer in range(STACK_DEPTH):
        p = params["lstm"][layer]
        w_ih, w_hh, b = p[0:1, :], p[1:2, :], p[2:3, :] + p[3:4, :]
        h = jnp.zeros((B, 1), jnp.float32)
        c = jnp.zeros((B, 1), jnp.float32)
        outs = []
        for t in range(T):
            g = seq[:, t:t + 1] * w_ih + h * w_hh + b
            i_g = jax.nn.sigmoid(g[:, 0:1])
            f_g = jax.nn.sigmoid(g[:, 1:2])
            g_g = jnp.tanh(g[:, 2:3])
            o_g = jax.nn.sigmoid(g[:, 3:4])
            c = f_g * c + i_g * g_g
            h = o_g * jnp.tanh(c)
            outs.append(h)
        seq = jnp.concatenate(outs, axis=1)
    y = seq @ params["w1"] + params["b1"]
    y = y @ params["w2"] + params["b2"]
    return jnp.squeeze(y)


if __name__ == "__main__":
    B = 2
    key = jax.random.PRNGKey(0)
    x = jax.random.normal(key, (B, PAST_HISTORY, FORWARD_LOOK), jnp.float32)
    params = make_params()

    out = jax.block_until_ready(stockbot_forward(x, params))
    ref = reference_forward(x, params)

    assert out.shape == (B,), out.shape
    assert jnp.max(jnp.abs(out - ref)) < 5e-4, (out, ref)

    print("KERNEL_OK")
</pallas_src>

<mosaic_0001>
module attributes {stable_mosaic.version = 11 : i64} {
  func.func @stockbot_kernel(%arg0: i32, %arg1: memref<16x8x128xf32, #tpu.memory_space<vmem>>, %arg2: memref<16xf32, #tpu.memory_space<smem>>, %arg3: memref<16xf32, #tpu.memory_space<smem>>, %arg4: memref<24xf32, #tpu.memory_space<smem>>, %arg5: memref<17xf32, #tpu.memory_space<smem>>, %arg6: memref<8x128xf32, #tpu.memory_space<vmem>>) attributes {dimension_semantics = [#tpu.dimension_semantics<parallel>], iteration_bounds = array<i64: 1>, scalar_prefetch = 0 : i64, scratch_operands = 0 : i64, tpu.core_type = #tpu.core_type<tc>, window_params = [{transform_indices = @transform_0, window_bounds = array<i64: 16, 8, 128>}, {transform_indices = @transform_1, window_bounds = array<i64: 16>}, {transform_indices = @transform_2, window_bounds = array<i64: 16>}, {transform_indices = @transform_3, window_bounds = array<i64: 24>}, {transform_indices = @transform_4, window_bounds = array<i64: 17>}, {transform_indices = @transform_5, window_bounds = array<i64: 8, 128>}]} {
    %c0 = arith.constant 0 : index
    %c0_0 = arith.constant 0 : index
    %c0_1 = arith.constant 0 : index
    %0 = vector.load %arg1[%c0, %c0_0, %c0_1] : memref<16x8x128xf32, #tpu.memory_space<vmem>>, vector<1x8x128xf32>
    %1 = vector.shape_cast %0 : vector<1x8x128xf32> to vector<8x128xf32>
    %c1 = arith.constant 1 : index
    %c0_2 = arith.constant 0 : index
    %c0_3 = arith.constant 0 : index
    %2 = vector.load %arg1[%c1, %c0_2, %c0_3] : memref<16x8x128xf32, #tpu.memory_space<vmem>>, vector<1x8x128xf32>
    %3 = vector.shape_cast %2 : vector<1x8x128xf32> to vector<8x128xf32>
    %4 = arith.addf %1, %3 : vector<8x128xf32>
    %c2 = arith.constant 2 : index
    %c0_4 = arith.constant 0 : index
    %c0_5 = arith.constant 0 : index
    %5 = vector.load %arg1[%c2, %c0_4, %c0_5] : memref<16x8x128xf32, #tpu.memory_space<vmem>>, vector<1x8x128xf32>
    %6 = vector.shape_cast %5 : vector<1x8x128xf32> to vector<8x128xf32>
    %7 = arith.addf %4, %6 : vector<8x128xf32>
    %c3 = arith.constant 3 : index
    %c0_6 = arith.constant 0 : index
    %c0_7 = arith.constant 0 : index
    %8 = vector.load %arg1[%c3, %c0_6, %c0_7] : memref<16x8x128xf32, #tpu.memory_space<vmem>>, vector<1x8x128xf32>
    %9 = vector.shape_cast %8 : vector<1x8x128xf32> to vector<8x128xf32>
    %10 = arith.addf %7, %9 : vector<8x128xf32>
    %c4 = arith.constant 4 : index
    %c0_8 = arith.constant 0 : index
    %c0_9 = arith.constant 0 : index
    %11 = vector.load %arg1[%c4, %c0_8, %c0_9] : memref<16x8x128xf32, #tpu.memory_space<vmem>>, vector<1x8x128xf32>
    %12 = vector.shape_cast %11 : vector<1x8x128xf32> to vector<8x128xf32>
    %13 = arith.addf %10, %12 : vector<8x128xf32>
    %c5 = arith.constant 5 : index
    %c0_10 = arith.constant 0 : index
    %c0_11 = arith.constant 0 : index
    %14 = vector.load %arg1[%c5, %c0_10, %c0_11] : memref<16x8x128xf32, #tpu.memory_space<vmem>>, vector<1x8x128xf32>
    %15 = vector.shape_cast %14 : vector<1x8x128xf32> to vector<8x128xf32>
    %16 = arith.addf %13, %15 : vector<8x128xf32>
    %c6 = arith.constant 6 : index
    %c0_12 = arith.constant 0 : index
    %c0_13 = arith.constant 0 : index
    %17 = vector.load %arg1[%c6, %c0_12, %c0_13] : memref<16x8x128xf32, #tpu.memory_space<vmem>>, vector<1x8x128xf32>
    %18 = vector.shape_cast %17 : vector<1x8x128xf32> to vector<8x128xf32>
    %19 = arith.addf %16, %18 : vector<8x128xf32>
    %c7 = arith.constant 7 : index
    %c0_14 = arith.constant 0 : index
    %c0_15 = arith.constant 0 : index
    %20 = vector.load %arg1[%c7, %c0_14, %c0_15] : memref<16x8x128xf32, #tpu.memory_space<vmem>>, vector<1x8x128xf32>
    %21 = vector.shape_cast %20 : vector<1x8x128xf32> to vector<8x128xf32>
    %22 = arith.addf %19, %21 : vector<8x128xf32>
    %c8 = arith.constant 8 : index
    %c0_16 = arith.constant 0 : index
    %c0_17 = arith.constant 0 : index
    %23 = vector.load %arg1[%c8, %c0_16, %c0_17] : memref<16x8x128xf32, #tpu.memory_space<vmem>>, vector<1x8x128xf32>
    %24 = vector.shape_cast %23 : vector<1x8x128xf32> to vector<8x128xf32>
    %25 = arith.addf %22, %24 : vector<8x128xf32>
    %c9 = arith.constant 9 : index
    %c0_18 = arith.constant 0 : index
    %c0_19 = arith.constant 0 : index
    %26 = vector.load %arg1[%c9, %c0_18, %c0_19] : memref<16x8x128xf32, #tpu.memory_space<vmem>>, vector<1x8x128xf32>
    %27 = vector.shape_cast %26 : vector<1x8x128xf32> to vector<8x128xf32>
    %28 = arith.addf %25, %27 : vector<8x128xf32>
    %c10 = arith.constant 10 : index
    %c0_20 = arith.constant 0 : index
    %c0_21 = arith.constant 0 : index
    %29 = vector.load %arg1[%c10, %c0_20, %c0_21] : memref<16x8x128xf32, #tpu.memory_space<vmem>>, vector<1x8x128xf32>
    %30 = vector.shape_cast %29 : vector<1x8x128xf32> to vector<8x128xf32>
    %31 = arith.addf %28, %30 : vector<8x128xf32>
    %c11 = arith.constant 11 : index
    %c0_22 = arith.constant 0 : index
    %c0_23 = arith.constant 0 : index
    %32 = vector.load %arg1[%c11, %c0_22, %c0_23] : memref<16x8x128xf32, #tpu.memory_space<vmem>>, vector<1x8x128xf32>
    %33 = vector.shape_cast %32 : vector<1x8x128xf32> to vector<8x128xf32>
    %34 = arith.addf %31, %33 : vector<8x128xf32>
    %c12 = arith.constant 12 : index
    %c0_24 = arith.constant 0 : index
    %c0_25 = arith.constant 0 : index
    %35 = vector.load %arg1[%c12, %c0_24, %c0_25] : memref<16x8x128xf32, #tpu.memory_space<vmem>>, vector<1x8x128xf32>
    %36 = vector.shape_cast %35 : vector<1x8x128xf32> to vector<8x128xf32>
    %37 = arith.addf %34, %36 : vector<8x128xf32>
    %c13 = arith.constant 13 : index
    %c0_26 = arith.constant 0 : index
    %c0_27 = arith.constant 0 : index
    %38 = vector.load %arg1[%c13, %c0_26, %c0_27] : memref<16x8x128xf32, #tpu.memory_space<vmem>>, vector<1x8x128xf32>
    %39 = vector.shape_cast %38 : vector<1x8x128xf32> to vector<8x128xf32>
    %40 = arith.addf %37, %39 : vector<8x128xf32>
    %c14 = arith.constant 14 : index
    %c0_28 = arith.constant 0 : index
    %c0_29 = arith.constant 0 : index
    %41 = vector.load %arg1[%c14, %c0_28, %c0_29] : memref<16x8x128xf32, #tpu.memory_space<vmem>>, vector<1x8x128xf32>
    %42 = vector.shape_cast %41 : vector<1x8x128xf32> to vector<8x128xf32>
    %43 = arith.addf %40, %42 : vector<8x128xf32>
    %c15 = arith.constant 15 : index
    %c0_30 = arith.constant 0 : index
    %c0_31 = arith.constant 0 : index
    %44 = vector.load %arg1[%c15, %c0_30, %c0_31] : memref<16x8x128xf32, #tpu.memory_space<vmem>>, vector<1x8x128xf32>
    %45 = vector.shape_cast %44 : vector<1x8x128xf32> to vector<8x128xf32>
    %46 = arith.addf %43, %45 : vector<8x128xf32>
    %cst = arith.constant 6.250000e-02 : f32
    %47 = vector.broadcast %cst : f32 to vector<8x128xf32>
    %48 = arith.mulf %46, %47 : vector<8x128xf32>
    %c0_32 = arith.constant 0 : index
    %c0_33 = arith.constant 0 : index
    %c0_34 = arith.constant 0 : index
    %49 = vector.load %arg1[%c0_32, %c0_33, %c0_34] : memref<16x8x128xf32, #tpu.memory_space<vmem>>, vector<1x8x128xf32>
    %50 = vector.shape_cast %49 : vector<1x8x128xf32> to vector<8x128xf32>
    %51 = arith.subf %50, %48 : vector<8x128xf32>
    %52 = arith.mulf %51, %51 : vector<8x128xf32>
    %c1_35 = arith.constant 1 : index
    %c0_36 = arith.constant 0 : index
    %c0_37 = arith.constant 0 : index
    %53 = vector.load %arg1[%c1_35, %c0_36, %c0_37] : memref<16x8x128xf32, #tpu.memory_space<vmem>>, vector<1x8x128xf32>
    %54 = vector.shape_cast %53 : vector<1x8x128xf32> to vector<8x128xf32>
    %55 = arith.subf %54, %48 : vector<8x128xf32>
    %56 = arith.mulf %55, %55 : vector<8x128xf32>
    %57 = arith.addf %52, %56 : vector<8x128xf32>
    %c2_38 = arith.constant 2 : index
    %c0_39 = arith.constant 0 : index
    %c0_40 = arith.constant 0 : index
    %58 = vector.load %arg1[%c2_38, %c0_39, %c0_40] : memref<16x8x128xf32, #tpu.memory_space<vmem>>, vector<1x8x128xf32>
    %59 = vector.shape_cast %58 : vector<1x8x128xf32> to vector<8x128xf32>
    %60 = arith.subf %59, %48 : vector<8x128xf32>
    %61 = arith.mulf %60, %60 : vector<8x128xf32>
    %62 = arith.addf %57, %61 : vector<8x128xf32>
    %c3_41 = arith.constant 3 : index
    %c0_42 = arith.constant 0 : index
    %c0_43 = arith.constant 0 : index
    %63 = vector.load %arg1[%c3_41, %c0_42, %c0_43] : memref<16x8x128xf32, #tpu.memory_space<vmem>>, vector<1x8x128xf32>
    %64 = vector.shape_cast %63 : vector<1x8x128xf32> to vector<8x128xf32>
    %65 = arith.subf %64, %48 : vector<8x128xf32>
    %66 = arith.mulf %65, %65 : vector<8x128xf32>
    %67 = arith.addf %62, %66 : vector<8x128xf32>
    %c4_44 = arith.constant 4 : index
    %c0_45 = arith.constant 0 : index
    %c0_46 = arith.constant 0 : index
    %68 = vector.load %arg1[%c4_44, %c0_45, %c0_46] : memref<16x8x128xf32, #tpu.memory_space<vmem>>, vector<1x8x128xf32>
    %69 = vector.shape_cast %68 : vector<1x8x128xf32> to vector<8x128xf32>
    %70 = arith.subf %69, %48 : vector<8x128xf32>
    %71 = arith.mulf %70, %70 : vector<8x128xf32>
    %72 = arith.addf %67, %71 : vector<8x128xf32>
    %c5_47 = arith.constant 5 : index
    %c0_48 = arith.constant 0 : index
    %c0_49 = arith.constant 0 : index
    %73 = vector.load %arg1[%c5_47, %c0_48, %c0_49] : memref<16x8x128xf32, #tpu.memory_space<vmem>>, vector<1x8x128xf32>
    %74 = vector.shape_cast %73 : vector<1x8x128xf32> to vector<8x128xf32>
    %75 = arith.subf %74, %48 : vector<8x128xf32>
    %76 = arith.mulf %75, %75 : vector<8x128xf32>
    %77 = arith.addf %72, %76 : vector<8x128xf32>
    %c6_50 = arith.constant 6 : index
    %c0_51 = arith.constant 0 : index
    %c0_52 = arith.constant 0 : index
    %78 = vector.load %arg1[%c6_50, %c0_51, %c0_52] : memref<16x8x128xf32, #tpu.memory_space<vmem>>, vector<1x8x128xf32>
    %79 = vector.shape_cast %78 : vector<1x8x128xf32> to vector<8x128xf32>
    %80 = arith.subf %79, %48 : vector<8x128xf32>
    %81 = arith.mulf %80, %80 : vector<8x128xf32>
    %82 = arith.addf %77, %81 : vector<8x128xf32>
    %c7_53 = arith.constant 7 : index
    %c0_54 = arith.constant 0 : index
    %c0_55 = arith.constant 0 : index
    %83 = vector.load %arg1[%c7_53, %c0_54, %c0_55] : memref<16x8x128xf32, #tpu.memory_space<vmem>>, vector<1x8x128xf32>
    %84 = vector.shape_cast %83 : vector<1x8x128xf32> to vector<8x128xf32>
    %85 = arith.subf %84, %48 : vector<8x128xf32>
    %86 = arith.mulf %85, %85 : vector<8x128xf32>
    %87 = arith.addf %82, %86 : vector<8x128xf32>
    %c8_56 = arith.constant 8 : index
    %c0_57 = arith.constant 0 : index
    %c0_58 = arith.constant 0 : index
    %88 = vector.load %arg1[%c8_56, %c0_57, %c0_58] : memref<16x8x128xf32, #tpu.memory_space<vmem>>, vector<1x8x128xf32>
    %89 = vector.shape_cast %88 : vector<1x8x128xf32> to vector<8x128xf32>
    %90 = arith.subf %89, %48 : vector<8x128xf32>
    %91 = arith.mulf %90, %90 : vector<8x128xf32>
    %92 = arith.addf %87, %91 : vector<8x128xf32>
    %c9_59 = arith.constant 9 : index
    %c0_60 = arith.constant 0 : index
    %c0_61 = arith.constant 0 : index
    %93 = vector.load %arg1[%c9_59, %c0_60, %c0_61] : memref<16x8x128xf32, #tpu.memory_space<vmem>>, vector<1x8x128xf32>
    %94 = vector.shape_cast %93 : vector<1x8x128xf32> to vector<8x128xf32>
    %95 = arith.subf %94, %48 : vector<8x128xf32>
    %96 = arith.mulf %95, %95 : vector<8x128xf32>
    %97 = arith.addf %92, %96 : vector<8x128xf32>
    %c10_62 = arith.constant 10 : index
    %c0_63 = arith.constant 0 : index
    %c0_64 = arith.constant 0 : index
    %98 = vector.load %arg1[%c10_62, %c0_63, %c0_64] : memref<16x8x128xf32, #tpu.memory_space<vmem>>, vector<1x8x128xf32>
    %99 = vector.shape_cast %98 : vector<1x8x128xf32> to vector<8x128xf32>
    %100 = arith.subf %99, %48 : vector<8x128xf32>
    %101 = arith.mulf %100, %100 : vector<8x128xf32>
    %102 = arith.addf %97, %101 : vector<8x128xf32>
    %c11_65 = arith.constant 11 : index
    %c0_66 = arith.constant 0 : index
    %c0_67 = arith.constant 0 : index
    %103 = vector.load %arg1[%c11_65, %c0_66, %c0_67] : memref<16x8x128xf32, #tpu.memory_space<vmem>>, vector<1x8x128xf32>
    %104 = vector.shape_cast %103 : vector<1x8x128xf32> to vector<8x128xf32>
    %105 = arith.subf %104, %48 : vector<8x128xf32>
    %106 = arith.mulf %105, %105 : vector<8x128xf32>
    %107 = arith.addf %102, %106 : vector<8x128xf32>
    %c12_68 = arith.constant 12 : index
    %c0_69 = arith.constant 0 : index
    %c0_70 = arith.constant 0 : index
    %108 = vector.load %arg1[%c12_68, %c0_69, %c0_70] : memref<16x8x128xf32, #tpu.memory_space<vmem>>, vector<1x8x128xf32>
    %109 = vector.shape_cast %108 : vector<1x8x128xf32> to vector<8x128xf32>
    %110 = arith.subf %109, %48 : vector<8x128xf32>
    %111 = arith.mulf %110, %110 : vector<8x128xf32>
    %112 = arith.addf %107, %111 : vector<8x128xf32>
    %c13_71 = arith.constant 13 : index
    %c0_72 = arith.constant 0 : index
    %c0_73 = arith.constant 0 : index
    %113 = vector.load %arg1[%c13_71, %c0_72, %c0_73] : memref<16x8x128xf32, #tpu.memory_space<vmem>>, vector<1x8x128xf32>
    %114 = vector.shape_cast %113 : vector<1x8x128xf32> to vector<8x128xf32>
    %115 = arith.subf %114, %48 : vector<8x128xf32>
    %116 = arith.mulf %115, %115 : vector<8x128xf32>
    %117 = arith.addf %112, %116 : vector<8x128xf32>
    %c14_74 = arith.constant 14 : index
    %c0_75 = arith.constant 0 : index
    %c0_76 = arith.constant 0 : index
    %118 = vector.load %arg1[%c14_74, %c0_75, %c0_76] : memref<16x8x128xf32, #tpu.memory_space<vmem>>, vector<1x8x128xf32>
    %119 = vector.shape_cast %118 : vector<1x8x128xf32> to vector<8x128xf32>
    %120 = arith.subf %119, %48 : vector<8x128xf32>
    %121 = arith.mulf %120, %120 : vector<8x128xf32>
    %122 = arith.addf %117, %121 : vector<8x128xf32>
    %c15_77 = arith.constant 15 : index
    %c0_78 = arith.constant 0 : index
    %c0_79 = arith.constant 0 : index
    %123 = vector.load %arg1[%c15_77, %c0_78, %c0_79] : memref<16x8x128xf32, #tpu.memory_space<vmem>>, vector<1x8x128xf32>
    %124 = vector.shape_cast %123 : vector<1x8x128xf32> to vector<8x128xf32>
    %125 = arith.subf %124, %48 : vector<8x128xf32>
    %126 = arith.mulf %125, %125 : vector<8x128xf32>
    %127 = arith.addf %122, %126 : vector<8x128xf32>
    %cst_80 = arith.constant 6.250000e-02 : f32
    %128 = vector.broadcast %cst_80 : f32 to vector<8x128xf32>
    %129 = arith.mulf %127, %128 : vector<8x128xf32>
    %cst_81 = arith.constant 9.99999974E-6 : f32
    %130 = vector.broadcast %cst_81 : f32 to vector<8x128xf32>
    %131 = arith.addf %129, %130 : vector<8x128xf32>
    %132 = math.rsqrt %131 : vector<8x128xf32>
    %c0_82 = arith.constant 0 : index
    %133 = memref.load %arg4[%c0_82] : memref<24xf32, #tpu.memory_space<smem>>
    %c1_83 = arith.constant 1 : index
    %134 = memref.load %arg4[%c1_83] : memref<24xf32, #tpu.memory_space<smem>>
    %c2_84 = arith.constant 2 : index
    %135 = memref.load %arg4[%c2_84] : memref<24xf32, #tpu.memory_space<smem>>
    %c3_85 = arith.constant 3 : index
    %136 = memref.load %arg4[%c3_85] : memref<24xf32, #tpu.memory_space<smem>>
    %c4_86 = arith.constant 4 : index
    %137 = memref.load %arg4[%c4_86] : memref<24xf32, #tpu.memory_space<smem>>
    %c5_87 = arith.constant 5 : index
    %138 = memref.load %arg4[%c5_87] : memref<24xf32, #tpu.memory_space<smem>>
    %c6_88 = arith.constant 6 : index
    %139 = memref.load %arg4[%c6_88] : memref<24xf32, #tpu.memory_space<smem>>
    %c7_89 = arith.constant 7 : index
    %140 = memref.load %arg4[%c7_89] : memref<24xf32, #tpu.memory_space<smem>>
    %c8_90 = arith.constant 8 : index
    %141 = memref.load %arg4[%c8_90] : memref<24xf32, #tpu.memory_space<smem>>
    %c9_91 = arith.constant 9 : index
    %142 = memref.load %arg4[%c9_91] : memref<24xf32, #tpu.memory_space<smem>>
    %c10_92 = arith.constant 10 : index
    %143 = memref.load %arg4[%c10_92] : memref<24xf32, #tpu.memory_space<smem>>
    %c11_93 = arith.constant 11 : index
    %144 = memref.load %arg4[%c11_93] : memref<24xf32, #tpu.memory_space<smem>>
    %c12_94 = arith.constant 12 : index
    %145 = memref.load %arg4[%c12_94] : memref<24xf32, #tpu.memory_space<smem>>
    %c13_95 = arith.constant 13 : index
    %146 = memref.load %arg4[%c13_95] : memref<24xf32, #tpu.memory_space<smem>>
    %c14_96 = arith.constant 14 : index
    %147 = memref.load %arg4[%c14_96] : memref<24xf32, #tpu.memory_space<smem>>
    %c15_97 = arith.constant 15 : index
    %148 = memref.load %arg4[%c15_97] : memref<24xf32, #tpu.memory_space<smem>>
    %c16 = arith.constant 16 : index
    %149 = memref.load %arg4[%c16] : memref<24xf32, #tpu.memory_space<smem>>
    %c17 = arith.constant 17 : index
    %150 = memref.load %arg4[%c17] : memref<24xf32, #tpu.memory_space<smem>>
    %c18 = arith.constant 18 : index
    %151 = memref.load %arg4[%c18] : memref<24xf32, #tpu.memory_space<smem>>
    %c19 = arith.constant 19 : index
    %152 = memref.load %arg4[%c19] : memref<24xf32, #tpu.memory_space<smem>>
    %c20 = arith.constant 20 : index
    %153 = memref.load %arg4[%c20] : memref<24xf32, #tpu.memory_space<smem>>
    %c21 = arith.constant 21 : index
    %154 = memref.load %arg4[%c21] : memref<24xf32, #tpu.memory_space<smem>>
    %c22 = arith.constant 22 : index
    %155 = memref.load %arg4[%c22] : memref<24xf32, #tpu.memory_space<smem>>
    %c23 = arith.constant 23 : index
    %156 = memref.load %arg4[%c23] : memref<24xf32, #tpu.memory_space<smem>>
    %c0_98 = arith.constant 0 : index
    %157 = memref.load %arg5[%c0_98] : memref<17xf32, #tpu.memory_space<smem>>
    %c1_99 = arith.constant 1 : index
    %158 = memref.load %arg5[%c1_99] : memref<17xf32, #tpu.memory_space<smem>>
    %c2_100 = arith.constant 2 : index
    %159 = memref.load %arg5[%c2_100] : memref<17xf32, #tpu.memory_space<smem>>
    %c3_101 = arith.constant 3 : index
    %160 = memref.load %arg5[%c3_101] : memref<17xf32, #tpu.memory_space<smem>>
    %c4_102 = arith.constant 4 : index
    %161 = memref.load %arg5[%c4_102] : memref<17xf32, #tpu.memory_space<smem>>
    %c5_103 = arith.constant 5 : index
    %162 = memref.load %arg5[%c5_103] : memref<17xf32, #tpu.memory_space<smem>>
    %c6_104 = arith.constant 6 : index
    %163 = memref.load %arg5[%c6_104] : memref<17xf32, #tpu.memory_space<smem>>
    %c7_105 = arith.constant 7 : index
    %164 = memref.load %arg5[%c7_105] : memref<17xf32, #tpu.memory_space<smem>>
    %c8_106 = arith.constant 8 : index
    %165 = memref.load %arg5[%c8_106] : memref<17xf32, #tpu.memory_space<smem>>
    %c9_107 = arith.constant 9 : index
    %166 = memref.load %arg5[%c9_107] : memref<17xf32, #tpu.memory_space<smem>>
    %c10_108 = arith.constant 10 : index
    %167 = memref.load %arg5[%c10_108] : memref<17xf32, #tpu.memory_space<smem>>
    %c11_109 = arith.constant 11 : index
    %168 = memref.load %arg5[%c11_109] : memref<17xf32, #tpu.memory_space<smem>>
    %c12_110 = arith.constant 12 : index
    %169 = memref.load %arg5[%c12_110] : memref<17xf32, #tpu.memory_space<smem>>
    %c13_111 = arith.constant 13 : index
    %170 = memref.load %arg5[%c13_111] : memref<17xf32, #tpu.memory_space<smem>>
    %c14_112 = arith.constant 14 : index
    %171 = memref.load %arg5[%c14_112] : memref<17xf32, #tpu.memory_space<smem>>
    %c15_113 = arith.constant 15 : index
    %172 = memref.load %arg5[%c15_113] : memref<17xf32, #tpu.memory_space<smem>>
    %c16_114 = arith.constant 16 : index
    %173 = memref.load %arg5[%c16_114] : memref<17xf32, #tpu.memory_space<smem>>
    %c0_115 = arith.constant 0 : index
    %174 = memref.load %arg2[%c0_115] : memref<16xf32, #tpu.memory_space<smem>>
    %c1_116 = arith.constant 1 : index
    %175 = memref.load %arg2[%c1_116] : memref<16xf32, #tpu.memory_space<smem>>
    %c2_117 = arith.constant 2 : index
    %176 = memref.load %arg2[%c2_117] : memref<16xf32, #tpu.memory_space<smem>>
    %c3_118 = arith.constant 3 : index
    %177 = memref.load %arg2[%c3_118] : memref<16xf32, #tpu.memory_space<smem>>
    %c4_119 = arith.constant 4 : index
    %178 = memref.load %arg2[%c4_119] : memref<16xf32, #tpu.memory_space<smem>>
    %c5_120 = arith.constant 5 : index
    %179 = memref.load %arg2[%c5_120] : memref<16xf32, #tpu.memory_space<smem>>
    %c6_121 = arith.constant 6 : index
    %180 = memref.load %arg2[%c6_121] : memref<16xf32, #tpu.memory_space<smem>>
    %c7_122 = arith.constant 7 : index
    %181 = memref.load %arg2[%c7_122] : memref<16xf32, #tpu.memory_space<smem>>
    %c8_123 = arith.constant 8 : index
    %182 = memref.load %arg2[%c8_123] : memref<16xf32, #tpu.memory_space<smem>>
    %c9_124 = arith.constant 9 : index
    %183 = memref.load %arg2[%c9_124] : memref<16xf32, #tpu.memory_space<smem>>
    %c10_125 = arith.constant 10 : index
    %184 = memref.load %arg2[%c10_125] : memref<16xf32, #tpu.memory_space<smem>>
    %c11_126 = arith.constant 11 : index
    %185 = memref.load %arg2[%c11_126] : memref<16xf32, #tpu.memory_space<smem>>
    %c12_127 = arith.constant 12 : index
    %186 = memref.load %arg2[%c12_127] : memref<16xf32, #tpu.memory_space<smem>>
    %c13_128 = arith.constant 13 : index
    %187 = memref.load %arg2[%c13_128] : memref<16xf32, #tpu.memory_space<smem>>
    %c14_129 = arith.constant 14 : index
    %188 = memref.load %arg2[%c14_129] : memref<16xf32, #tpu.memory_space<smem>>
    %c15_130 = arith.constant 15 : index
    %189 = memref.load %arg2[%c15_130] : memref<16xf32, #tpu.memory_space<smem>>
    %c0_131 = arith.constant 0 : index
    %190 = memref.load %arg3[%c0_131] : memref<16xf32, #tpu.memory_space<smem>>
    %c1_132 = arith.constant 1 : index
    %191 = memref.load %arg3[%c1_132] : memref<16xf32, #tpu.memory_space<smem>>
    %c2_133 = arith.constant 2 : index
    %192 = memref.load %arg3[%c2_133] : memref<16xf32, #tpu.memory_space<smem>>
    %c3_134 = arith.constant 3 : index
    %193 = memref.load %arg3[%c3_134] : memref<16xf32, #tpu.memory_space<smem>>
    %c4_135 = arith.constant 4 : index
    %194 = memref.load %arg3[%c4_135] : memref<16xf32, #tpu.memory_space<smem>>
    %c5_136 = arith.constant 5 : index
    %195 = memref.load %arg3[%c5_136] : memref<16xf32, #tpu.memory_space<smem>>
    %c6_137 = arith.constant 6 : index
    %196 = memref.load %arg3[%c6_137] : memref<16xf32, #tpu.memory_space<smem>>
    %c7_138 = arith.constant 7 : index
    %197 = memref.load %arg3[%c7_138] : memref<16xf32, #tpu.memory_space<smem>>
    %c8_139 = arith.constant 8 : index
    %198 = memref.load %arg3[%c8_139] : memref<16xf32, #tpu.memory_space<smem>>
    %c9_140 = arith.constant 9 : index
    %199 = memref.load %arg3[%c9_140] : memref<16xf32, #tpu.memory_space<smem>>
    %c10_141 = arith.constant 10 : index
    %200 = memref.load %arg3[%c10_141] : memref<16xf32, #tpu.memory_space<smem>>
    %c11_142 = arith.constant 11 : index
    %201 = memref.load %arg3[%c11_142] : memref<16xf32, #tpu.memory_space<smem>>
    %c12_143 = arith.constant 12 : index
    %202 = memref.load %arg3[%c12_143] : memref<16xf32, #tpu.memory_space<smem>>
    %c13_144 = arith.constant 13 : index
    %203 = memref.load %arg3[%c13_144] : memref<16xf32, #tpu.memory_space<smem>>
    %c14_145 = arith.constant 14 : index
    %204 = memref.load %arg3[%c14_145] : memref<16xf32, #tpu.memory_space<smem>>
    %c15_146 = arith.constant 15 : index
    %205 = memref.load %arg3[%c15_146] : memref<16xf32, #tpu.memory_space<smem>>
    %cst_147 = arith.constant 0.000000e+00 : f32
    %206 = vector.broadcast %cst_147 : f32 to vector<8x128xf32>
    %c0_148 = arith.constant 0 : index
    %c0_149 = arith.constant 0 : index
    %c0_150 = arith.constant 0 : index
    %207 = vector.load %arg1[%c0_148, %c0_149, %c0_150] : memref<16x8x128xf32, #tpu.memory_space<vmem>>, vector<1x8x128xf32>
    %208 = vector.shape_cast %207 : vector<1x8x128xf32> to vector<8x128xf32>
    %209 = arith.subf %208, %48 : vector<8x128xf32>
    %210 = arith.mulf %209, %132 : vector<8x128xf32>
    %211 = vector.broadcast %174 : f32 to vector<8x128xf32>
    %212 = arith.mulf %210, %211 : vector<8x128xf32>
    %213 = vector.broadcast %190 : f32 to vector<8x128xf32>
    %214 = arith.addf %212, %213 : vector<8x128xf32>
    %215 = vector.broadcast %133 : f32 to vector<8x128xf32>
    %216 = arith.mulf %215, %214 : vector<8x128xf32>
    %217 = vector.broadcast %137 : f32 to vector<8x128xf32>
    %218 = arith.mulf %217, %206 : vector<8x128xf32>
    %219 = arith.addf %216, %218 : vector<8x128xf32>
    %220 = vector.broadcast %141 : f32 to vector<8x128xf32>
    %221 = arith.addf %219, %220 : vector<8x128xf32>
    %222 = arith.negf %221 : vector<8x128xf32>
    %223 = math.exp %222 : vector<8x128xf32>
    %cst_151 = arith.constant 1.000000e+00 : f32
    %224 = vector.broadcast %cst_151 : f32 to vector<8x128xf32>
    %225 = arith.addf %224, %223 : vector<8x128xf32>
    %226 = arith.divf %224, %225 : vector<8x128xf32>
    %227 = vector.broadcast %134 : f32 to vector<8x128xf32>
    %228 = arith.mulf %227, %214 : vector<8x128xf32>
    %229 = vector.broadcast %138 : f32 to vector<8x128xf32>
    %230 = arith.mulf %229, %206 : vector<8x128xf32>
    %231 = arith.addf %228, %230 : vector<8x128xf32>
    %232 = vector.broadcast %142 : f32 to vector<8x128xf32>
    %233 = arith.addf %231, %232 : vector<8x128xf32>
    %234 = arith.negf %233 : vector<8x128xf32>
    %235 = math.exp %234 : vector<8x128xf32>
    %cst_152 = arith.constant 1.000000e+00 : f32
    %236 = vector.broadcast %cst_152 : f32 to vector<8x128xf32>
    %237 = arith.addf %236, %235 : vector<8x128xf32>
    %238 = arith.divf %236, %237 : vector<8x128xf32>
    %239 = vector.broadcast %135 : f32 to vector<8x128xf32>
    %240 = arith.mulf %239, %214 : vector<8x128xf32>
    %241 = vector.broadcast %139 : f32 to vector<8x128xf32>
    %242 = arith.mulf %241, %206 : vector<8x128xf32>
    %243 = arith.addf %240, %242 : vector<8x128xf32>
    %244 = vector.broadcast %143 : f32 to vector<8x128xf32>
    %245 = arith.addf %243, %244 : vector<8x128xf32>
    %246 = math.tanh %245 : vector<8x128xf32>
    %247 = vector.broadcast %136 : f32 to vector<8x128xf32>
    %248 = arith.mulf %247, %214 : vector<8x128xf32>
    %249 = vector.broadcast %140 : f32 to vector<8x128xf32>
    %250 = arith.mulf %249, %206 : vector<8x128xf32>
    %251 = arith.addf %248, %250 : vector<8x128xf32>
    %252 = vector.broadcast %144 : f32 to vector<8x128xf32>
    %253 = arith.addf %251, %252 : vector<8x128xf32>
    %254 = arith.negf %253 : vector<8x128xf32>
    %255 = math.exp %254 : vector<8x128xf32>
    %cst_153 = arith.constant 1.000000e+00 : f32
    %256 = vector.broadcast %cst_153 : f32 to vector<8x128xf32>
    %257 = arith.addf %256, %255 : vector<8x128xf32>
    %258 = arith.divf %256, %257 : vector<8x128xf32>
    %259 = arith.mulf %238, %206 : vector<8x128xf32>
    %260 = arith.mulf %226, %246 : vector<8x128xf32>
    %261 = arith.addf %259, %260 : vector<8x128xf32>
    %262 = math.tanh %261 : vector<8x128xf32>
    %263 = arith.mulf %258, %262 : vector<8x128xf32>
    %264 = vector.broadcast %145 : f32 to vector<8x128xf32>
    %265 = arith.mulf %264, %263 : vector<8x128xf32>
    %266 = vector.broadcast %149 : f32 to vector<8x128xf32>
    %267 = arith.mulf %266, %206 : vector<8x128xf32>
    %268 = arith.addf %265, %267 : vector<8x128xf32>
    %269 = vector.broadcast %153 : f32 to vector<8x128xf32>
    %270 = arith.addf %268, %269 : vector<8x128xf32>
    %271 = arith.negf %270 : vector<8x128xf32>
    %272 = math.exp %271 : vector<8x128xf32>
    %cst_154 = arith.constant 1.000000e+00 : f32
    %273 = vector.broadcast %cst_154 : f32 to vector<8x128xf32>
    %274 = arith.addf %273, %272 : vector<8x128xf32>
    %275 = arith.divf %273, %274 : vector<8x128xf32>
    %276 = vector.broadcast %146 : f32 to vector<8x128xf32>
    %277 = arith.mulf %276, %263 : vector<8x128xf32>
    %278 = vector.broadcast %150 : f32 to vector<8x128xf32>
    %279 = arith.mulf %278, %206 : vector<8x128xf32>
    %280 = arith.addf %277, %279 : vector<8x128xf32>
    %281 = vector.broadcast %154 : f32 to vector<8x128xf32>
    %282 = arith.addf %280, %281 : vector<8x128xf32>
    %283 = arith.negf %282 : vector<8x128xf32>
    %284 = math.exp %283 : vector<8x128xf32>
    %cst_155 = arith.constant 1.000000e+00 : f32
    %285 = vector.broadcast %cst_155 : f32 to vector<8x128xf32>
    %286 = arith.addf %285, %284 : vector<8x128xf32>
    %287 = arith.divf %285, %286 : vector<8x128xf32>
    %288 = vector.broadcast %147 : f32 to vector<8x128xf32>
    %289 = arith.mulf %288, %263 : vector<8x128xf32>
    %290 = vector.broadcast %151 : f32 to vector<8x128xf32>
    %291 = arith.mulf %290, %206 : vector<8x128xf32>
    %292 = arith.addf %289, %291 : vector<8x128xf32>
    %293 = vector.broadcast %155 : f32 to vector<8x128xf32>
    %294 = arith.addf %292, %293 : vector<8x128xf32>
    %295 = math.tanh %294 : vector<8x128xf32>
    %296 = vector.broadcast %148 : f32 to vector<8x128xf32>
    %297 = arith.mulf %296, %263 : vector<8x128xf32>
    %298 = vector.broadcast %152 : f32 to vector<8x128xf32>
    %299 = arith.mulf %298, %206 : vector<8x128xf32>
    %300 = arith.addf %297, %299 : vector<8x128xf32>
    %301 = vector.broadcast %156 : f32 to vector<8x128xf32>
    %302 = arith.addf %300, %301 : vector<8x128xf32>
    %303 = arith.negf %302 : vector<8x128xf32>
    %304 = math.exp %303 : vector<8x128xf32>
    %cst_156 = arith.constant 1.000000e+00 : f32
    %305 = vector.broadcast %cst_156 : f32 to vector<8x128xf32>
    %306 = arith.addf %305, %304 : vector<8x128xf32>
    %307 = arith.divf %305, %306 : vector<8x128xf32>
    %308 = arith.mulf %287, %206 : vector<8x128xf32>
    %309 = arith.mulf %275, %295 : vector<8x128xf32>
    %310 = arith.addf %308, %309 : vector<8x128xf32>
    %311 = math.tanh %310 : vector<8x128xf32>
    %312 = arith.mulf %307, %311 : vector<8x128xf32>
    %313 = vector.broadcast %157 : f32 to vector<8x128xf32>
    %314 = arith.mulf %313, %312 : vector<8x128xf32>
    %315 = arith.addf %206, %314 : vector<8x128xf32>
    %c1_157 = arith.constant 1 : index
    %c0_158 = arith.constant 0 : index
    %c0_159 = arith.constant 0 : index
    %316 = vector.load %arg1[%c1_157, %c0_158, %c0_159] : memref<16x8x128xf32, #tpu.memory_space<vmem>>, vector<1x8x128xf32>
    %317 = vector.shape_cast %316 : vector<1x8x128xf32> to vector<8x128xf32>
    %318 = arith.subf %317, %48 : vector<8x128xf32>
    %319 = arith.mulf %318, %132 : vector<8x128xf32>
    %320 = vector.broadcast %175 : f32 to vector<8x128xf32>
    %321 = arith.mulf %319, %320 : vector<8x128xf32>
    %322 = vector.broadcast %191 : f32 to vector<8x128xf32>
    %323 = arith.addf %321, %322 : vector<8x128xf32>
    %324 = vector.broadcast %133 : f32 to vector<8x128xf32>
    %325 = arith.mulf %324, %323 : vector<8x128xf32>
    %326 = vector.broadcast %137 : f32 to vector<8x128xf32>
    %327 = arith.mulf %326, %263 : vector<8x128xf32>
    %328 = arith.addf %325, %327 : vector<8x128xf32>
    %329 = vector.broadcast %141 : f32 to vector<8x128xf32>
    %330 = arith.addf %328, %329 : vector<8x128xf32>
    %331 = arith.negf %330 : vector<8x128xf32>
    %332 = math.exp %331 : vector<8x128xf32>
    %cst_160 = arith.constant 1.000000e+00 : f32
    %333 = vector.broadcast %cst_160 : f32 to vector<8x128xf32>
    %334 = arith.addf %333, %332 : vector<8x128xf32>
    %335 = arith.divf %333, %334 : vector<8x128xf32>
    %336 = vector.broadcast %134 : f32 to vector<8x128xf32>
    %337 = arith.mulf %336, %323 : vector<8x128xf32>
    %338 = vector.broadcast %138 : f32 to vector<8x128xf32>
    %339 = arith.mulf %338, %263 : vector<8x128xf32>
    %340 = arith.addf %337, %339 : vector<8x128xf32>
    %341 = vector.broadcast %142 : f32 to vector<8x128xf32>
    %342 = arith.addf %340, %341 : vector<8x128xf32>
    %343 = arith.negf %342 : vector<8x128xf32>
    %344 = math.exp %343 : vector<8x128xf32>
    %cst_161 = arith.constant 1.000000e+00 : f32
    %345 = vector.broadcast %cst_161 : f32 to vector<8x128xf32>
    %346 = arith.addf %345, %344 : vector<8x128xf32>
    %347 = arith.divf %345, %346 : vector<8x128xf32>
    %348 = vector.broadcast %135 : f32 to vector<8x128xf32>
    %349 = arith.mulf %348, %323 : vector<8x128xf32>
    %350 = vector.broadcast %139 : f32 to vector<8x128xf32>
    %351 = arith.mulf %350, %263 : vector<8x128xf32>
    %352 = arith.addf %349, %351 : vector<8x128xf32>
    %353 = vector.broadcast %143 : f32 to vector<8x128xf32>
    %354 = arith.addf %352, %353 : vector<8x128xf32>
    %355 = math.tanh %354 : vector<8x128xf32>
    %356 = vector.broadcast %136 : f32 to vector<8x128xf32>
    %357 = arith.mulf %356, %323 : vector<8x128xf32>
    %358 = vector.broadcast %140 : f32 to vector<8x128xf32>
    %359 = arith.mulf %358, %263 : vector<8x128xf32>
    %360 = arith.addf %357, %359 : vector<8x128xf32>
    %361 = vector.broadcast %144 : f32 to vector<8x128xf32>
    %362 = arith.addf %360, %361 : vector<8x128xf32>
    %363 = arith.negf %362 : vector<8x128xf32>
    %364 = math.exp %363 : vector<8x128xf32>
    %cst_162 = arith.constant 1.000000e+00 : f32
    %365 = vector.broadcast %cst_162 : f32 to vector<8x128xf32>
    %366 = arith.addf %365, %364 : vector<8x128xf32>
    %367 = arith.divf %365, %366 : vector<8x128xf32>
    %368 = arith.mulf %347, %261 : vector<8x128xf32>
    %369 = arith.mulf %335, %355 : vector<8x128xf32>
    %370 = arith.addf %368, %369 : vector<8x128xf32>
    %371 = math.tanh %370 : vector<8x128xf32>
    %372 = arith.mulf %367, %371 : vector<8x128xf32>
    %373 = vector.broadcast %145 : f32 to vector<8x128xf32>
    %374 = arith.mulf %373, %372 : vector<8x128xf32>
    %375 = vector.broadcast %149 : f32 to vector<8x128xf32>
    %376 = arith.mulf %375, %312 : vector<8x128xf32>
    %377 = arith.addf %374, %376 : vector<8x128xf32>
    %378 = vector.broadcast %153 : f32 to vector<8x128xf32>
    %379 = arith.addf %377, %378 : vector<8x128xf32>
    %380 = arith.negf %379 : vector<8x128xf32>
    %381 = math.exp %380 : vector<8x128xf32>
    %cst_163 = arith.constant 1.000000e+00 : f32
    %382 = vector.broadcast %cst_163 : f32 to vector<8x128xf32>
    %383 = arith.addf %382, %381 : vector<8x128xf32>
    %384 = arith.divf %382, %383 : vector<8x128xf32>
    %385 = vector.broadcast %146 : f32 to vector<8x128xf32>
    %386 = arith.mulf %385, %372 : vector<8x128xf32>
    %387 = vector.broadcast %150 : f32 to vector<8x128xf32>
    %388 = arith.mulf %387, %312 : vector<8x128xf32>
    %389 = arith.addf %386, %388 : vector<8x128xf32>
    %390 = vector.broadcast %154 : f32 to vector<8x128xf32>
    %391 = arith.addf %389, %390 : vector<8x128xf32>
    %392 = arith.negf %391 : vector<8x128xf32>
    %393 = math.exp %392 : vector<8x128xf32>
    %cst_164 = arith.constant 1.000000e+00 : f32
    %394 = vector.broadcast %cst_164 : f32 to vector<8x128xf32>
    %395 = arith.addf %394, %393 : vector<8x128xf32>
    %396 = arith.divf %394, %395 : vector<8x128xf32>
    %397 = vector.broadcast %147 : f32 to vector<8x128xf32>
    %398 = arith.mulf %397, %372 : vector<8x128xf32>
    %399 = vector.broadcast %151 : f32 to vector<8x128xf32>
    %400 = arith.mulf %399, %312 : vector<8x128xf32>
    %401 = arith.addf %398, %400 : vector<8x128xf32>
    %402 = vector.broadcast %155 : f32 to vector<8x128xf32>
    %403 = arith.addf %401, %402 : vector<8x128xf32>
    %404 = math.tanh %403 : vector<8x128xf32>
    %405 = vector.broadcast %148 : f32 to vector<8x128xf32>
    %406 = arith.mulf %405, %372 : vector<8x128xf32>
    %407 = vector.broadcast %152 : f32 to vector<8x128xf32>
    %408 = arith.mulf %407, %312 : vector<8x128xf32>
    %409 = arith.addf %406, %408 : vector<8x128xf32>
    %410 = vector.broadcast %156 : f32 to vector<8x128xf32>
    %411 = arith.addf %409, %410 : vector<8x128xf32>
    %412 = arith.negf %411 : vector<8x128xf32>
    %413 = math.exp %412 : vector<8x128xf32>
    %cst_165 = arith.constant 1.000000e+00 : f32
    %414 = vector.broadcast %cst_165 : f32 to vector<8x128xf32>
    %415 = arith.addf %414, %413 : vector<8x128xf32>
    %416 = arith.divf %414, %415 : vector<8x128xf32>
    %417 = arith.mulf %396, %310 : vector<8x128xf32>
    %418 = arith.mulf %384, %404 : vector<8x128xf32>
    %419 = arith.addf %417, %418 : vector<8x128xf32>
    %420 = math.tanh %419 : vector<8x128xf32>
    %421 = arith.mulf %416, %420 : vector<8x128xf32>
    %422 = vector.broadcast %158 : f32 to vector<8x128xf32>
    %423 = arith.mulf %422, %421 : vector<8x128xf32>
    %424 = arith.addf %315, %423 : vector<8x128xf32>
    %c2_166 = arith.constant 2 : index
    %c0_167 = arith.constant 0 : index
    %c0_168 = arith.constant 0 : index
    %425 = vector.load %arg1[%c2_166, %c0_167, %c0_168] : memref<16x8x128xf32, #tpu.memory_space<vmem>>, vector<1x8x128xf32>
    %426 = vector.shape_cast %425 : vector<1x8x128xf32> to vector<8x128xf32>
    %427 = arith.subf %426, %48 : vector<8x128xf32>
    %428 = arith.mulf %427, %132 : vector<8x128xf32>
    %429 = vector.broadcast %176 : f32 to vector<8x128xf32>
    %430 = arith.mulf %428, %429 : vector<8x128xf32>
    %431 = vector.broadcast %192 : f32 to vector<8x128xf32>
    %432 = arith.addf %430, %431 : vector<8x128xf32>
    %433 = vector.broadcast %133 : f32 to vector<8x128xf32>
    %434 = arith.mulf %433, %432 : vector<8x128xf32>
    %435 = vector.broadcast %137 : f32 to vector<8x128xf32>
    %436 = arith.mulf %435, %372 : vector<8x128xf32>
    %437 = arith.addf %434, %436 : vector<8x128xf32>
    %438 = vector.broadcast %141 : f32 to vector<8x128xf32>
    %439 = arith.addf %437, %438 : vector<8x128xf32>
    %440 = arith.negf %439 : vector<8x128xf32>
    %441 = math.exp %440 : vector<8x128xf32>
    %cst_169 = arith.constant 1.000000e+00 : f32
    %442 = vector.broadcast %cst_169 : f32 to vector<8x128xf32>
    %443 = arith.addf %442, %441 : vector<8x128xf32>
    %444 = arith.divf %442, %443 : vector<8x128xf32>
    %445 = vector.broadcast %134 : f32 to vector<8x128xf32>
    %446 = arith.mulf %445, %432 : vector<8x128xf32>
    %447 = vector.broadcast %138 : f32 to vector<8x128xf32>
    %448 = arith.mulf %447, %372 : vector<8x128xf32>
    %449 = arith.addf %446, %448 : vector<8x128xf32>
    %450 = vector.broadcast %142 : f32 to vector<8x128xf32>
    %451 = arith.addf %449, %450 : vector<8x128xf32>
    %452 = arith.negf %451 : vector<8x128xf32>
    %453 = math.exp %452 : vector<8x128xf32>
    %cst_170 = arith.constant 1.000000e+00 : f32
    %454 = vector.broadcast %cst_170 : f32 to vector<8x128xf32>
    %455 = arith.addf %454, %453 : vector<8x128xf32>
    %456 = arith.divf %454, %455 : vector<8x128xf32>
    %457 = vector.broadcast %135 : f32 to vector<8x128xf32>
    %458 = arith.mulf %457, %432 : vector<8x128xf32>
    %459 = vector.broadcast %139 : f32 to vector<8x128xf32>
    %460 = arith.mulf %459, %372 : vector<8x128xf32>
    %461 = arith.addf %458, %460 : vector<8x128xf32>
    %462 = vector.broadcast %143 : f32 to vector<8x128xf32>
    %463 = arith.addf %461, %462 : vector<8x128xf32>
    %464 = math.tanh %463 : vector<8x128xf32>
    %465 = vector.broadcast %136 : f32 to vector<8x128xf32>
    %466 = arith.mulf %465, %432 : vector<8x128xf32>
    %467 = vector.broadcast %140 : f32 to vector<8x128xf32>
    %468 = arith.mulf %467, %372 : vector<8x128xf32>
    %469 = arith.addf %466, %468 : vector<8x128xf32>
    %470 = vector.broadcast %144 : f32 to vector<8x128xf32>
    %471 = arith.addf %469, %470 : vector<8x128xf32>
    %472 = arith.negf %471 : vector<8x128xf32>
    %473 = math.exp %472 : vector<8x128xf32>
    %cst_171 = arith.constant 1.000000e+00 : f32
    %474 = vector.broadcast %cst_171 : f32 to vector<8x128xf32>
    %475 = arith.addf %474, %473 : vector<8x128xf32>
    %476 = arith.divf %474, %475 : vector<8x128xf32>
    %477 = arith.mulf %456, %370 : vector<8x128xf32>
    %478 = arith.mulf %444, %464 : vector<8x128xf32>
    %479 = arith.addf %477, %478 : vector<8x128xf32>
    %480 = math.tanh %479 : vector<8x128xf32>
    %481 = arith.mulf %476, %480 : vector<8x128xf32>
    %482 = vector.broadcast %145 : f32 to vector<8x128xf32>
    %483 = arith.mulf %482, %481 : vector<8x128xf32>
    %484 = vector.broadcast %149 : f32 to vector<8x128xf32>
    %485 = arith.mulf %484, %421 : vector<8x128xf32>
    %486 = arith.addf %483, %485 : vector<8x128xf32>
    %487 = vector.broadcast %153 : f32 to vector<8x128xf32>
    %488 = arith.addf %486, %487 : vector<8x128xf32>
    %489 = arith.negf %488 : vector<8x128xf32>
    %490 = math.exp %489 : vector<8x128xf32>
    %cst_172 = arith.constant 1.000000e+00 : f32
    %491 = vector.broadcast %cst_172 : f32 to vector<8x128xf32>
    %492 = arith.addf %491, %490 : vector<8x128xf32>
    %493 = arith.divf %491, %492 : vector<8x128xf32>
    %494 = vector.broadcast %146 : f32 to vector<8x128xf32>
    %495 = arith.mulf %494, %481 : vector<8x128xf32>
    %496 = vector.broadcast %150 : f32 to vector<8x128xf32>
    %497 = arith.mulf %496, %421 : vector<8x128xf32>
    %498 = arith.addf %495, %497 : vector<8x128xf32>
    %499 = vector.broadcast %154 : f32 to vector<8x128xf32>
    %500 = arith.addf %498, %499 : vector<8x128xf32>
    %501 = arith.negf %500 : vector<8x128xf32>
    %502 = math.exp %501 : vector<8x128xf32>
    %cst_173 = arith.constant 1.000000e+00 : f32
    %503 = vector.broadcast %cst_173 : f32 to vector<8x128xf32>
    %504 = arith.addf %503, %502 : vector<8x128xf32>
    %505 = arith.divf %503, %504 : vector<8x128xf32>
    %506 = vector.broadcast %147 : f32 to vector<8x128xf32>
    %507 = arith.mulf %506, %481 : vector<8x128xf32>
    %508 = vector.broadcast %151 : f32 to vector<8x128xf32>
    %509 = arith.mulf %508, %421 : vector<8x128xf32>
    %510 = arith.addf %507, %509 : vector<8x128xf32>
    %511 = vector.broadcast %155 : f32 to vector<8x128xf32>
    %512 = arith.addf %510, %511 : vector<8x128xf32>
    %513 = math.tanh %512 : vector<8x128xf32>
    %514 = vector.broadcast %148 : f32 to vector<8x128xf32>
    %515 = arith.mulf %514, %481 : vector<8x128xf32>
    %516 = vector.broadcast %152 : f32 to vector<8x128xf32>
    %517 = arith.mulf %516, %421 : vector<8x128xf32>
    %518 = arith.addf %515, %517 : vector<8x128xf32>
    %519 = vector.broadcast %156 : f32 to vector<8x128xf32>
    %520 = arith.addf %518, %519 : vector<8x128xf32>
    %521 = arith.negf %520 : vector<8x128xf32>
    %522 = math.exp %521 : vector<8x128xf32>
    %cst_174 = arith.constant 1.000000e+00 : f32
    %523 = vector.broadcast %cst_174 : f32 to vector<8x128xf32>
    %524 = arith.addf %523, %522 : vector<8x128xf32>
    %525 = arith.divf %523, %524 : vector<8x128xf32>
    %526 = arith.mulf %505, %419 : vector<8x128xf32>
    %527 = arith.mulf %493, %513 : vector<8x128xf32>
    %528 = arith.addf %526, %527 : vector<8x128xf32>
    %529 = math.tanh %528 : vector<8x128xf32>
    %530 = arith.mulf %525, %529 : vector<8x128xf32>
    %531 = vector.broadcast %159 : f32 to vector<8x128xf32>
    %532 = arith.mulf %531, %530 : vector<8x128xf32>
    %533 = arith.addf %424, %532 : vector<8x128xf32>
    %c3_175 = arith.constant 3 : index
    %c0_176 = arith.constant 0 : index
    %c0_177 = arith.constant 0 : index
    %534 = vector.load %arg1[%c3_175, %c0_176, %c0_177] : memref<16x8x128xf32, #tpu.memory_space<vmem>>, vector<1x8x128xf32>
    %535 = vector.shape_cast %534 : vector<1x8x128xf32> to vector<8x128xf32>
    %536 = arith.subf %535, %48 : vector<8x128xf32>
    %537 = arith.mulf %536, %132 : vector<8x128xf32>
    %538 = vector.broadcast %177 : f32 to vector<8x128xf32>
    %539 = arith.mulf %537, %538 : vector<8x128xf32>
    %540 = vector.broadcast %193 : f32 to vector<8x128xf32>
    %541 = arith.addf %539, %540 : vector<8x128xf32>
    %542 = vector.broadcast %133 : f32 to vector<8x128xf32>
    %543 = arith.mulf %542, %541 : vector<8x128xf32>
    %544 = vector.broadcast %137 : f32 to vector<8x128xf32>
    %545 = arith.mulf %544, %481 : vector<8x128xf32>
    %546 = arith.addf %543, %545 : vector<8x128xf32>
    %547 = vector.broadcast %141 : f32 to vector<8x128xf32>
    %548 = arith.addf %546, %547 : vector<8x128xf32>
    %549 = arith.negf %548 : vector<8x128xf32>
    %550 = math.exp %549 : vector<8x128xf32>
    %cst_178 = arith.constant 1.000000e+00 : f32
    %551 = vector.broadcast %cst_178 : f32 to vector<8x128xf32>
    %552 = arith.addf %551, %550 : vector<8x128xf32>
    %553 = arith.divf %551, %552 : vector<8x128xf32>
    %554 = vector.broadcast %134 : f32 to vector<8x128xf32>
    %555 = arith.mulf %554, %541 : vector<8x128xf32>
    %556 = vector.broadcast %138 : f32 to vector<8x128xf32>
    %557 = arith.mulf %556, %481 : vector<8x128xf32>
    %558 = arith.addf %555, %557 : vector<8x128xf32>
    %559 = vector.broadcast %142 : f32 to vector<8x128xf32>
    %560 = arith.addf %558, %559 : vector<8x128xf32>
    %561 = arith.negf %560 : vector<8x128xf32>
    %562 = math.exp %561 : vector<8x128xf32>
    %cst_179 = arith.constant 1.000000e+00 : f32
    %563 = vector.broadcast %cst_179 : f32 to vector<8x128xf32>
    %564 = arith.addf %563, %562 : vector<8x128xf32>
    %565 = arith.divf %563, %564 : vector<8x128xf32>
    %566 = vector.broadcast %135 : f32 to vector<8x128xf32>
    %567 = arith.mulf %566, %541 : vector<8x128xf32>
    %568 = vector.broadcast %139 : f32 to vector<8x128xf32>
    %569 = arith.mulf %568, %481 : vector<8x128xf32>
    %570 = arith.addf %567, %569 : vector<8x128xf32>
    %571 = vector.broadcast %143 : f32 to vector<8x128xf32>
    %572 = arith.addf %570, %571 : vector<8x128xf32>
    %573 = math.tanh %572 : vector<8x128xf32>
    %574 = vector.broadcast %136 : f32 to vector<8x128xf32>
    %575 = arith.mulf %574, %541 : vector<8x128xf32>
    %576 = vector.broadcast %140 : f32 to vector<8x128xf32>
    %577 = arith.mulf %576, %481 : vector<8x128xf32>
    %578 = arith.addf %575, %577 : vector<8x128xf32>
    %579 = vector.broadcast %144 : f32 to vector<8x128xf32>
    %580 = arith.addf %578, %579 : vector<8x128xf32>
    %581 = arith.negf %580 : vector<8x128xf32>
    %582 = math.exp %581 : vector<8x128xf32>
    %cst_180 = arith.constant 1.000000e+00 : f32
    %583 = vector.broadcast %cst_180 : f32 to vector<8x128xf32>
    %584 = arith.addf %583, %582 : vector<8x128xf32>
    %585 = arith.divf %583, %584 : vector<8x128xf32>
    %586 = arith.mulf %565, %479 : vector<8x128xf32>
    %587 = arith.mulf %553, %573 : vector<8x128xf32>
    %588 = arith.addf %586, %587 : vector<8x128xf32>
    %589 = math.tanh %588 : vector<8x128xf32>
    %590 = arith.mulf %585, %589 : vector<8x128xf32>
    %591 = vector.broadcast %145 : f32 to vector<8x128xf32>
    %592 = arith.mulf %591, %590 : vector<8x128xf32>
    %593 = vector.broadcast %149 : f32 to vector<8x128xf32>
    %594 = arith.mulf %593, %530 : vector<8x128xf32>
    %595 = arith.addf %592, %594 : vector<8x128xf32>
    %596 = vector.broadcast %153 : f32 to vector<8x128xf32>
    %597 = arith.addf %595, %596 : vector<8x128xf32>
    %598 = arith.negf %597 : vector<8x128xf32>
    %599 = math.exp %598 : vector<8x128xf32>
    %cst_181 = arith.constant 1.000000e+00 : f32
    %600 = vector.broadcast %cst_181 : f32 to vector<8x128xf32>
    %601 = arith.addf %600, %599 : vector<8x128xf32>
    %602 = arith.divf %600, %601 : vector<8x128xf32>
    %603 = vector.broadcast %146 : f32 to vector<8x128xf32>
    %604 = arith.mulf %603, %590 : vector<8x128xf32>
    %605 = vector.broadcast %150 : f32 to vector<8x128xf32>
    %606 = arith.mulf %605, %530 : vector<8x128xf32>
    %607 = arith.addf %604, %606 : vector<8x128xf32>
    %608 = vector.broadcast %154 : f32 to vector<8x128xf32>
    %609 = arith.addf %607, %608 : vector<8x128xf32>
    %610 = arith.negf %609 : vector<8x128xf32>
    %611 = math.exp %610 : vector<8x128xf32>
    %cst_182 = arith.constant 1.000000e+00 : f32
    %612 = vector.broadcast %cst_182 : f32 to vector<8x128xf32>
    %613 = arith.addf %612, %611 : vector<8x128xf32>
    %614 = arith.divf %612, %613 : vector<8x128xf32>
    %615 = vector.broadcast %147 : f32 to vector<8x128xf32>
    %616 = arith.mulf %615, %590 : vector<8x128xf32>
    %617 = vector.broadcast %151 : f32 to vector<8x128xf32>
    %618 = arith.mulf %617, %530 : vector<8x128xf32>
    %619 = arith.addf %616, %618 : vector<8x128xf32>
    %620 = vector.broadcast %155 : f32 to vector<8x128xf32>
    %621 = arith.addf %619, %620 : vector<8x128xf32>
    %622 = math.tanh %621 : vector<8x128xf32>
    %623 = vector.broadcast %148 : f32 to vector<8x128xf32>
    %624 = arith.mulf %623, %590 : vector<8x128xf32>
    %625 = vector.broadcast %152 : f32 to vector<8x128xf32>
    %626 = arith.mulf %625, %530 : vector<8x128xf32>
    %627 = arith.addf %624, %626 : vector<8x128xf32>
    %628 = vector.broadcast %156 : f32 to vector<8x128xf32>
    %629 = arith.addf %627, %628 : vector<8x128xf32>
    %630 = arith.negf %629 : vector<8x128xf32>
    %631 = math.exp %630 : vector<8x128xf32>
    %cst_183 = arith.constant 1.000000e+00 : f32
    %632 = vector.broadcast %cst_183 : f32 to vector<8x128xf32>
    %633 = arith.addf %632, %631 : vector<8x128xf32>
    %634 = arith.divf %632, %633 : vector<8x128xf32>
    %635 = arith.mulf %614, %528 : vector<8x128xf32>
    %636 = arith.mulf %602, %622 : vector<8x128xf32>
    %637 = arith.addf %635, %636 : vector<8x128xf32>
    %638 = math.tanh %637 : vector<8x128xf32>
    %639 = arith.mulf %634, %638 : vector<8x128xf32>
    %640 = vector.broadcast %160 : f32 to vector<8x128xf32>
    %641 = arith.mulf %640, %639 : vector<8x128xf32>
    %642 = arith.addf %533, %641 : vector<8x128xf32>
    %c4_184 = arith.constant 4 : index
    %c0_185 = arith.constant 0 : index
    %c0_186 = arith.constant 0 : index
    %643 = vector.load %arg1[%c4_184, %c0_185, %c0_186] : memref<16x8x128xf32, #tpu.memory_space<vmem>>, vector<1x8x128xf32>
    %644 = vector.shape_cast %643 : vector<1x8x128xf32> to vector<8x128xf32>
    %645 = arith.subf %644, %48 : vector<8x128xf32>
    %646 = arith.mulf %645, %132 : vector<8x128xf32>
    %647 = vector.broadcast %178 : f32 to vector<8x128xf32>
    %648 = arith.mulf %646, %647 : vector<8x128xf32>
    %649 = vector.broadcast %194 : f32 to vector<8x128xf32>
    %650 = arith.addf %648, %649 : vector<8x128xf32>
    %651 = vector.broadcast %133 : f32 to vector<8x128xf32>
    %652 = arith.mulf %651, %650 : vector<8x128xf32>
    %653 = vector.broadcast %137 : f32 to vector<8x128xf32>
    %654 = arith.mulf %653, %590 : vector<8x128xf32>
    %655 = arith.addf %652, %654 : vector<8x128xf32>
    %656 = vector.broadcast %141 : f32 to vector<8x128xf32>
    %657 = arith.addf %655, %656 : vector<8x128xf32>
    %658 = arith.negf %657 : vector<8x128xf32>
    %659 = math.exp %658 : vector<8x128xf32>
    %cst_187 = arith.constant 1.000000e+00 : f32
    %660 = vector.broadcast %cst_187 : f32 to vector<8x128xf32>
    %661 = arith.addf %660, %659 : vector<8x128xf32>
    %662 = arith.divf %660, %661 : vector<8x128xf32>
    %663 = vector.broadcast %134 : f32 to vector<8x128xf32>
    %664 = arith.mulf %663, %650 : vector<8x128xf32>
    %665 = vector.broadcast %138 : f32 to vector<8x128xf32>
    %666 = arith.mulf %665, %590 : vector<8x128xf32>
    %667 = arith.addf %664, %666 : vector<8x128xf32>
    %668 = vector.broadcast %142 : f32 to vector<8x128xf32>
    %669 = arith.addf %667, %668 : vector<8x128xf32>
    %670 = arith.negf %669 : vector<8x128xf32>
    %671 = math.exp %670 : vector<8x128xf32>
    %cst_188 = arith.constant 1.000000e+00 : f32
    %672 = vector.broadcast %cst_188 : f32 to vector<8x128xf32>
    %673 = arith.addf %672, %671 : vector<8x128xf32>
    %674 = arith.divf %672, %673 : vector<8x128xf32>
    %675 = vector.broadcast %135 : f32 to vector<8x128xf32>
    %676 = arith.mulf %675, %650 : vector<8x128xf32>
    %677 = vector.broadcast %139 : f32 to vector<8x128xf32>
    %678 = arith.mulf %677, %590 : vector<8x128xf32>
    %679 = arith.addf %676, %678 : vector<8x128xf32>
    %680 = vector.broadcast %143 : f32 to vector<8x128xf32>
    %681 = arith.addf %679, %680 : vector<8x128xf32>
    %682 = math.tanh %681 : vector<8x128xf32>
    %683 = vector.broadcast %136 : f32 to vector<8x128xf32>
    %684 = arith.mulf %683, %650 : vector<8x128xf32>
    %685 = vector.broadcast %140 : f32 to vector<8x128xf32>
    %686 = arith.mulf %685, %590 : vector<8x128xf32>
    %687 = arith.addf %684, %686 : vector<8x128xf32>
    %688 = vector.broadcast %144 : f32 to vector<8x128xf32>
    %689 = arith.addf %687, %688 : vector<8x128xf32>
    %690 = arith.negf %689 : vector<8x128xf32>
    %691 = math.exp %690 : vector<8x128xf32>
    %cst_189 = arith.constant 1.000000e+00 : f32
    %692 = vector.broadcast %cst_189 : f32 to vector<8x128xf32>
    %693 = arith.addf %692, %691 : vector<8x128xf32>
    %694 = arith.divf %692, %693 : vector<8x128xf32>
    %695 = arith.mulf %674, %588 : vector<8x128xf32>
    %696 = arith.mulf %662, %682 : vector<8x128xf32>
    %697 = arith.addf %695, %696 : vector<8x128xf32>
    %698 = math.tanh %697 : vector<8x128xf32>
    %699 = arith.mulf %694, %698 : vector<8x128xf32>
    %700 = vector.broadcast %145 : f32 to vector<8x128xf32>
    %701 = arith.mulf %700, %699 : vector<8x128xf32>
    %702 = vector.broadcast %149 : f32 to vector<8x128xf32>
    %703 = arith.mulf %702, %639 : vector<8x128xf32>
    %704 = arith.addf %701, %703 : vector<8x128xf32>
    %705 = vector.broadcast %153 : f32 to vector<8x128xf32>
    %706 = arith.addf %704, %705 : vector<8x128xf32>
    %707 = arith.negf %706 : vector<8x128xf32>
    %708 = math.exp %707 : vector<8x128xf32>
    %cst_190 = arith.constant 1.000000e+00 : f32
    %709 = vector.broadcast %cst_190 : f32 to vector<8x128xf32>
    %710 = arith.addf %709, %708 : vector<8x128xf32>
    %711 = arith.divf %709, %710 : vector<8x128xf32>
    %712 = vector.broadcast %146 : f32 to vector<8x128xf32>
    %713 = arith.mulf %712, %699 : vector<8x128xf32>
    %714 = vector.broadcast %150 : f32 to vector<8x128xf32>
    %715 = arith.mulf %714, %639 : vector<8x128xf32>
    %716 = arith.addf %713, %715 : vector<8x128xf32>
    %717 = vector.broadcast %154 : f32 to vector<8x128xf32>
    %718 = arith.addf %716, %717 : vector<8x128xf32>
    %719 = arith.negf %718 : vector<8x128xf32>
    %720 = math.exp %719 : vector<8x128xf32>
    %cst_191 = arith.constant 1.000000e+00 : f32
    %721 = vector.broadcast %cst_191 : f32 to vector<8x128xf32>
    %722 = arith.addf %721, %720 : vector<8x128xf32>
    %723 = arith.divf %721, %722 : vector<8x128xf32>
    %724 = vector.broadcast %147 : f32 to vector<8x128xf32>
    %725 = arith.mulf %724, %699 : vector<8x128xf32>
    %726 = vector.broadcast %151 : f32 to vector<8x128xf32>
    %727 = arith.mulf %726, %639 : vector<8x128xf32>
    %728 = arith.addf %725, %727 : vector<8x128xf32>
    %729 = vector.broadcast %155 : f32 to vector<8x128xf32>
    %730 = arith.addf %728, %729 : vector<8x128xf32>
    %731 = math.tanh %730 : vector<8x128xf32>
    %732 = vector.broadcast %148 : f32 to vector<8x128xf32>
    %733 = arith.mulf %732, %699 : vector<8x128xf32>
    %734 = vector.broadcast %152 : f32 to vector<8x128xf32>
    %735 = arith.mulf %734, %639 : vector<8x128xf32>
    %736 = arith.addf %733, %735 : vector<8x128xf32>
    %737 = vector.broadcast %156 : f32 to vector<8x128xf32>
    %738 = arith.addf %736, %737 : vector<8x128xf32>
    %739 = arith.negf %738 : vector<8x128xf32>
    %740 = math.exp %739 : vector<8x128xf32>
    %cst_192 = arith.constant 1.000000e+00 : f32
    %741 = vector.broadcast %cst_192 : f32 to vector<8x128xf32>
    %742 = arith.addf %741, %740 : vector<8x128xf32>
    %743 = arith.divf %741, %742 : vector<8x128xf32>
    %744 = arith.mulf %723, %637 : vector<8x128xf32>
    %745 = arith.mulf %711, %731 : vector<8x128xf32>
    %746 = arith.addf %744, %745 : vector<8x128xf32>
    %747 = math.tanh %746 : vector<8x128xf32>
    %748 = arith.mulf %743, %747 : vector<8x128xf32>
    %749 = vector.broadcast %161 : f32 to vector<8x128xf32>
    %750 = arith.mulf %749, %748 : vector<8x128xf32>
    %751 = arith.addf %642, %750 : vector<8x128xf32>
    %c5_193 = arith.constant 5 : index
    %c0_194 = arith.constant 0 : index
    %c0_195 = arith.constant 0 : index
    %752 = vector.load %arg1[%c5_193, %c0_194, %c0_195] : memref<16x8x128xf32, #tpu.memory_space<vmem>>, vector<1x8x128xf32>
    %753 = vector.shape_cast %752 : vector<1x8x128xf32> to vector<8x128xf32>
    %754 = arith.subf %753, %48 : vector<8x128xf32>
    %755 = arith.mulf %754, %132 : vector<8x128xf32>
    %756 = vector.broadcast %179 : f32 to vector<8x128xf32>
    %757 = arith.mulf %755, %756 : vector<8x128xf32>
    %758 = vector.broadcast %195 : f32 to vector<8x128xf32>
    %759 = arith.addf %757, %758 : vector<8x128xf32>
    %760 = vector.broadcast %133 : f32 to vector<8x128xf32>
    %761 = arith.mulf %760, %759 : vector<8x128xf32>
    %762 = vector.broadcast %137 : f32 to vector<8x128xf32>
    %763 = arith.mulf %762, %699 : vector<8x128xf32>
    %764 = arith.addf %761, %763 : vector<8x128xf32>
    %765 = vector.broadcast %141 : f32 to vector<8x128xf32>
    %766 = arith.addf %764, %765 : vector<8x128xf32>
    %767 = arith.negf %766 : vector<8x128xf32>
    %768 = math.exp %767 : vector<8x128xf32>
    %cst_196 = arith.constant 1.000000e+00 : f32
    %769 = vector.broadcast %cst_196 : f32 to vector<8x128xf32>
    %770 = arith.addf %769, %768 : vector<8x128xf32>
    %771 = arith.divf %769, %770 : vector<8x128xf32>
    %772 = vector.broadcast %134 : f32 to vector<8x128xf32>
    %773 = arith.mulf %772, %759 : vector<8x128xf32>
    %774 = vector.broadcast %138 : f32 to vector<8x128xf32>
    %775 = arith.mulf %774, %699 : vector<8x128xf32>
    %776 = arith.addf %773, %775 : vector<8x128xf32>
    %777 = vector.broadcast %142 : f32 to vector<8x128xf32>
    %778 = arith.addf %776, %777 : vector<8x128xf32>
    %779 = arith.negf %778 : vector<8x128xf32>
    %780 = math.exp %779 : vector<8x128xf32>
    %cst_197 = arith.constant 1.000000e+00 : f32
    %781 = vector.broadcast %cst_197 : f32 to vector<8x128xf32>
    %782 = arith.addf %781, %780 : vector<8x128xf32>
    %783 = arith.divf %781, %782 : vector<8x128xf32>
    %784 = vector.broadcast %135 : f32 to vector<8x128xf32>
    %785 = arith.mulf %784, %759 : vector<8x128xf32>
    %786 = vector.broadcast %139 : f32 to vector<8x128xf32>
    %787 = arith.mulf %786, %699 : vector<8x128xf32>
    %788 = arith.addf %785, %787 : vector<8x128xf32>
    %789 = vector.broadcast %143 : f32 to vector<8x128xf32>
    %790 = arith.addf %788, %789 : vector<8x128xf32>
    %791 = math.tanh %790 : vector<8x128xf32>
    %792 = vector.broadcast %136 : f32 to vector<8x128xf32>
    %793 = arith.mulf %792, %759 : vector<8x128xf32>
    %794 = vector.broadcast %140 : f32 to vector<8x128xf32>
    %795 = arith.mulf %794, %699 : vector<8x128xf32>
    %796 = arith.addf %793, %795 : vector<8x128xf32>
    %797 = vector.broadcast %144 : f32 to vector<8x128xf32>
    %798 = arith.addf %796, %797 : vector<8x128xf32>
    %799 = arith.negf %798 : vector<8x128xf32>
    %800 = math.exp %799 : vector<8x128xf32>
    %cst_198 = arith.constant 1.000000e+00 : f32
    %801 = vector.broadcast %cst_198 : f32 to vector<8x128xf32>
    %802 = arith.addf %801, %800 : vector<8x128xf32>
    %803 = arith.divf %801, %802 : vector<8x128xf32>
    %804 = arith.mulf %783, %697 : vector<8x128xf32>
    %805 = arith.mulf %771, %791 : vector<8x128xf32>
    %806 = arith.addf %804, %805 : vector<8x128xf32>
    %807 = math.tanh %806 : vector<8x128xf32>
    %808 = arith.mulf %803, %807 : vector<8x128xf32>
    %809 = vector.broadcast %145 : f32 to vector<8x128xf32>
    %810 = arith.mulf %809, %808 : vector<8x128xf32>
    %811 = vector.broadcast %149 : f32 to vector<8x128xf32>
    %812 = arith.mulf %811, %748 : vector<8x128xf32>
    %813 = arith.addf %810, %812 : vector<8x128xf32>
    %814 = vector.broadcast %153 : f32 to vector<8x128xf32>
    %815 = arith.addf %813, %814 : vector<8x128xf32>
    %816 = arith.negf %815 : vector<8x128xf32>
    %817 = math.exp %816 : vector<8x128xf32>
    %cst_199 = arith.constant 1.000000e+00 : f32
    %818 = vector.broadcast %cst_199 : f32 to vector<8x128xf32>
    %819 = arith.addf %818, %817 : vector<8x128xf32>
    %820 = arith.divf %818, %819 : vector<8x128xf32>
    %821 = vector.broadcast %146 : f32 to vector<8x128xf32>
    %822 = arith.mulf %821, %808 : vector<8x128xf32>
    %823 = vector.broadcast %150 : f32 to vector<8x128xf32>
    %824 = arith.mulf %823, %748 : vector<8x128xf32>
    %825 = arith.addf %822, %824 : vector<8x128xf32>
    %826 = vector.broadcast %154 : f32 to vector<8x128xf32>
    %827 = arith.addf %825, %826 : vector<8x128xf32>
    %828 = arith.negf %827 : vector<8x128xf32>
    %829 = math.exp %828 : vector<8x128xf32>
    %cst_200 = arith.constant 1.000000e+00 : f32
    %830 = vector.broadcast %cst_200 : f32 to vector<8x128xf32>
    %831 = arith.addf %830, %829 : vector<8x128xf32>
    %832 = arith.divf %830, %831 : vector<8x128xf32>
    %833 = vector.broadcast %147 : f32 to vector<8x128xf32>
    %834 = arith.mulf %833, %808 : vector<8x128xf32>
    %835 = vector.broadcast %151 : f32 to vector<8x128xf32>
    %836 = arith.mulf %835, %748 : vector<8x128xf32>
    %837 = arith.addf %834, %836 : vector<8x128xf32>
    %838 = vector.broadcast %155 : f32 to vector<8x128xf32>
    %839 = arith.addf %837, %838 : vector<8x128xf32>
    %840 = math.tanh %839 : vector<8x128xf32>
    %841 = vector.broadcast %148 : f32 to vector<8x128xf32>
    %842 = arith.mulf %841, %808 : vector<8x128xf32>
    %843 = vector.broadcast %152 : f32 to vector<8x128xf32>
    %844 = arith.mulf %843, %748 : vector<8x128xf32>
    %845 = arith.addf %842, %844 : vector<8x128xf32>
    %846 = vector.broadcast %156 : f32 to vector<8x128xf32>
    %847 = arith.addf %845, %846 : vector<8x128xf32>
    %848 = arith.negf %847 : vector<8x128xf32>
    %849 = math.exp %848 : vector<8x128xf32>
    %cst_201 = arith.constant 1.000000e+00 : f32
    %850 = vector.broadcast %cst_201 : f32 to vector<8x128xf32>
    %851 = arith.addf %850, %849 : vector<8x128xf32>
    %852 = arith.divf %850, %851 : vector<8x128xf32>
    %853 = arith.mulf %832, %746 : vector<8x128xf32>
    %854 = arith.mulf %820, %840 : vector<8x128xf32>
    %855 = arith.addf %853, %854 : vector<8x128xf32>
    %856 = math.tanh %855 : vector<8x128xf32>
    %857 = arith.mulf %852, %856 : vector<8x128xf32>
    %858 = vector.broadcast %162 : f32 to vector<8x128xf32>
    %859 = arith.mulf %858, %857 : vector<8x128xf32>
    %860 = arith.addf %751, %859 : vector<8x128xf32>
    %c6_202 = arith.constant 6 : index
    %c0_203 = arith.constant 0 : index
    %c0_204 = arith.constant 0 : index
    %861 = vector.load %arg1[%c6_202, %c0_203, %c0_204] : memref<16x8x128xf32, #tpu.memory_space<vmem>>, vector<1x8x128xf32>
    %862 = vector.shape_cast %861 : vector<1x8x128xf32> to vector<8x128xf32>
    %863 = arith.subf %862, %48 : vector<8x128xf32>
    %864 = arith.mulf %863, %132 : vector<8x128xf32>
    %865 = vector.broadcast %180 : f32 to vector<8x128xf32>
    %866 = arith.mulf %864, %865 : vector<8x128xf32>
    %867 = vector.broadcast %196 : f32 to vector<8x128xf32>
    %868 = arith.addf %866, %867 : vector<8x128xf32>
    %869 = vector.broadcast %133 : f32 to vector<8x128xf32>
    %870 = arith.mulf %869, %868 : vector<8x128xf32>
    %871 = vector.broadcast %137 : f32 to vector<8x128xf32>
    %872 = arith.mulf %871, %808 : vector<8x128xf32>
    %873 = arith.addf %870, %872 : vector<8x128xf32>
    %874 = vector.broadcast %141 : f32 to vector<8x128xf32>
    %875 = arith.addf %873, %874 : vector<8x128xf32>
    %876 = arith.negf %875 : vector<8x128xf32>
    %877 = math.exp %876 : vector<8x128xf32>
    %cst_205 = arith.constant 1.000000e+00 : f32
    %878 = vector.broadcast %cst_205 : f32 to vector<8x128xf32>
    %879 = arith.addf %878, %877 : vector<8x128xf32>
    %880 = arith.divf %878, %879 : vector<8x128xf32>
    %881 = vector.broadcast %134 : f32 to vector<8x128xf32>
    %882 = arith.mulf %881, %868 : vector<8x128xf32>
    %883 = vector.broadcast %138 : f32 to vector<8x128xf32>
    %884 = arith.mulf %883, %808 : vector<8x128xf32>
    %885 = arith.addf %882, %884 : vector<8x128xf32>
    %886 = vector.broadcast %142 : f32 to vector<8x128xf32>
    %887 = arith.addf %885, %886 : vector<8x128xf32>
    %888 = arith.negf %887 : vector<8x128xf32>
    %889 = math.exp %888 : vector<8x128xf32>
    %cst_206 = arith.constant 1.000000e+00 : f32
    %890 = vector.broadcast %cst_206 : f32 to vector<8x128xf32>
    %891 = arith.addf %890, %889 : vector<8x128xf32>
    %892 = arith.divf %890, %891 : vector<8x128xf32>
    %893 = vector.broadcast %135 : f32 to vector<8x128xf32>
    %894 = arith.mulf %893, %868 : vector<8x128xf32>
    %895 = vector.broadcast %139 : f32 to vector<8x128xf32>
    %896 = arith.mulf %895, %808 : vector<8x128xf32>
    %897 = arith.addf %894, %896 : vector<8x128xf32>
    %898 = vector.broadcast %143 : f32 to vector<8x128xf32>
    %899 = arith.addf %897, %898 : vector<8x128xf32>
    %900 = math.tanh %899 : vector<8x128xf32>
    %901 = vector.broadcast %136 : f32 to vector<8x128xf32>
    %902 = arith.mulf %901, %868 : vector<8x128xf32>
    %903 = vector.broadcast %140 : f32 to vector<8x128xf32>
    %904 = arith.mulf %903, %808 : vector<8x128xf32>
    %905 = arith.addf %902, %904 : vector<8x128xf32>
    %906 = vector.broadcast %144 : f32 to vector<8x128xf32>
    %907 = arith.addf %905, %906 : vector<8x128xf32>
    %908 = arith.negf %907 : vector<8x128xf32>
    %909 = math.exp %908 : vector<8x128xf32>
    %cst_207 = arith.constant 1.000000e+00 : f32
    %910 = vector.broadcast %cst_207 : f32 to vector<8x128xf32>
    %911 = arith.addf %910, %909 : vector<8x128xf32>
    %912 = arith.divf %910, %911 : vector<8x128xf32>
    %913 = arith.mulf %892, %806 : vector<8x128xf32>
    %914 = arith.mulf %880, %900 : vector<8x128xf32>
    %915 = arith.addf %913, %914 : vector<8x128xf32>
    %916 = math.tanh %915 : vector<8x128xf32>
    %917 = arith.mulf %912, %916 : vector<8x128xf32>
    %918 = vector.broadcast %145 : f32 to vector<8x128xf32>
    %919 = arith.mulf %918, %917 : vector<8x128xf32>
    %920 = vector.broadcast %149 : f32 to vector<8x128xf32>
    %921 = arith.mulf %920, %857 : vector<8x128xf32>
    %922 = arith.addf %919, %921 : vector<8x128xf32>
    %923 = vector.broadcast %153 : f32 to vector<8x128xf32>
    %924 = arith.addf %922, %923 : vector<8x128xf32>
    %925 = arith.negf %924 : vector<8x128xf32>
    %926 = math.exp %925 : vector<8x128xf32>
    %cst_208 = arith.constant 1.000000e+00 : f32
    %927 = vector.broadcast %cst_208 : f32 to vector<8x128xf32>
    %928 = arith.addf %927, %926 : vector<8x128xf32>
    %929 = arith.divf %927, %928 : vector<8x128xf32>
    %930 = vector.broadcast %146 : f32 to vector<8x128xf32>
    %931 = arith.mulf %930, %917 : vector<8x128xf32>
    %932 = vector.broadcast %150 : f32 to vector<8x128xf32>
    %933 = arith.mulf %932, %857 : vector<8x128xf32>
    %934 = arith.addf %931, %933 : vector<8x128xf32>
    %935 = vector.broadcast %154 : f32 to vector<8x128xf32>
    %936 = arith.addf %934, %935 : vector<8x128xf32>
    %937 = arith.negf %936 : vector<8x128xf32>
    %938 = math.exp %937 : vector<8x128xf32>
    %cst_209 = arith.constant 1.000000e+00 : f32
    %939 = vector.broadcast %cst_209 : f32 to vector<8x128xf32>
    %940 = arith.addf %939, %938 : vector<8x128xf32>
    %941 = arith.divf %939, %940 : vector<8x128xf32>
    %942 = vector.broadcast %147 : f32 to vector<8x128xf32>
    %943 = arith.mulf %942, %917 : vector<8x128xf32>
    %944 = vector.broadcast %151 : f32 to vector<8x128xf32>
    %945 = arith.mulf %944, %857 : vector<8x128xf32>
    %946 = arith.addf %943, %945 : vector<8x128xf32>
    %947 = vector.broadcast %155 : f32 to vector<8x128xf32>
    %948 = arith.addf %946, %947 : vector<8x128xf32>
    %949 = math.tanh %948 : vector<8x128xf32>
    %950 = vector.broadcast %148 : f32 to vector<8x128xf32>
    %951 = arith.mulf %950, %917 : vector<8x128xf32>
    %952 = vector.broadcast %152 : f32 to vector<8x128xf32>
    %953 = arith.mulf %952, %857 : vector<8x128xf32>
    %954 = arith.addf %951, %953 : vector<8x128xf32>
    %955 = vector.broadcast %156 : f32 to vector<8x128xf32>
    %956 = arith.addf %954, %955 : vector<8x128xf32>
    %957 = arith.negf %956 : vector<8x128xf32>
    %958 = math.exp %957 : vector<8x128xf32>
    %cst_210 = arith.constant 1.000000e+00 : f32
    %959 = vector.broadcast %cst_210 : f32 to vector<8x128xf32>
    %960 = arith.addf %959, %958 : vector<8x128xf32>
    %961 = arith.divf %959, %960 : vector<8x128xf32>
    %962 = arith.mulf %941, %855 : vector<8x128xf32>
    %963 = arith.mulf %929, %949 : vector<8x128xf32>
    %964 = arith.addf %962, %963 : vector<8x128xf32>
    %965 = math.tanh %964 : vector<8x128xf32>
    %966 = arith.mulf %961, %965 : vector<8x128xf32>
    %967 = vector.broadcast %163 : f32 to vector<8x128xf32>
    %968 = arith.mulf %967, %966 : vector<8x128xf32>
    %969 = arith.addf %860, %968 : vector<8x128xf32>
    %c7_211 = arith.constant 7 : index
    %c0_212 = arith.constant 0 : index
    %c0_213 = arith.constant 0 : index
    %970 = vector.load %arg1[%c7_211, %c0_212, %c0_213] : memref<16x8x128xf32, #tpu.memory_space<vmem>>, vector<1x8x128xf32>
    %971 = vector.shape_cast %970 : vector<1x8x128xf32> to vector<8x128xf32>
    %972 = arith.subf %971, %48 : vector<8x128xf32>
    %973 = arith.mulf %972, %132 : vector<8x128xf32>
    %974 = vector.broadcast %181 : f32 to vector<8x128xf32>
    %975 = arith.mulf %973, %974 : vector<8x128xf32>
    %976 = vector.broadcast %197 : f32 to vector<8x128xf32>
    %977 = arith.addf %975, %976 : vector<8x128xf32>
    %978 = vector.broadcast %133 : f32 to vector<8x128xf32>
    %979 = arith.mulf %978, %977 : vector<8x128xf32>
    %980 = vector.broadcast %137 : f32 to vector<8x128xf32>
    %981 = arith.mulf %980, %917 : vector<8x128xf32>
    %982 = arith.addf %979, %981 : vector<8x128xf32>
    %983 = vector.broadcast %141 : f32 to vector<8x128xf32>
    %984 = arith.addf %982, %983 : vector<8x128xf32>
    %985 = arith.negf %984 : vector<8x128xf32>
    %986 = math.exp %985 : vector<8x128xf32>
    %cst_214 = arith.constant 1.000000e+00 : f32
    %987 = vector.broadcast %cst_214 : f32 to vector<8x128xf32>
    %988 = arith.addf %987, %986 : vector<8x128xf32>
    %989 = arith.divf %987, %988 : vector<8x128xf32>
    %990 = vector.broadcast %134 : f32 to vector<8x128xf32>
    %991 = arith.mulf %990, %977 : vector<8x128xf32>
    %992 = vector.broadcast %138 : f32 to vector<8x128xf32>
    %993 = arith.mulf %992, %917 : vector<8x128xf32>
    %994 = arith.addf %991, %993 : vector<8x128xf32>
    %995 = vector.broadcast %142 : f32 to vector<8x128xf32>
    %996 = arith.addf %994, %995 : vector<8x128xf32>
    %997 = arith.negf %996 : vector<8x128xf32>
    %998 = math.exp %997 : vector<8x128xf32>
    %cst_215 = arith.constant 1.000000e+00 : f32
    %999 = vector.broadcast %cst_215 : f32 to vector<8x128xf32>
    %1000 = arith.addf %999, %998 : vector<8x128xf32>
    %1001 = arith.divf %999, %1000 : vector<8x128xf32>
    %1002 = vector.broadcast %135 : f32 to vector<8x128xf32>
    %1003 = arith.mulf %1002, %977 : vector<8x128xf32>
    %1004 = vector.broadcast %139 : f32 to vector<8x128xf32>
    %1005 = arith.mulf %1004, %917 : vector<8x128xf32>
    %1006 = arith.addf %1003, %1005 : vector<8x128xf32>
    %1007 = vector.broadcast %143 : f32 to vector<8x128xf32>
    %1008 = arith.addf %1006, %1007 : vector<8x128xf32>
    %1009 = math.tanh %1008 : vector<8x128xf32>
    %1010 = vector.broadcast %136 : f32 to vector<8x128xf32>
    %1011 = arith.mulf %1010, %977 : vector<8x128xf32>
    %1012 = vector.broadcast %140 : f32 to vector<8x128xf32>
    %1013 = arith.mulf %1012, %917 : vector<8x128xf32>
    %1014 = arith.addf %1011, %1013 : vector<8x128xf32>
    %1015 = vector.broadcast %144 : f32 to vector<8x128xf32>
    %1016 = arith.addf %1014, %1015 : vector<8x128xf32>
    %1017 = arith.negf %1016 : vector<8x128xf32>
    %1018 = math.exp %1017 : vector<8x128xf32>
    %cst_216 = arith.constant 1.000000e+00 : f32
    %1019 = vector.broadcast %cst_216 : f32 to vector<8x128xf32>
    %1020 = arith.addf %1019, %1018 : vector<8x128xf32>
    %1021 = arith.divf %1019, %1020 : vector<8x128xf32>
    %1022 = arith.mulf %1001, %915 : vector<8x128xf32>
    %1023 = arith.mulf %989, %1009 : vector<8x128xf32>
    %1024 = arith.addf %1022, %1023 : vector<8x128xf32>
    %1025 = math.tanh %1024 : vector<8x128xf32>
    %1026 = arith.mulf %1021, %1025 : vector<8x128xf32>
    %1027 = vector.broadcast %145 : f32 to vector<8x128xf32>
    %1028 = arith.mulf %1027, %1026 : vector<8x128xf32>
    %1029 = vector.broadcast %149 : f32 to vector<8x128xf32>
    %1030 = arith.mulf %1029, %966 : vector<8x128xf32>
    %1031 = arith.addf %1028, %1030 : vector<8x128xf32>
    %1032 = vector.broadcast %153 : f32 to vector<8x128xf32>
    %1033 = arith.addf %1031, %1032 : vector<8x128xf32>
    %1034 = arith.negf %1033 : vector<8x128xf32>
    %1035 = math.exp %1034 : vector<8x128xf32>
    %cst_217 = arith.constant 1.000000e+00 : f32
    %1036 = vector.broadcast %cst_217 : f32 to vector<8x128xf32>
    %1037 = arith.addf %1036, %1035 : vector<8x128xf32>
    %1038 = arith.divf %1036, %1037 : vector<8x128xf32>
    %1039 = vector.broadcast %146 : f32 to vector<8x128xf32>
    %1040 = arith.mulf %1039, %1026 : vector<8x128xf32>
    %1041 = vector.broadcast %150 : f32 to vector<8x128xf32>
    %1042 = arith.mulf %1041, %966 : vector<8x128xf32>
    %1043 = arith.addf %1040, %1042 : vector<8x128xf32>
    %1044 = vector.broadcast %154 : f32 to vector<8x128xf32>
    %1045 = arith.addf %1043, %1044 : vector<8x128xf32>
    %1046 = arith.negf %1045 : vector<8x128xf32>
    %1047 = math.exp %1046 : vector<8x128xf32>
    %cst_218 = arith.constant 1.000000e+00 : f32
    %1048 = vector.broadcast %cst_218 : f32 to vector<8x128xf32>
    %1049 = arith.addf %1048, %1047 : vector<8x128xf32>
    %1050 = arith.divf %1048, %1049 : vector<8x128xf32>
    %1051 = vector.broadcast %147 : f32 to vector<8x128xf32>
    %1052 = arith.mulf %1051, %1026 : vector<8x128xf32>
    %1053 = vector.broadcast %151 : f32 to vector<8x128xf32>
    %1054 = arith.mulf %1053, %966 : vector<8x128xf32>
    %1055 = arith.addf %1052, %1054 : vector<8x128xf32>
    %1056 = vector.broadcast %155 : f32 to vector<8x128xf32>
    %1057 = arith.addf %1055, %1056 : vector<8x128xf32>
    %1058 = math.tanh %1057 : vector<8x128xf32>
    %1059 = vector.broadcast %148 : f32 to vector<8x128xf32>
    %1060 = arith.mulf %1059, %1026 : vector<8x128xf32>
    %1061 = vector.broadcast %152 : f32 to vector<8x128xf32>
    %1062 = arith.mulf %1061, %966 : vector<8x128xf32>
    %1063 = arith.addf %1060, %1062 : vector<8x128xf32>
    %1064 = vector.broadcast %156 : f32 to vector<8x128xf32>
    %1065 = arith.addf %1063, %1064 : vector<8x128xf32>
    %1066 = arith.negf %1065 : vector<8x128xf32>
    %1067 = math.exp %1066 : vector<8x128xf32>
    %cst_219 = arith.constant 1.000000e+00 : f32
    %1068 = vector.broadcast %cst_219 : f32 to vector<8x128xf32>
    %1069 = arith.addf %1068, %1067 : vector<8x128xf32>
    %1070 = arith.divf %1068, %1069 : vector<8x128xf32>
    %1071 = arith.mulf %1050, %964 : vector<8x128xf32>
    %1072 = arith.mulf %1038, %1058 : vector<8x128xf32>
    %1073 = arith.addf %1071, %1072 : vector<8x128xf32>
    %1074 = math.tanh %1073 : vector<8x128xf32>
    %1075 = arith.mulf %1070, %1074 : vector<8x128xf32>
    %1076 = vector.broadcast %164 : f32 to vector<8x128xf32>
    %1077 = arith.mulf %1076, %1075 : vector<8x128xf32>
    %1078 = arith.addf %969, %1077 : vector<8x128xf32>
    %c8_220 = arith.constant 8 : index
    %c0_221 = arith.constant 0 : index
    %c0_222 = arith.constant 0 : index
    %1079 = vector.load %arg1[%c8_220, %c0_221, %c0_222] : memref<16x8x128xf32, #tpu.memory_space<vmem>>, vector<1x8x128xf32>
    %1080 = vector.shape_cast %1079 : vector<1x8x128xf32> to vector<8x128xf32>
    %1081 = arith.subf %1080, %48 : vector<8x128xf32>
    %1082 = arith.mulf %1081, %132 : vector<8x128xf32>
    %1083 = vector.broadcast %182 : f32 to vector<8x128xf32>
    %1084 = arith.mulf %1082, %1083 : vector<8x128xf32>
    %1085 = vector.broadcast %198 : f32 to vector<8x128xf32>
    %1086 = arith.addf %1084, %1085 : vector<8x128xf32>
    %1087 = vector.broadcast %133 : f32 to vector<8x128xf32>
    %1088 = arith.mulf %1087, %1086 : vector<8x128xf32>
    %1089 = vector.broadcast %137 : f32 to vector<8x128xf32>
    %1090 = arith.mulf %1089, %1026 : vector<8x128xf32>
    %1091 = arith.addf %1088, %1090 : vector<8x128xf32>
    %1092 = vector.broadcast %141 : f32 to vector<8x128xf32>
    %1093 = arith.addf %1091, %1092 : vector<8x128xf32>
    %1094 = arith.negf %1093 : vector<8x128xf32>
    %1095 = math.exp %1094 : vector<8x128xf32>
    %cst_223 = arith.constant 1.000000e+00 : f32
    %1096 = vector.broadcast %cst_223 : f32 to vector<8x128xf32>
    %1097 = arith.addf %1096, %1095 : vector<8x128xf32>
    %1098 = arith.divf %1096, %1097 : vector<8x128xf32>
    %1099 = vector.broadcast %134 : f32 to vector<8x128xf32>
    %1100 = arith.mulf %1099, %1086 : vector<8x128xf32>
    %1101 = vector.broadcast %138 : f32 to vector<8x128xf32>
    %1102 = arith.mulf %1101, %1026 : vector<8x128xf32>
    %1103 = arith.addf %1100, %1102 : vector<8x128xf32>
    %1104 = vector.broadcast %142 : f32 to vector<8x128xf32>
    %1105 = arith.addf %1103, %1104 : vector<8x128xf32>
    %1106 = arith.negf %1105 : vector<8x128xf32>
    %1107 = math.exp %1106 : vector<8x128xf32>
    %cst_224 = arith.constant 1.000000e+00 : f32
    %1108 = vector.broadcast %cst_224 : f32 to vector<8x128xf32>
    %1109 = arith.addf %1108, %1107 : vector<8x128xf32>
    %1110 = arith.divf %1108, %1109 : vector<8x128xf32>
    %1111 = vector.broadcast %135 : f32 to vector<8x128xf32>
    %1112 = arith.mulf %1111, %1086 : vector<8x128xf32>
    %1113 = vector.broadcast %139 : f32 to vector<8x128xf32>
    %1114 = arith.mulf %1113, %1026 : vector<8x128xf32>
    %1115 = arith.addf %1112, %1114 : vector<8x128xf32>
    %1116 = vector.broadcast %143 : f32 to vector<8x128xf32>
    %1117 = arith.addf %1115, %1116 : vector<8x128xf32>
    %1118 = math.tanh %1117 : vector<8x128xf32>
    %1119 = vector.broadcast %136 : f32 to vector<8x128xf32>
    %1120 = arith.mulf %1119, %1086 : vector<8x128xf32>
    %1121 = vector.broadcast %140 : f32 to vector<8x128xf32>
    %1122 = arith.mulf %1121, %1026 : vector<8x128xf32>
    %1123 = arith.addf %1120, %1122 : vector<8x128xf32>
    %1124 = vector.broadcast %144 : f32 to vector<8x128xf32>
    %1125 = arith.addf %1123, %1124 : vector<8x128xf32>
    %1126 = arith.negf %1125 : vector<8x128xf32>
    %1127 = math.exp %1126 : vector<8x128xf32>
    %cst_225 = arith.constant 1.000000e+00 : f32
    %1128 = vector.broadcast %cst_225 : f32 to vector<8x128xf32>
    %1129 = arith.addf %1128, %1127 : vector<8x128xf32>
    %1130 = arith.divf %1128, %1129 : vector<8x128xf32>
    %1131 = arith.mulf %1110, %1024 : vector<8x128xf32>
    %1132 = arith.mulf %1098, %1118 : vector<8x128xf32>
    %1133 = arith.addf %1131, %1132 : vector<8x128xf32>
    %1134 = math.tanh %1133 : vector<8x128xf32>
    %1135 = arith.mulf %1130, %1134 : vector<8x128xf32>
    %1136 = vector.broadcast %145 : f32 to vector<8x128xf32>
    %1137 = arith.mulf %1136, %1135 : vector<8x128xf32>
    %1138 = vector.broadcast %149 : f32 to vector<8x128xf32>
    %1139 = arith.mulf %1138, %1075 : vector<8x128xf32>
    %1140 = arith.addf %1137, %1139 : vector<8x128xf32>
    %1141 = vector.broadcast %153 : f32 to vector<8x128xf32>
    %1142 = arith.addf %1140, %1141 : vector<8x128xf32>
    %1143 = arith.negf %1142 : vector<8x128xf32>
    %1144 = math.exp %1143 : vector<8x128xf32>
    %cst_226 = arith.constant 1.000000e+00 : f32
    %1145 = vector.broadcast %cst_226 : f32 to vector<8x128xf32>
    %1146 = arith.addf %1145, %1144 : vector<8x128xf32>
    %1147 = arith.divf %1145, %1146 : vector<8x128xf32>
    %1148 = vector.broadcast %146 : f32 to vector<8x128xf32>
    %1149 = arith.mulf %1148, %1135 : vector<8x128xf32>
    %1150 = vector.broadcast %150 : f32 to vector<8x128xf32>
    %1151 = arith.mulf %1150, %1075 : vector<8x128xf32>
    %1152 = arith.addf %1149, %1151 : vector<8x128xf32>
    %1153 = vector.broadcast %154 : f32 to vector<8x128xf32>
    %1154 = arith.addf %1152, %1153 : vector<8x128xf32>
    %1155 = arith.negf %1154 : vector<8x128xf32>
    %1156 = math.exp %1155 : vector<8x128xf32>
    %cst_227 = arith.constant 1.000000e+00 : f32
    %1157 = vector.broadcast %cst_227 : f32 to vector<8x128xf32>
    %1158 = arith.addf %1157, %1156 : vector<8x128xf32>
    %1159 = arith.divf %1157, %1158 : vector<8x128xf32>
    %1160 = vector.broadcast %147 : f32 to vector<8x128xf32>
    %1161 = arith.mulf %1160, %1135 : vector<8x128xf32>
    %1162 = vector.broadcast %151 : f32 to vector<8x128xf32>
    %1163 = arith.mulf %1162, %1075 : vector<8x128xf32>
    %1164 = arith.addf %1161, %1163 : vector<8x128xf32>
    %1165 = vector.broadcast %155 : f32 to vector<8x128xf32>
    %1166 = arith.addf %1164, %1165 : vector<8x128xf32>
    %1167 = math.tanh %1166 : vector<8x128xf32>
    %1168 = vector.broadcast %148 : f32 to vector<8x128xf32>
    %1169 = arith.mulf %1168, %1135 : vector<8x128xf32>
    %1170 = vector.broadcast %152 : f32 to vector<8x128xf32>
    %1171 = arith.mulf %1170, %1075 : vector<8x128xf32>
    %1172 = arith.addf %1169, %1171 : vector<8x128xf32>
    %1173 = vector.broadcast %156 : f32 to vector<8x128xf32>
    %1174 = arith.addf %1172, %1173 : vector<8x128xf32>
    %1175 = arith.negf %1174 : vector<8x128xf32>
    %1176 = math.exp %1175 : vector<8x128xf32>
    %cst_228 = arith.constant 1.000000e+00 : f32
    %1177 = vector.broadcast %cst_228 : f32 to vector<8x128xf32>
    %1178 = arith.addf %1177, %1176 : vector<8x128xf32>
    %1179 = arith.divf %1177, %1178 : vector<8x128xf32>
    %1180 = arith.mulf %1159, %1073 : vector<8x128xf32>
    %1181 = arith.mulf %1147, %1167 : vector<8x128xf32>
    %1182 = arith.addf %1180, %1181 : vector<8x128xf32>
    %1183 = math.tanh %1182 : vector<8x128xf32>
    %1184 = arith.mulf %1179, %1183 : vector<8x128xf32>
    %1185 = vector.broadcast %165 : f32 to vector<8x128xf32>
    %1186 = arith.mulf %1185, %1184 : vector<8x128xf32>
    %1187 = arith.addf %1078, %1186 : vector<8x128xf32>
    %c9_229 = arith.constant 9 : index
    %c0_230 = arith.constant 0 : index
    %c0_231 = arith.constant 0 : index
    %1188 = vector.load %arg1[%c9_229, %c0_230, %c0_231] : memref<16x8x128xf32, #tpu.memory_space<vmem>>, vector<1x8x128xf32>
    %1189 = vector.shape_cast %1188 : vector<1x8x128xf32> to vector<8x128xf32>
    %1190 = arith.subf %1189, %48 : vector<8x128xf32>
    %1191 = arith.mulf %1190, %132 : vector<8x128xf32>
    %1192 = vector.broadcast %183 : f32 to vector<8x128xf32>
    %1193 = arith.mulf %1191, %1192 : vector<8x128xf32>
    %1194 = vector.broadcast %199 : f32 to vector<8x128xf32>
    %1195 = arith.addf %1193, %1194 : vector<8x128xf32>
    %1196 = vector.broadcast %133 : f32 to vector<8x128xf32>
    %1197 = arith.mulf %1196, %1195 : vector<8x128xf32>
    %1198 = vector.broadcast %137 : f32 to vector<8x128xf32>
    %1199 = arith.mulf %1198, %1135 : vector<8x128xf32>
    %1200 = arith.addf %1197, %1199 : vector<8x128xf32>
    %1201 = vector.broadcast %141 : f32 to vector<8x128xf32>
    %1202 = arith.addf %1200, %1201 : vector<8x128xf32>
    %1203 = arith.negf %1202 : vector<8x128xf32>
    %1204 = math.exp %1203 : vector<8x128xf32>
    %cst_232 = arith.constant 1.000000e+00 : f32
    %1205 = vector.broadcast %cst_232 : f32 to vector<8x128xf32>
    %1206 = arith.addf %1205, %1204 : vector<8x128xf32>
    %1207 = arith.divf %1205, %1206 : vector<8x128xf32>
    %1208 = vector.broadcast %134 : f32 to vector<8x128xf32>
    %1209 = arith.mulf %1208, %1195 : vector<8x128xf32>
    %1210 = vector.broadcast %138 : f32 to vector<8x128xf32>
    %1211 = arith.mulf %1210, %1135 : vector<8x128xf32>
    %1212 = arith.addf %1209, %1211 : vector<8x128xf32>
    %1213 = vector.broadcast %142 : f32 to vector<8x128xf32>
    %1214 = arith.addf %1212, %1213 : vector<8x128xf32>
    %1215 = arith.negf %1214 : vector<8x128xf32>
    %1216 = math.exp %1215 : vector<8x128xf32>
    %cst_233 = arith.constant 1.000000e+00 : f32
    %1217 = vector.broadcast %cst_233 : f32 to vector<8x128xf32>
    %1218 = arith.addf %1217, %1216 : vector<8x128xf32>
    %1219 = arith.divf %1217, %1218 : vector<8x128xf32>
    %1220 = vector.broadcast %135 : f32 to vector<8x128xf32>
    %1221 = arith.mulf %1220, %1195 : vector<8x128xf32>
    %1222 = vector.broadcast %139 : f32 to vector<8x128xf32>
    %1223 = arith.mulf %1222, %1135 : vector<8x128xf32>
    %1224 = arith.addf %1221, %1223 : vector<8x128xf32>
    %1225 = vector.broadcast %143 : f32 to vector<8x128xf32>
    %1226 = arith.addf %1224, %1225 : vector<8x128xf32>
    %1227 = math.tanh %1226 : vector<8x128xf32>
    %1228 = vector.broadcast %136 : f32 to vector<8x128xf32>
    %1229 = arith.mulf %1228, %1195 : vector<8x128xf32>
    %1230 = vector.broadcast %140 : f32 to vector<8x128xf32>
    %1231 = arith.mulf %1230, %1135 : vector<8x128xf32>
    %1232 = arith.addf %1229, %1231 : vector<8x128xf32>
    %1233 = vector.broadcast %144 : f32 to vector<8x128xf32>
    %1234 = arith.addf %1232, %1233 : vector<8x128xf32>
    %1235 = arith.negf %1234 : vector<8x128xf32>
    %1236 = math.exp %1235 : vector<8x128xf32>
    %cst_234 = arith.constant 1.000000e+00 : f32
    %1237 = vector.broadcast %cst_234 : f32 to vector<8x128xf32>
    %1238 = arith.addf %1237, %1236 : vector<8x128xf32>
    %1239 = arith.divf %1237, %1238 : vector<8x128xf32>
    %1240 = arith.mulf %1219, %1133 : vector<8x128xf32>
    %1241 = arith.mulf %1207, %1227 : vector<8x128xf32>
    %1242 = arith.addf %1240, %1241 : vector<8x128xf32>
    %1243 = math.tanh %1242 : vector<8x128xf32>
    %1244 = arith.mulf %1239, %1243 : vector<8x128xf32>
    %1245 = vector.broadcast %145 : f32 to vector<8x128xf32>
    %1246 = arith.mulf %1245, %1244 : vector<8x128xf32>
    %1247 = vector.broadcast %149 : f32 to vector<8x128xf32>
    %1248 = arith.mulf %1247, %1184 : vector<8x128xf32>
    %1249 = arith.addf %1246, %1248 : vector<8x128xf32>
    %1250 = vector.broadcast %153 : f32 to vector<8x128xf32>
    %1251 = arith.addf %1249, %1250 : vector<8x128xf32>
    %1252 = arith.negf %1251 : vector<8x128xf32>
    %1253 = math.exp %1252 : vector<8x128xf32>
    %cst_235 = arith.constant 1.000000e+00 : f32
    %1254 = vector.broadcast %cst_235 : f32 to vector<8x128xf32>
    %1255 = arith.addf %1254, %1253 : vector<8x128xf32>
    %1256 = arith.divf %1254, %1255 : vector<8x128xf32>
    %1257 = vector.broadcast %146 : f32 to vector<8x128xf32>
    %1258 = arith.mulf %1257, %1244 : vector<8x128xf32>
    %1259 = vector.broadcast %150 : f32 to vector<8x128xf32>
    %1260 = arith.mulf %1259, %1184 : vector<8x128xf32>
    %1261 = arith.addf %1258, %1260 : vector<8x128xf32>
    %1262 = vector.broadcast %154 : f32 to vector<8x128xf32>
    %1263 = arith.addf %1261, %1262 : vector<8x128xf32>
    %1264 = arith.negf %1263 : vector<8x128xf32>
    %1265 = math.exp %1264 : vector<8x128xf32>
    %cst_236 = arith.constant 1.000000e+00 : f32
    %1266 = vector.broadcast %cst_236 : f32 to vector<8x128xf32>
    %1267 = arith.addf %1266, %1265 : vector<8x128xf32>
    %1268 = arith.divf %1266, %1267 : vector<8x128xf32>
    %1269 = vector.broadcast %147 : f32 to vector<8x128xf32>
    %1270 = arith.mulf %1269, %1244 : vector<8x128xf32>
    %1271 = vector.broadcast %151 : f32 to vector<8x128xf32>
    %1272 = arith.mulf %1271, %1184 : vector<8x128xf32>
    %1273 = arith.addf %1270, %1272 : vector<8x128xf32>
    %1274 = vector.broadcast %155 : f32 to vector<8x128xf32>
    %1275 = arith.addf %1273, %1274 : vector<8x128xf32>
    %1276 = math.tanh %1275 : vector<8x128xf32>
    %1277 = vector.broadcast %148 : f32 to vector<8x128xf32>
    %1278 = arith.mulf %1277, %1244 : vector<8x128xf32>
    %1279 = vector.broadcast %152 : f32 to vector<8x128xf32>
    %1280 = arith.mulf %1279, %1184 : vector<8x128xf32>
    %1281 = arith.addf %1278, %1280 : vector<8x128xf32>
    %1282 = vector.broadcast %156 : f32 to vector<8x128xf32>
    %1283 = arith.addf %1281, %1282 : vector<8x128xf32>
    %1284 = arith.negf %1283 : vector<8x128xf32>
    %1285 = math.exp %1284 : vector<8x128xf32>
    %cst_237 = arith.constant 1.000000e+00 : f32
    %1286 = vector.broadcast %cst_237 : f32 to vector<8x128xf32>
    %1287 = arith.addf %1286, %1285 : vector<8x128xf32>
    %1288 = arith.divf %1286, %1287 : vector<8x128xf32>
    %1289 = arith.mulf %1268, %1182 : vector<8x128xf32>
    %1290 = arith.mulf %1256, %1276 : vector<8x128xf32>
    %1291 = arith.addf %1289, %1290 : vector<8x128xf32>
    %1292 = math.tanh %1291 : vector<8x128xf32>
    %1293 = arith.mulf %1288, %1292 : vector<8x128xf32>
    %1294 = vector.broadcast %166 : f32 to vector<8x128xf32>
    %1295 = arith.mulf %1294, %1293 : vector<8x128xf32>
    %1296 = arith.addf %1187, %1295 : vector<8x128xf32>
    %c10_238 = arith.constant 10 : index
    %c0_239 = arith.constant 0 : index
    %c0_240 = arith.constant 0 : index
    %1297 = vector.load %arg1[%c10_238, %c0_239, %c0_240] : memref<16x8x128xf32, #tpu.memory_space<vmem>>, vector<1x8x128xf32>
    %1298 = vector.shape_cast %1297 : vector<1x8x128xf32> to vector<8x128xf32>
    %1299 = arith.subf %1298, %48 : vector<8x128xf32>
    %1300 = arith.mulf %1299, %132 : vector<8x128xf32>
    %1301 = vector.broadcast %184 : f32 to vector<8x128xf32>
    %1302 = arith.mulf %1300, %1301 : vector<8x128xf32>
    %1303 = vector.broadcast %200 : f32 to vector<8x128xf32>
    %1304 = arith.addf %1302, %1303 : vector<8x128xf32>
    %1305 = vector.broadcast %133 : f32 to vector<8x128xf32>
    %1306 = arith.mulf %1305, %1304 : vector<8x128xf32>
    %1307 = vector.broadcast %137 : f32 to vector<8x128xf32>
    %1308 = arith.mulf %1307, %1244 : vector<8x128xf32>
    %1309 = arith.addf %1306, %1308 : vector<8x128xf32>
    %1310 = vector.broadcast %141 : f32 to vector<8x128xf32>
    %1311 = arith.addf %1309, %1310 : vector<8x128xf32>
    %1312 = arith.negf %1311 : vector<8x128xf32>
    %1313 = math.exp %1312 : vector<8x128xf32>
    %cst_241 = arith.constant 1.000000e+00 : f32
    %1314 = vector.broadcast %cst_241 : f32 to vector<8x128xf32>
    %1315 = arith.addf %1314, %1313 : vector<8x128xf32>
    %1316 = arith.divf %1314, %1315 : vector<8x128xf32>
    %1317 = vector.broadcast %134 : f32 to vector<8x128xf32>
    %1318 = arith.mulf %1317, %1304 : vector<8x128xf32>
    %1319 = vector.broadcast %138 : f32 to vector<8x128xf32>
    %1320 = arith.mulf %1319, %1244 : vector<8x128xf32>
    %1321 = arith.addf %1318, %1320 : vector<8x128xf32>
    %1322 = vector.broadcast %142 : f32 to vector<8x128xf32>
    %1323 = arith.addf %1321, %1322 : vector<8x128xf32>
    %1324 = arith.negf %1323 : vector<8x128xf32>
    %1325 = math.exp %1324 : vector<8x128xf32>
    %cst_242 = arith.constant 1.000000e+00 : f32
    %1326 = vector.broadcast %cst_242 : f32 to vector<8x128xf32>
    %1327 = arith.addf %1326, %1325 : vector<8x128xf32>
    %1328 = arith.divf %1326, %1327 : vector<8x128xf32>
    %1329 = vector.broadcast %135 : f32 to vector<8x128xf32>
    %1330 = arith.mulf %1329, %1304 : vector<8x128xf32>
    %1331 = vector.broadcast %139 : f32 to vector<8x128xf32>
    %1332 = arith.mulf %1331, %1244 : vector<8x128xf32>
    %1333 = arith.addf %1330, %1332 : vector<8x128xf32>
    %1334 = vector.broadcast %143 : f32 to vector<8x128xf32>
    %1335 = arith.addf %1333, %1334 : vector<8x128xf32>
    %1336 = math.tanh %1335 : vector<8x128xf32>
    %1337 = vector.broadcast %136 : f32 to vector<8x128xf32>
    %1338 = arith.mulf %1337, %1304 : vector<8x128xf32>
    %1339 = vector.broadcast %140 : f32 to vector<8x128xf32>
    %1340 = arith.mulf %1339, %1244 : vector<8x128xf32>
    %1341 = arith.addf %1338, %1340 : vector<8x128xf32>
    %1342 = vector.broadcast %144 : f32 to vector<8x128xf32>
    %1343 = arith.addf %1341, %1342 : vector<8x128xf32>
    %1344 = arith.negf %1343 : vector<8x128xf32>
    %1345 = math.exp %1344 : vector<8x128xf32>
    %cst_243 = arith.constant 1.000000e+00 : f32
    %1346 = vector.broadcast %cst_243 : f32 to vector<8x128xf32>
    %1347 = arith.addf %1346, %1345 : vector<8x128xf32>
    %1348 = arith.divf %1346, %1347 : vector<8x128xf32>
    %1349 = arith.mulf %1328, %1242 : vector<8x128xf32>
    %1350 = arith.mulf %1316, %1336 : vector<8x128xf32>
    %1351 = arith.addf %1349, %1350 : vector<8x128xf32>
    %1352 = math.tanh %1351 : vector<8x128xf32>
    %1353 = arith.mulf %1348, %1352 : vector<8x128xf32>
    %1354 = vector.broadcast %145 : f32 to vector<8x128xf32>
    %1355 = arith.mulf %1354, %1353 : vector<8x128xf32>
    %1356 = vector.broadcast %149 : f32 to vector<8x128xf32>
    %1357 = arith.mulf %1356, %1293 : vector<8x128xf32>
    %1358 = arith.addf %1355, %1357 : vector<8x128xf32>
    %1359 = vector.broadcast %153 : f32 to vector<8x128xf32>
    %1360 = arith.addf %1358, %1359 : vector<8x128xf32>
    %1361 = arith.negf %1360 : vector<8x128xf32>
    %1362 = math.exp %1361 : vector<8x128xf32>
    %cst_244 = arith.constant 1.000000e+00 : f32
    %1363 = vector.broadcast %cst_244 : f32 to vector<8x128xf32>
    %1364 = arith.addf %1363, %1362 : vector<8x128xf32>
    %1365 = arith.divf %1363, %1364 : vector<8x128xf32>
    %1366 = vector.broadcast %146 : f32 to vector<8x128xf32>
    %1367 = arith.mulf %1366, %1353 : vector<8x128xf32>
    %1368 = vector.broadcast %150 : f32 to vector<8x128xf32>
    %1369 = arith.mulf %1368, %1293 : vector<8x128xf32>
    %1370 = arith.addf %1367, %1369 : vector<8x128xf32>
    %1371 = vector.broadcast %154 : f32 to vector<8x128xf32>
    %1372 = arith.addf %1370, %1371 : vector<8x128xf32>
    %1373 = arith.negf %1372 : vector<8x128xf32>
    %1374 = math.exp %1373 : vector<8x128xf32>
    %cst_245 = arith.constant 1.000000e+00 : f32
    %1375 = vector.broadcast %cst_245 : f32 to vector<8x128xf32>
    %1376 = arith.addf %1375, %1374 : vector<8x128xf32>
    %1377 = arith.divf %1375, %1376 : vector<8x128xf32>
    %1378 = vector.broadcast %147 : f32 to vector<8x128xf32>
    %1379 = arith.mulf %1378, %1353 : vector<8x128xf32>
    %1380 = vector.broadcast %151 : f32 to vector<8x128xf32>
    %1381 = arith.mulf %1380, %1293 : vector<8x128xf32>
    %1382 = arith.addf %1379, %1381 : vector<8x128xf32>
    %1383 = vector.broadcast %155 : f32 to vector<8x128xf32>
    %1384 = arith.addf %1382, %1383 : vector<8x128xf32>
    %1385 = math.tanh %1384 : vector<8x128xf32>
    %1386 = vector.broadcast %148 : f32 to vector<8x128xf32>
    %1387 = arith.mulf %1386, %1353 : vector<8x128xf32>
    %1388 = vector.broadcast %152 : f32 to vector<8x128xf32>
    %1389 = arith.mulf %1388, %1293 : vector<8x128xf32>
    %1390 = arith.addf %1387, %1389 : vector<8x128xf32>
    %1391 = vector.broadcast %156 : f32 to vector<8x128xf32>
    %1392 = arith.addf %1390, %1391 : vector<8x128xf32>
    %1393 = arith.negf %1392 : vector<8x128xf32>
    %1394 = math.exp %1393 : vector<8x128xf32>
    %cst_246 = arith.constant 1.000000e+00 : f32
    %1395 = vector.broadcast %cst_246 : f32 to vector<8x128xf32>
    %1396 = arith.addf %1395, %1394 : vector<8x128xf32>
    %1397 = arith.divf %1395, %1396 : vector<8x128xf32>
    %1398 = arith.mulf %1377, %1291 : vector<8x128xf32>
    %1399 = arith.mulf %1365, %1385 : vector<8x128xf32>
    %1400 = arith.addf %1398, %1399 : vector<8x128xf32>
    %1401 = math.tanh %1400 : vector<8x128xf32>
    %1402 = arith.mulf %1397, %1401 : vector<8x128xf32>
    %1403 = vector.broadcast %167 : f32 to vector<8x128xf32>
    %1404 = arith.mulf %1403, %1402 : vector<8x128xf32>
    %1405 = arith.addf %1296, %1404 : vector<8x128xf32>
    %c11_247 = arith.constant 11 : index
    %c0_248 = arith.constant 0 : index
    %c0_249 = arith.constant 0 : index
    %1406 = vector.load %arg1[%c11_247, %c0_248, %c0_249] : memref<16x8x128xf32, #tpu.memory_space<vmem>>, vector<1x8x128xf32>
    %1407 = vector.shape_cast %1406 : vector<1x8x128xf32> to vector<8x128xf32>
    %1408 = arith.subf %1407, %48 : vector<8x128xf32>
    %1409 = arith.mulf %1408, %132 : vector<8x128xf32>
    %1410 = vector.broadcast %185 : f32 to vector<8x128xf32>
    %1411 = arith.mulf %1409, %1410 : vector<8x128xf32>
    %1412 = vector.broadcast %201 : f32 to vector<8x128xf32>
    %1413 = arith.addf %1411, %1412 : vector<8x128xf32>
    %1414 = vector.broadcast %133 : f32 to vector<8x128xf32>
    %1415 = arith.mulf %1414, %1413 : vector<8x128xf32>
    %1416 = vector.broadcast %137 : f32 to vector<8x128xf32>
    %1417 = arith.mulf %1416, %1353 : vector<8x128xf32>
    %1418 = arith.addf %1415, %1417 : vector<8x128xf32>
    %1419 = vector.broadcast %141 : f32 to vector<8x128xf32>
    %1420 = arith.addf %1418, %1419 : vector<8x128xf32>
    %1421 = arith.negf %1420 : vector<8x128xf32>
    %1422 = math.exp %1421 : vector<8x128xf32>
    %cst_250 = arith.constant 1.000000e+00 : f32
    %1423 = vector.broadcast %cst_250 : f32 to vector<8x128xf32>
    %1424 = arith.addf %1423, %1422 : vector<8x128xf32>
    %1425 = arith.divf %1423, %1424 : vector<8x128xf32>
    %1426 = vector.broadcast %134 : f32 to vector<8x128xf32>
    %1427 = arith.mulf %1426, %1413 : vector<8x128xf32>
    %1428 = vector.broadcast %138 : f32 to vector<8x128xf32>
    %1429 = arith.mulf %1428, %1353 : vector<8x128xf32>
    %1430 = arith.addf %1427, %1429 : vector<8x128xf32>
    %1431 = vector.broadcast %142 : f32 to vector<8x128xf32>
    %1432 = arith.addf %1430, %1431 : vector<8x128xf32>
    %1433 = arith.negf %1432 : vector<8x128xf32>
    %1434 = math.exp %1433 : vector<8x128xf32>
    %cst_251 = arith.constant 1.000000e+00 : f32
    %1435 = vector.broadcast %cst_251 : f32 to vector<8x128xf32>
    %1436 = arith.addf %1435, %1434 : vector<8x128xf32>
    %1437 = arith.divf %1435, %1436 : vector<8x128xf32>
    %1438 = vector.broadcast %135 : f32 to vector<8x128xf32>
    %1439 = arith.mulf %1438, %1413 : vector<8x128xf32>
    %1440 = vector.broadcast %139 : f32 to vector<8x128xf32>
    %1441 = arith.mulf %1440, %1353 : vector<8x128xf32>
    %1442 = arith.addf %1439, %1441 : vector<8x128xf32>
    %1443 = vector.broadcast %143 : f32 to vector<8x128xf32>
    %1444 = arith.addf %1442, %1443 : vector<8x128xf32>
    %1445 = math.tanh %1444 : vector<8x128xf32>
    %1446 = vector.broadcast %136 : f32 to vector<8x128xf32>
    %1447 = arith.mulf %1446, %1413 : vector<8x128xf32>
    %1448 = vector.broadcast %140 : f32 to vector<8x128xf32>
    %1449 = arith.mulf %1448, %1353 : vector<8x128xf32>
    %1450 = arith.addf %1447, %1449 : vector<8x128xf32>
    %1451 = vector.broadcast %144 : f32 to vector<8x128xf32>
    %1452 = arith.addf %1450, %1451 : vector<8x128xf32>
    %1453 = arith.negf %1452 : vector<8x128xf32>
    %1454 = math.exp %1453 : vector<8x128xf32>
    %cst_252 = arith.constant 1.000000e+00 : f32
    %1455 = vector.broadcast %cst_252 : f32 to vector<8x128xf32>
    %1456 = arith.addf %1455, %1454 : vector<8x128xf32>
    %1457 = arith.divf %1455, %1456 : vector<8x128xf32>
    %1458 = arith.mulf %1437, %1351 : vector<8x128xf32>
    %1459 = arith.mulf %1425, %1445 : vector<8x128xf32>
    %1460 = arith.addf %1458, %1459 : vector<8x128xf32>
    %1461 = math.tanh %1460 : vector<8x128xf32>
    %1462 = arith.mulf %1457, %1461 : vector<8x128xf32>
    %1463 = vector.broadcast %145 : f32 to vector<8x128xf32>
    %1464 = arith.mulf %1463, %1462 : vector<8x128xf32>
    %1465 = vector.broadcast %149 : f32 to vector<8x128xf32>
    %1466 = arith.mulf %1465, %1402 : vector<8x128xf32>
    %1467 = arith.addf %1464, %1466 : vector<8x128xf32>
    %1468 = vector.broadcast %153 : f32 to vector<8x128xf32>
    %1469 = arith.addf %1467, %1468 : vector<8x128xf32>
    %1470 = arith.negf %1469 : vector<8x128xf32>
    %1471 = math.exp %1470 : vector<8x128xf32>
    %cst_253 = arith.constant 1.000000e+00 : f32
    %1472 = vector.broadcast %cst_253 : f32 to vector<8x128xf32>
    %1473 = arith.addf %1472, %1471 : vector<8x128xf32>
    %1474 = arith.divf %1472, %1473 : vector<8x128xf32>
    %1475 = vector.broadcast %146 : f32 to vector<8x128xf32>
    %1476 = arith.mulf %1475, %1462 : vector<8x128xf32>
    %1477 = vector.broadcast %150 : f32 to vector<8x128xf32>
    %1478 = arith.mulf %1477, %1402 : vector<8x128xf32>
    %1479 = arith.addf %1476, %1478 : vector<8x128xf32>
    %1480 = vector.broadcast %154 : f32 to vector<8x128xf32>
    %1481 = arith.addf %1479, %1480 : vector<8x128xf32>
    %1482 = arith.negf %1481 : vector<8x128xf32>
    %1483 = math.exp %1482 : vector<8x128xf32>
    %cst_254 = arith.constant 1.000000e+00 : f32
    %1484 = vector.broadcast %cst_254 : f32 to vector<8x128xf32>
    %1485 = arith.addf %1484, %1483 : vector<8x128xf32>
    %1486 = arith.divf %1484, %1485 : vector<8x128xf32>
    %1487 = vector.broadcast %147 : f32 to vector<8x128xf32>
    %1488 = arith.mulf %1487, %1462 : vector<8x128xf32>
    %1489 = vector.broadcast %151 : f32 to vector<8x128xf32>
    %1490 = arith.mulf %1489, %1402 : vector<8x128xf32>
    %1491 = arith.addf %1488, %1490 : vector<8x128xf32>
    %1492 = vector.broadcast %155 : f32 to vector<8x128xf32>
    %1493 = arith.addf %1491, %1492 : vector<8x128xf32>
    %1494 = math.tanh %1493 : vector<8x128xf32>
    %1495 = vector.broadcast %148 : f32 to vector<8x128xf32>
    %1496 = arith.mulf %1495, %1462 : vector<8x128xf32>
    %1497 = vector.broadcast %152 : f32 to vector<8x128xf32>
    %1498 = arith.mulf %1497, %1402 : vector<8x128xf32>
    %1499 = arith.addf %1496, %1498 : vector<8x128xf32>
    %1500 = vector.broadcast %156 : f32 to vector<8x128xf32>
    %1501 = arith.addf %1499, %1500 : vector<8x128xf32>
    %1502 = arith.negf %1501 : vector<8x128xf32>
    %1503 = math.exp %1502 : vector<8x128xf32>
    %cst_255 = arith.constant 1.000000e+00 : f32
    %1504 = vector.broadcast %cst_255 : f32 to vector<8x128xf32>
    %1505 = arith.addf %1504, %1503 : vector<8x128xf32>
    %1506 = arith.divf %1504, %1505 : vector<8x128xf32>
    %1507 = arith.mulf %1486, %1400 : vector<8x128xf32>
    %1508 = arith.mulf %1474, %1494 : vector<8x128xf32>
    %1509 = arith.addf %1507, %1508 : vector<8x128xf32>
    %1510 = math.tanh %1509 : vector<8x128xf32>
    %1511 = arith.mulf %1506, %1510 : vector<8x128xf32>
    %1512 = vector.broadcast %168 : f32 to vector<8x128xf32>
    %1513 = arith.mulf %1512, %1511 : vector<8x128xf32>
    %1514 = arith.addf %1405, %1513 : vector<8x128xf32>
    %c12_256 = arith.constant 12 : index
    %c0_257 = arith.constant 0 : index
    %c0_258 = arith.constant 0 : index
    %1515 = vector.load %arg1[%c12_256, %c0_257, %c0_258] : memref<16x8x128xf32, #tpu.memory_space<vmem>>, vector<1x8x128xf32>
    %1516 = vector.shape_cast %1515 : vector<1x8x128xf32> to vector<8x128xf32>
    %1517 = arith.subf %1516, %48 : vector<8x128xf32>
    %1518 = arith.mulf %1517, %132 : vector<8x128xf32>
    %1519 = vector.broadcast %186 : f32 to vector<8x128xf32>
    %1520 = arith.mulf %1518, %1519 : vector<8x128xf32>
    %1521 = vector.broadcast %202 : f32 to vector<8x128xf32>
    %1522 = arith.addf %1520, %1521 : vector<8x128xf32>
    %1523 = vector.broadcast %133 : f32 to vector<8x128xf32>
    %1524 = arith.mulf %1523, %1522 : vector<8x128xf32>
    %1525 = vector.broadcast %137 : f32 to vector<8x128xf32>
    %1526 = arith.mulf %1525, %1462 : vector<8x128xf32>
    %1527 = arith.addf %1524, %1526 : vector<8x128xf32>
    %1528 = vector.broadcast %141 : f32 to vector<8x128xf32>
    %1529 = arith.addf %1527, %1528 : vector<8x128xf32>
    %1530 = arith.negf %1529 : vector<8x128xf32>
    %1531 = math.exp %1530 : vector<8x128xf32>
    %cst_259 = arith.constant 1.000000e+00 : f32
    %1532 = vector.broadcast %cst_259 : f32 to vector<8x128xf32>
    %1533 = arith.addf %1532, %1531 : vector<8x128xf32>
    %1534 = arith.divf %1532, %1533 : vector<8x128xf32>
    %1535 = vector.broadcast %134 : f32 to vector<8x128xf32>
    %1536 = arith.mulf %1535, %1522 : vector<8x128xf32>
    %1537 = vector.broadcast %138 : f32 to vector<8x128xf32>
    %1538 = arith.mulf %1537, %1462 : vector<8x128xf32>
    %1539 = arith.addf %1536, %1538 : vector<8x128xf32>
    %1540 = vector.broadcast %142 : f32 to vector<8x128xf32>
    %1541 = arith.addf %1539, %1540 : vector<8x128xf32>
    %1542 = arith.negf %1541 : vector<8x128xf32>
    %1543 = math.exp %1542 : vector<8x128xf32>
    %cst_260 = arith.constant 1.000000e+00 : f32
    %1544 = vector.broadcast %cst_260 : f32 to vector<8x128xf32>
    %1545 = arith.addf %1544, %1543 : vector<8x128xf32>
    %1546 = arith.divf %1544, %1545 : vector<8x128xf32>
    %1547 = vector.broadcast %135 : f32 to vector<8x128xf32>
    %1548 = arith.mulf %1547, %1522 : vector<8x128xf32>
    %1549 = vector.broadcast %139 : f32 to vector<8x128xf32>
    %1550 = arith.mulf %1549, %1462 : vector<8x128xf32>
    %1551 = arith.addf %1548, %1550 : vector<8x128xf32>
    %1552 = vector.broadcast %143 : f32 to vector<8x128xf32>
    %1553 = arith.addf %1551, %1552 : vector<8x128xf32>
    %1554 = math.tanh %1553 : vector<8x128xf32>
    %1555 = vector.broadcast %136 : f32 to vector<8x128xf32>
    %1556 = arith.mulf %1555, %1522 : vector<8x128xf32>
    %1557 = vector.broadcast %140 : f32 to vector<8x128xf32>
    %1558 = arith.mulf %1557, %1462 : vector<8x128xf32>
    %1559 = arith.addf %1556, %1558 : vector<8x128xf32>
    %1560 = vector.broadcast %144 : f32 to vector<8x128xf32>
    %1561 = arith.addf %1559, %1560 : vector<8x128xf32>
    %1562 = arith.negf %1561 : vector<8x128xf32>
    %1563 = math.exp %1562 : vector<8x128xf32>
    %cst_261 = arith.constant 1.000000e+00 : f32
    %1564 = vector.broadcast %cst_261 : f32 to vector<8x128xf32>
    %1565 = arith.addf %1564, %1563 : vector<8x128xf32>
    %1566 = arith.divf %1564, %1565 : vector<8x128xf32>
    %1567 = arith.mulf %1546, %1460 : vector<8x128xf32>
    %1568 = arith.mulf %1534, %1554 : vector<8x128xf32>
    %1569 = arith.addf %1567, %1568 : vector<8x128xf32>
    %1570 = math.tanh %1569 : vector<8x128xf32>
    %1571 = arith.mulf %1566, %1570 : vector<8x128xf32>
    %1572 = vector.broadcast %145 : f32 to vector<8x128xf32>
    %1573 = arith.mulf %1572, %1571 : vector<8x128xf32>
    %1574 = vector.broadcast %149 : f32 to vector<8x128xf32>
    %1575 = arith.mulf %1574, %1511 : vector<8x128xf32>
    %1576 = arith.addf %1573, %1575 : vector<8x128xf32>
    %1577 = vector.broadcast %153 : f32 to vector<8x128xf32>
    %1578 = arith.addf %1576, %1577 : vector<8x128xf32>
    %1579 = arith.negf %1578 : vector<8x128xf32>
    %1580 = math.exp %1579 : vector<8x128xf32>
    %cst_262 = arith.constant 1.000000e+00 : f32
    %1581 = vector.broadcast %cst_262 : f32 to vector<8x128xf32>
    %1582 = arith.addf %1581, %1580 : vector<8x128xf32>
    %1583 = arith.divf %1581, %1582 : vector<8x128xf32>
    %1584 = vector.broadcast %146 : f32 to vector<8x128xf32>
    %1585 = arith.mulf %1584, %1571 : vector<8x128xf32>
    %1586 = vector.broadcast %150 : f32 to vector<8x128xf32>
    %1587 = arith.mulf %1586, %1511 : vector<8x128xf32>
    %1588 = arith.addf %1585, %1587 : vector<8x128xf32>
    %1589 = vector.broadcast %154 : f32 to vector<8x128xf32>
    %1590 = arith.addf %1588, %1589 : vector<8x128xf32>
    %1591 = arith.negf %1590 : vector<8x128xf32>
    %1592 = math.exp %1591 : vector<8x128xf32>
    %cst_263 = arith.constant 1.000000e+00 : f32
    %1593 = vector.broadcast %cst_263 : f32 to vector<8x128xf32>
    %1594 = arith.addf %1593, %1592 : vector<8x128xf32>
    %1595 = arith.divf %1593, %1594 : vector<8x128xf32>
    %1596 = vector.broadcast %147 : f32 to vector<8x128xf32>
    %1597 = arith.mulf %1596, %1571 : vector<8x128xf32>
    %1598 = vector.broadcast %151 : f32 to vector<8x128xf32>
    %1599 = arith.mulf %1598, %1511 : vector<8x128xf32>
    %1600 = arith.addf %1597, %1599 : vector<8x128xf32>
    %1601 = vector.broadcast %155 : f32 to vector<8x128xf32>
    %1602 = arith.addf %1600, %1601 : vector<8x128xf32>
    %1603 = math.tanh %1602 : vector<8x128xf32>
    %1604 = vector.broadcast %148 : f32 to vector<8x128xf32>
    %1605 = arith.mulf %1604, %1571 : vector<8x128xf32>
    %1606 = vector.broadcast %152 : f32 to vector<8x128xf32>
    %1607 = arith.mulf %1606, %1511 : vector<8x128xf32>
    %1608 = arith.addf %1605, %1607 : vector<8x128xf32>
    %1609 = vector.broadcast %156 : f32 to vector<8x128xf32>
    %1610 = arith.addf %1608, %1609 : vector<8x128xf32>
    %1611 = arith.negf %1610 : vector<8x128xf32>
    %1612 = math.exp %1611 : vector<8x128xf32>
    %cst_264 = arith.constant 1.000000e+00 : f32
    %1613 = vector.broadcast %cst_264 : f32 to vector<8x128xf32>
    %1614 = arith.addf %1613, %1612 : vector<8x128xf32>
    %1615 = arith.divf %1613, %1614 : vector<8x128xf32>
    %1616 = arith.mulf %1595, %1509 : vector<8x128xf32>
    %1617 = arith.mulf %1583, %1603 : vector<8x128xf32>
    %1618 = arith.addf %1616, %1617 : vector<8x128xf32>
    %1619 = math.tanh %1618 : vector<8x128xf32>
    %1620 = arith.mulf %1615, %1619 : vector<8x128xf32>
    %1621 = vector.broadcast %169 : f32 to vector<8x128xf32>
    %1622 = arith.mulf %1621, %1620 : vector<8x128xf32>
    %1623 = arith.addf %1514, %1622 : vector<8x128xf32>
    %c13_265 = arith.constant 13 : index
    %c0_266 = arith.constant 0 : index
    %c0_267 = arith.constant 0 : index
    %1624 = vector.load %arg1[%c13_265, %c0_266, %c0_267] : memref<16x8x128xf32, #tpu.memory_space<vmem>>, vector<1x8x128xf32>
    %1625 = vector.shape_cast %1624 : vector<1x8x128xf32> to vector<8x128xf32>
    %1626 = arith.subf %1625, %48 : vector<8x128xf32>
    %1627 = arith.mulf %1626, %132 : vector<8x128xf32>
    %1628 = vector.broadcast %187 : f32 to vector<8x128xf32>
    %1629 = arith.mulf %1627, %1628 : vector<8x128xf32>
    %1630 = vector.broadcast %203 : f32 to vector<8x128xf32>
    %1631 = arith.addf %1629, %1630 : vector<8x128xf32>
    %1632 = vector.broadcast %133 : f32 to vector<8x128xf32>
    %1633 = arith.mulf %1632, %1631 : vector<8x128xf32>
    %1634 = vector.broadcast %137 : f32 to vector<8x128xf32>
    %1635 = arith.mulf %1634, %1571 : vector<8x128xf32>
    %1636 = arith.addf %1633, %1635 : vector<8x128xf32>
    %1637 = vector.broadcast %141 : f32 to vector<8x128xf32>
    %1638 = arith.addf %1636, %1637 : vector<8x128xf32>
    %1639 = arith.negf %1638 : vector<8x128xf32>
    %1640 = math.exp %1639 : vector<8x128xf32>
    %cst_268 = arith.constant 1.000000e+00 : f32
    %1641 = vector.broadcast %cst_268 : f32 to vector<8x128xf32>
    %1642 = arith.addf %1641, %1640 : vector<8x128xf32>
    %1643 = arith.divf %1641, %1642 : vector<8x128xf32>
    %1644 = vector.broadcast %134 : f32 to vector<8x128xf32>
    %1645 = arith.mulf %1644, %1631 : vector<8x128xf32>
    %1646 = vector.broadcast %138 : f32 to vector<8x128xf32>
    %1647 = arith.mulf %1646, %1571 : vector<8x128xf32>
    %1648 = arith.addf %1645, %1647 : vector<8x128xf32>
    %1649 = vector.broadcast %142 : f32 to vector<8x128xf32>
    %1650 = arith.addf %1648, %1649 : vector<8x128xf32>
    %1651 = arith.negf %1650 : vector<8x128xf32>
    %1652 = math.exp %1651 : vector<8x128xf32>
    %cst_269 = arith.constant 1.000000e+00 : f32
    %1653 = vector.broadcast %cst_269 : f32 to vector<8x128xf32>
    %1654 = arith.addf %1653, %1652 : vector<8x128xf32>
    %1655 = arith.divf %1653, %1654 : vector<8x128xf32>
    %1656 = vector.broadcast %135 : f32 to vector<8x128xf32>
    %1657 = arith.mulf %1656, %1631 : vector<8x128xf32>
    %1658 = vector.broadcast %139 : f32 to vector<8x128xf32>
    %1659 = arith.mulf %1658, %1571 : vector<8x128xf32>
    %1660 = arith.addf %1657, %1659 : vector<8x128xf32>
    %1661 = vector.broadcast %143 : f32 to vector<8x128xf32>
    %1662 = arith.addf %1660, %1661 : vector<8x128xf32>
    %1663 = math.tanh %1662 : vector<8x128xf32>
    %1664 = vector.broadcast %136 : f32 to vector<8x128xf32>
    %1665 = arith.mulf %1664, %1631 : vector<8x128xf32>
    %1666 = vector.broadcast %140 : f32 to vector<8x128xf32>
    %1667 = arith.mulf %1666, %1571 : vector<8x128xf32>
    %1668 = arith.addf %1665, %1667 : vector<8x128xf32>
    %1669 = vector.broadcast %144 : f32 to vector<8x128xf32>
    %1670 = arith.addf %1668, %1669 : vector<8x128xf32>
    %1671 = arith.negf %1670 : vector<8x128xf32>
    %1672 = math.exp %1671 : vector<8x128xf32>
    %cst_270 = arith.constant 1.000000e+00 : f32
    %1673 = vector.broadcast %cst_270 : f32 to vector<8x128xf32>
    %1674 = arith.addf %1673, %1672 : vector<8x128xf32>
    %1675 = arith.divf %1673, %1674 : vector<8x128xf32>
    %1676 = arith.mulf %1655, %1569 : vector<8x128xf32>
    %1677 = arith.mulf %1643, %1663 : vector<8x128xf32>
    %1678 = arith.addf %1676, %1677 : vector<8x128xf32>
    %1679 = math.tanh %1678 : vector<8x128xf32>
    %1680 = arith.mulf %1675, %1679 : vector<8x128xf32>
    %1681 = vector.broadcast %145 : f32 to vector<8x128xf32>
    %1682 = arith.mulf %1681, %1680 : vector<8x128xf32>
    %1683 = vector.broadcast %149 : f32 to vector<8x128xf32>
    %1684 = arith.mulf %1683, %1620 : vector<8x128xf32>
    %1685 = arith.addf %1682, %1684 : vector<8x128xf32>
    %1686 = vector.broadcast %153 : f32 to vector<8x128xf32>
    %1687 = arith.addf %1685, %1686 : vector<8x128xf32>
    %1688 = arith.negf %1687 : vector<8x128xf32>
    %1689 = math.exp %1688 : vector<8x128xf32>
    %cst_271 = arith.constant 1.000000e+00 : f32
    %1690 = vector.broadcast %cst_271 : f32 to vector<8x128xf32>
    %1691 = arith.addf %1690, %1689 : vector<8x128xf32>
    %1692 = arith.divf %1690, %1691 : vector<8x128xf32>
    %1693 = vector.broadcast %146 : f32 to vector<8x128xf32>
    %1694 = arith.mulf %1693, %1680 : vector<8x128xf32>
    %1695 = vector.broadcast %150 : f32 to vector<8x128xf32>
    %1696 = arith.mulf %1695, %1620 : vector<8x128xf32>
    %1697 = arith.addf %1694, %1696 : vector<8x128xf32>
    %1698 = vector.broadcast %154 : f32 to vector<8x128xf32>
    %1699 = arith.addf %1697, %1698 : vector<8x128xf32>
    %1700 = arith.negf %1699 : vector<8x128xf32>
    %1701 = math.exp %1700 : vector<8x128xf32>
    %cst_272 = arith.constant 1.000000e+00 : f32
    %1702 = vector.broadcast %cst_272 : f32 to vector<8x128xf32>
    %1703 = arith.addf %1702, %1701 : vector<8x128xf32>
    %1704 = arith.divf %1702, %1703 : vector<8x128xf32>
    %1705 = vector.broadcast %147 : f32 to vector<8x128xf32>
    %1706 = arith.mulf %1705, %1680 : vector<8x128xf32>
    %1707 = vector.broadcast %151 : f32 to vector<8x128xf32>
    %1708 = arith.mulf %1707, %1620 : vector<8x128xf32>
    %1709 = arith.addf %1706, %1708 : vector<8x128xf32>
    %1710 = vector.broadcast %155 : f32 to vector<8x128xf32>
    %1711 = arith.addf %1709, %1710 : vector<8x128xf32>
    %1712 = math.tanh %1711 : vector<8x128xf32>
    %1713 = vector.broadcast %148 : f32 to vector<8x128xf32>
    %1714 = arith.mulf %1713, %1680 : vector<8x128xf32>
    %1715 = vector.broadcast %152 : f32 to vector<8x128xf32>
    %1716 = arith.mulf %1715, %1620 : vector<8x128xf32>
    %1717 = arith.addf %1714, %1716 : vector<8x128xf32>
    %1718 = vector.broadcast %156 : f32 to vector<8x128xf32>
    %1719 = arith.addf %1717, %1718 : vector<8x128xf32>
    %1720 = arith.negf %1719 : vector<8x128xf32>
    %1721 = math.exp %1720 : vector<8x128xf32>
    %cst_273 = arith.constant 1.000000e+00 : f32
    %1722 = vector.broadcast %cst_273 : f32 to vector<8x128xf32>
    %1723 = arith.addf %1722, %1721 : vector<8x128xf32>
    %1724 = arith.divf %1722, %1723 : vector<8x128xf32>
    %1725 = arith.mulf %1704, %1618 : vector<8x128xf32>
    %1726 = arith.mulf %1692, %1712 : vector<8x128xf32>
    %1727 = arith.addf %1725, %1726 : vector<8x128xf32>
    %1728 = math.tanh %1727 : vector<8x128xf32>
    %1729 = arith.mulf %1724, %1728 : vector<8x128xf32>
    %1730 = vector.broadcast %170 : f32 to vector<8x128xf32>
    %1731 = arith.mulf %1730, %1729 : vector<8x128xf32>
    %1732 = arith.addf %1623, %1731 : vector<8x128xf32>
    %c14_274 = arith.constant 14 : index
    %c0_275 = arith.constant 0 : index
    %c0_276 = arith.constant 0 : index
    %1733 = vector.load %arg1[%c14_274, %c0_275, %c0_276] : memref<16x8x128xf32, #tpu.memory_space<vmem>>, vector<1x8x128xf32>
    %1734 = vector.shape_cast %1733 : vector<1x8x128xf32> to vector<8x128xf32>
    %1735 = arith.subf %1734, %48 : vector<8x128xf32>
    %1736 = arith.mulf %1735, %132 : vector<8x128xf32>
    %1737 = vector.broadcast %188 : f32 to vector<8x128xf32>
    %1738 = arith.mulf %1736, %1737 : vector<8x128xf32>
    %1739 = vector.broadcast %204 : f32 to vector<8x128xf32>
    %1740 = arith.addf %1738, %1739 : vector<8x128xf32>
    %1741 = vector.broadcast %133 : f32 to vector<8x128xf32>
    %1742 = arith.mulf %1741, %1740 : vector<8x128xf32>
    %1743 = vector.broadcast %137 : f32 to vector<8x128xf32>
    %1744 = arith.mulf %1743, %1680 : vector<8x128xf32>
    %1745 = arith.addf %1742, %1744 : vector<8x128xf32>
    %1746 = vector.broadcast %141 : f32 to vector<8x128xf32>
    %1747 = arith.addf %1745, %1746 : vector<8x128xf32>
    %1748 = arith.negf %1747 : vector<8x128xf32>
    %1749 = math.exp %1748 : vector<8x128xf32>
    %cst_277 = arith.constant 1.000000e+00 : f32
    %1750 = vector.broadcast %cst_277 : f32 to vector<8x128xf32>
    %1751 = arith.addf %1750, %1749 : vector<8x128xf32>
    %1752 = arith.divf %1750, %1751 : vector<8x128xf32>
    %1753 = vector.broadcast %134 : f32 to vector<8x128xf32>
    %1754 = arith.mulf %1753, %1740 : vector<8x128xf32>
    %1755 = vector.broadcast %138 : f32 to vector<8x128xf32>
    %1756 = arith.mulf %1755, %1680 : vector<8x128xf32>
    %1757 = arith.addf %1754, %1756 : vector<8x128xf32>
    %1758 = vector.broadcast %142 : f32 to vector<8x128xf32>
    %1759 = arith.addf %1757, %1758 : vector<8x128xf32>
    %1760 = arith.negf %1759 : vector<8x128xf32>
    %1761 = math.exp %1760 : vector<8x128xf32>
    %cst_278 = arith.constant 1.000000e+00 : f32
    %1762 = vector.broadcast %cst_278 : f32 to vector<8x128xf32>
    %1763 = arith.addf %1762, %1761 : vector<8x128xf32>
    %1764 = arith.divf %1762, %1763 : vector<8x128xf32>
    %1765 = vector.broadcast %135 : f32 to vector<8x128xf32>
    %1766 = arith.mulf %1765, %1740 : vector<8x128xf32>
    %1767 = vector.broadcast %139 : f32 to vector<8x128xf32>
    %1768 = arith.mulf %1767, %1680 : vector<8x128xf32>
    %1769 = arith.addf %1766, %1768 : vector<8x128xf32>
    %1770 = vector.broadcast %143 : f32 to vector<8x128xf32>
    %1771 = arith.addf %1769, %1770 : vector<8x128xf32>
    %1772 = math.tanh %1771 : vector<8x128xf32>
    %1773 = vector.broadcast %136 : f32 to vector<8x128xf32>
    %1774 = arith.mulf %1773, %1740 : vector<8x128xf32>
    %1775 = vector.broadcast %140 : f32 to vector<8x128xf32>
    %1776 = arith.mulf %1775, %1680 : vector<8x128xf32>
    %1777 = arith.addf %1774, %1776 : vector<8x128xf32>
    %1778 = vector.broadcast %144 : f32 to vector<8x128xf32>
    %1779 = arith.addf %1777, %1778 : vector<8x128xf32>
    %1780 = arith.negf %1779 : vector<8x128xf32>
    %1781 = math.exp %1780 : vector<8x128xf32>
    %cst_279 = arith.constant 1.000000e+00 : f32
    %1782 = vector.broadcast %cst_279 : f32 to vector<8x128xf32>
    %1783 = arith.addf %1782, %1781 : vector<8x128xf32>
    %1784 = arith.divf %1782, %1783 : vector<8x128xf32>
    %1785 = arith.mulf %1764, %1678 : vector<8x128xf32>
    %1786 = arith.mulf %1752, %1772 : vector<8x128xf32>
    %1787 = arith.addf %1785, %1786 : vector<8x128xf32>
    %1788 = math.tanh %1787 : vector<8x128xf32>
    %1789 = arith.mulf %1784, %1788 : vector<8x128xf32>
    %1790 = vector.broadcast %145 : f32 to vector<8x128xf32>
    %1791 = arith.mulf %1790, %1789 : vector<8x128xf32>
    %1792 = vector.broadcast %149 : f32 to vector<8x128xf32>
    %1793 = arith.mulf %1792, %1729 : vector<8x128xf32>
    %1794 = arith.addf %1791, %1793 : vector<8x128xf32>
    %1795 = vector.broadcast %153 : f32 to vector<8x128xf32>
    %1796 = arith.addf %1794, %1795 : vector<8x128xf32>
    %1797 = arith.negf %1796 : vector<8x128xf32>
    %1798 = math.exp %1797 : vector<8x128xf32>
    %cst_280 = arith.constant 1.000000e+00 : f32
    %1799 = vector.broadcast %cst_280 : f32 to vector<8x128xf32>
    %1800 = arith.addf %1799, %1798 : vector<8x128xf32>
    %1801 = arith.divf %1799, %1800 : vector<8x128xf32>
    %1802 = vector.broadcast %146 : f32 to vector<8x128xf32>
    %1803 = arith.mulf %1802, %1789 : vector<8x128xf32>
    %1804 = vector.broadcast %150 : f32 to vector<8x128xf32>
    %1805 = arith.mulf %1804, %1729 : vector<8x128xf32>
    %1806 = arith.addf %1803, %1805 : vector<8x128xf32>
    %1807 = vector.broadcast %154 : f32 to vector<8x128xf32>
    %1808 = arith.addf %1806, %1807 : vector<8x128xf32>
    %1809 = arith.negf %1808 : vector<8x128xf32>
    %1810 = math.exp %1809 : vector<8x128xf32>
    %cst_281 = arith.constant 1.000000e+00 : f32
    %1811 = vector.broadcast %cst_281 : f32 to vector<8x128xf32>
    %1812 = arith.addf %1811, %1810 : vector<8x128xf32>
    %1813 = arith.divf %1811, %1812 : vector<8x128xf32>
    %1814 = vector.broadcast %147 : f32 to vector<8x128xf32>
    %1815 = arith.mulf %1814, %1789 : vector<8x128xf32>
    %1816 = vector.broadcast %151 : f32 to vector<8x128xf32>
    %1817 = arith.mulf %1816, %1729 : vector<8x128xf32>
    %1818 = arith.addf %1815, %1817 : vector<8x128xf32>
    %1819 = vector.broadcast %155 : f32 to vector<8x128xf32>
    %1820 = arith.addf %1818, %1819 : vector<8x128xf32>
    %1821 = math.tanh %1820 : vector<8x128xf32>
    %1822 = vector.broadcast %148 : f32 to vector<8x128xf32>
    %1823 = arith.mulf %1822, %1789 : vector<8x128xf32>
    %1824 = vector.broadcast %152 : f32 to vector<8x128xf32>
    %1825 = arith.mulf %1824, %1729 : vector<8x128xf32>
    %1826 = arith.addf %1823, %1825 : vector<8x128xf32>
    %1827 = vector.broadcast %156 : f32 to vector<8x128xf32>
    %1828 = arith.addf %1826, %1827 : vector<8x128xf32>
    %1829 = arith.negf %1828 : vector<8x128xf32>
    %1830 = math.exp %1829 : vector<8x128xf32>
    %cst_282 = arith.constant 1.000000e+00 : f32
    %1831 = vector.broadcast %cst_282 : f32 to vector<8x128xf32>
    %1832 = arith.addf %1831, %1830 : vector<8x128xf32>
    %1833 = arith.divf %1831, %1832 : vector<8x128xf32>
    %1834 = arith.mulf %1813, %1727 : vector<8x128xf32>
    %1835 = arith.mulf %1801, %1821 : vector<8x128xf32>
    %1836 = arith.addf %1834, %1835 : vector<8x128xf32>
    %1837 = math.tanh %1836 : vector<8x128xf32>
    %1838 = arith.mulf %1833, %1837 : vector<8x128xf32>
    %1839 = vector.broadcast %171 : f32 to vector<8x128xf32>
    %1840 = arith.mulf %1839, %1838 : vector<8x128xf32>
    %1841 = arith.addf %1732, %1840 : vector<8x128xf32>
    %c15_283 = arith.constant 15 : index
    %c0_284 = arith.constant 0 : index
    %c0_285 = arith.constant 0 : index
    %1842 = vector.load %arg1[%c15_283, %c0_284, %c0_285] : memref<16x8x128xf32, #tpu.memory_space<vmem>>, vector<1x8x128xf32>
    %1843 = vector.shape_cast %1842 : vector<1x8x128xf32> to vector<8x128xf32>
    %1844 = arith.subf %1843, %48 : vector<8x128xf32>
    %1845 = arith.mulf %1844, %132 : vector<8x128xf32>
    %1846 = vector.broadcast %189 : f32 to vector<8x128xf32>
    %1847 = arith.mulf %1845, %1846 : vector<8x128xf32>
    %1848 = vector.broadcast %205 : f32 to vector<8x128xf32>
    %1849 = arith.addf %1847, %1848 : vector<8x128xf32>
    %1850 = vector.broadcast %133 : f32 to vector<8x128xf32>
    %1851 = arith.mulf %1850, %1849 : vector<8x128xf32>
    %1852 = vector.broadcast %137 : f32 to vector<8x128xf32>
    %1853 = arith.mulf %1852, %1789 : vector<8x128xf32>
    %1854 = arith.addf %1851, %1853 : vector<8x128xf32>
    %1855 = vector.broadcast %141 : f32 to vector<8x128xf32>
    %1856 = arith.addf %1854, %1855 : vector<8x128xf32>
    %1857 = arith.negf %1856 : vector<8x128xf32>
    %1858 = math.exp %1857 : vector<8x128xf32>
    %cst_286 = arith.constant 1.000000e+00 : f32
    %1859 = vector.broadcast %cst_286 : f32 to vector<8x128xf32>
    %1860 = arith.addf %1859, %1858 : vector<8x128xf32>
    %1861 = arith.divf %1859, %1860 : vector<8x128xf32>
    %1862 = vector.broadcast %134 : f32 to vector<8x128xf32>
    %1863 = arith.mulf %1862, %1849 : vector<8x128xf32>
    %1864 = vector.broadcast %138 : f32 to vector<8x128xf32>
    %1865 = arith.mulf %1864, %1789 : vector<8x128xf32>
    %1866 = arith.addf %1863, %1865 : vector<8x128xf32>
    %1867 = vector.broadcast %142 : f32 to vector<8x128xf32>
    %1868 = arith.addf %1866, %1867 : vector<8x128xf32>
    %1869 = arith.negf %1868 : vector<8x128xf32>
    %1870 = math.exp %1869 : vector<8x128xf32>
    %cst_287 = arith.constant 1.000000e+00 : f32
    %1871 = vector.broadcast %cst_287 : f32 to vector<8x128xf32>
    %1872 = arith.addf %1871, %1870 : vector<8x128xf32>
    %1873 = arith.divf %1871, %1872 : vector<8x128xf32>
    %1874 = vector.broadcast %135 : f32 to vector<8x128xf32>
    %1875 = arith.mulf %1874, %1849 : vector<8x128xf32>
    %1876 = vector.broadcast %139 : f32 to vector<8x128xf32>
    %1877 = arith.mulf %1876, %1789 : vector<8x128xf32>
    %1878 = arith.addf %1875, %1877 : vector<8x128xf32>
    %1879 = vector.broadcast %143 : f32 to vector<8x128xf32>
    %1880 = arith.addf %1878, %1879 : vector<8x128xf32>
    %1881 = math.tanh %1880 : vector<8x128xf32>
    %1882 = vector.broadcast %136 : f32 to vector<8x128xf32>
    %1883 = arith.mulf %1882, %1849 : vector<8x128xf32>
    %1884 = vector.broadcast %140 : f32 to vector<8x128xf32>
    %1885 = arith.mulf %1884, %1789 : vector<8x128xf32>
    %1886 = arith.addf %1883, %1885 : vector<8x128xf32>
    %1887 = vector.broadcast %144 : f32 to vector<8x128xf32>
    %1888 = arith.addf %1886, %1887 : vector<8x128xf32>
    %1889 = arith.negf %1888 : vector<8x128xf32>
    %1890 = math.exp %1889 : vector<8x128xf32>
    %cst_288 = arith.constant 1.000000e+00 : f32
    %1891 = vector.broadcast %cst_288 : f32 to vector<8x128xf32>
    %1892 = arith.addf %1891, %1890 : vector<8x128xf32>
    %1893 = arith.divf %1891, %1892 : vector<8x128xf32>
    %1894 = arith.mulf %1873, %1787 : vector<8x128xf32>
    %1895 = arith.mulf %1861, %1881 : vector<8x128xf32>
    %1896 = arith.addf %1894, %1895 : vector<8x128xf32>
    %1897 = math.tanh %1896 : vector<8x128xf32>
    %1898 = arith.mulf %1893, %1897 : vector<8x128xf32>
    %1899 = vector.broadcast %145 : f32 to vector<8x128xf32>
    %1900 = arith.mulf %1899, %1898 : vector<8x128xf32>
    %1901 = vector.broadcast %149 : f32 to vector<8x128xf32>
    %1902 = arith.mulf %1901, %1838 : vector<8x128xf32>
    %1903 = arith.addf %1900, %1902 : vector<8x128xf32>
    %1904 = vector.broadcast %153 : f32 to vector<8x128xf32>
    %1905 = arith.addf %1903, %1904 : vector<8x128xf32>
    %1906 = arith.negf %1905 : vector<8x128xf32>
    %1907 = math.exp %1906 : vector<8x128xf32>
    %cst_289 = arith.constant 1.000000e+00 : f32
    %1908 = vector.broadcast %cst_289 : f32 to vector<8x128xf32>
    %1909 = arith.addf %1908, %1907 : vector<8x128xf32>
    %1910 = arith.divf %1908, %1909 : vector<8x128xf32>
    %1911 = vector.broadcast %146 : f32 to vector<8x128xf32>
    %1912 = arith.mulf %1911, %1898 : vector<8x128xf32>
    %1913 = vector.broadcast %150 : f32 to vector<8x128xf32>
    %1914 = arith.mulf %1913, %1838 : vector<8x128xf32>
    %1915 = arith.addf %1912, %1914 : vector<8x128xf32>
    %1916 = vector.broadcast %154 : f32 to vector<8x128xf32>
    %1917 = arith.addf %1915, %1916 : vector<8x128xf32>
    %1918 = arith.negf %1917 : vector<8x128xf32>
    %1919 = math.exp %1918 : vector<8x128xf32>
    %cst_290 = arith.constant 1.000000e+00 : f32
    %1920 = vector.broadcast %cst_290 : f32 to vector<8x128xf32>
    %1921 = arith.addf %1920, %1919 : vector<8x128xf32>
    %1922 = arith.divf %1920, %1921 : vector<8x128xf32>
    %1923 = vector.broadcast %147 : f32 to vector<8x128xf32>
    %1924 = arith.mulf %1923, %1898 : vector<8x128xf32>
    %1925 = vector.broadcast %151 : f32 to vector<8x128xf32>
    %1926 = arith.mulf %1925, %1838 : vector<8x128xf32>
    %1927 = arith.addf %1924, %1926 : vector<8x128xf32>
    %1928 = vector.broadcast %155 : f32 to vector<8x128xf32>
    %1929 = arith.addf %1927, %1928 : vector<8x128xf32>
    %1930 = math.tanh %1929 : vector<8x128xf32>
    %1931 = vector.broadcast %148 : f32 to vector<8x128xf32>
    %1932 = arith.mulf %1931, %1898 : vector<8x128xf32>
    %1933 = vector.broadcast %152 : f32 to vector<8x128xf32>
    %1934 = arith.mulf %1933, %1838 : vector<8x128xf32>
    %1935 = arith.addf %1932, %1934 : vector<8x128xf32>
    %1936 = vector.broadcast %156 : f32 to vector<8x128xf32>
    %1937 = arith.addf %1935, %1936 : vector<8x128xf32>
    %1938 = arith.negf %1937 : vector<8x128xf32>
    %1939 = math.exp %1938 : vector<8x128xf32>
    %cst_291 = arith.constant 1.000000e+00 : f32
    %1940 = vector.broadcast %cst_291 : f32 to vector<8x128xf32>
    %1941 = arith.addf %1940, %1939 : vector<8x128xf32>
    %1942 = arith.divf %1940, %1941 : vector<8x128xf32>
    %1943 = arith.mulf %1922, %1836 : vector<8x128xf32>
    %1944 = arith.mulf %1910, %1930 : vector<8x128xf32>
    %1945 = arith.addf %1943, %1944 : vector<8x128xf32>
    %1946 = math.tanh %1945 : vector<8x128xf32>
    %1947 = arith.mulf %1942, %1946 : vector<8x128xf32>
    %1948 = vector.broadcast %172 : f32 to vector<8x128xf32>
    %1949 = arith.mulf %1948, %1947 : vector<8x128xf32>
    %1950 = arith.addf %1841, %1949 : vector<8x128xf32>
    %1951 = vector.broadcast %173 : f32 to vector<8x128xf32>
    %1952 = arith.addf %1950, %1951 : vector<8x128xf32>
    %c0_292 = arith.constant 0 : index
    %c0_293 = arith.constant 0 : index
    %1953 = vector.load %arg6[%c0_292, %c0_293] : memref<8x128xf32, #tpu.memory_space<vmem>>, vector<8x128xf32>
    tpu.vector_store %arg6[%c0_292, %c0_293], %1952 {strides = array<i32>} : memref<8x128xf32, #tpu.memory_space<vmem>>, vector<8x128xf32>,
    return
  }
  func.func @transform_0(%arg0: i32) -> (i32, i32, i32) {
    %c0_i32 = arith.constant 0 : i32
    %c0_i32_0 = arith.constant 0 : i32
    %c0_i32_1 = arith.constant 0 : i32
    return %c0_i32, %arg0, %c0_i32_0 : i32, i32, i32
  }
  func.func @transform_1(%arg0: i32) -> i32 {
    %c0_i32 = arith.constant 0 : i32
    %c0_i32_0 = arith.constant 0 : i32
    return %c0_i32 : i32
  }
  func.func @transform_2(%arg0: i32) -> i32 {
    %c0_i32 = arith.constant 0 : i32
    %c0_i32_0 = arith.constant 0 : i32
    return %c0_i32 : i32
  }
  func.func @transform_3(%arg0: i32) -> i32 {
    %c0_i32 = arith.constant 0 : i32
    %c0_i32_0 = arith.constant 0 : i32
    return %c0_i32 : i32
  }
  func.func @transform_4(%arg0: i32) -> i32 {
    %c0_i32 = arith.constant 0 : i32
    %c0_i32_0 = arith.constant 0 : i32
    return %c0_i32 : i32
  }
  func.func @transform_5(%arg0: i32) -> (i32, i32) {
    %c0_i32 = arith.constant 0 : i32
    %c0_i32_0 = arith.constant 0 : i32
    return %arg0, %c0_i32 : i32, i32
  }
}

</mosaic_0001>

<bundles_post_ra>
// kernel: tpu_custom_call.1
= control target key start
LH: loop header
LB: loop body
LE: loop exit
PB: predicated region body
PF: predicated region fallthrough
CT: control target
= control target key end

     0   :  { %10 = vsyncpa [#allocation3], 0  ;;  %s3234_s0 = inlined_call_operand.hbm [shape: f32[16,8,128], index: 0, kind: input, shape index: {}]   ;;  %s3235_s1 = inlined_call_operand.vmem [shape: f32[16], index: 1, kind: input, shape index: {}]   ;;  %s3236_s2 = inlined_call_operand.vmem [shape: f32[16], index: 2, kind: input, shape index: {}]   ;;  %s3237_s3 = inlined_call_operand.vmem [shape: f32[24], index: 3, kind: input, shape index: {}]   ;;  %s3238_s4 = inlined_call_operand.vmem [shape: f32[17], index: 4, kind: input, shape index: {}]   ;;  %s3239_s5 = inlined_call_operand.hbm [shape: f32[8,128], index: 5, kind: output, shape index: {}]  }
   0x1   :  { %11 = vsyncpa [#allocation5], 0 }
   0x2   :  { %12 = vsyncpa [#allocation8], 0 }
   0x3   :  { %13 = vsyncpa [#allocation11], 0  ;;  %s43_s20 = sshll.u32 %s3236_s2, 4  ;;  %s44_s20 = int_to_ptr.vmem [resolvable:$true] %s43_s20 }
   0x4   :  { %14 = vsyncpa [#allocation4], 0  ;;  %s2393_s21 = scalar_lea.vmem %s44_s20, 16  ;;  %p2398_p1 = scmp.lt.s32.totalorder %s44_s20, %s44_s20 }
   0x5   :  { %p2394_p0 = scmp.ne.s32.totalorder %s44_s20, %s2393_s21  ;;  %p2399_p2 = scmp.lt.s32.totalorder %s2393_s21, %s2393_s21 }
   0x7   :  { %p2400_p3 = por %p2399_p2, %p2398_p1 }
   0x9   :  { %p2401_p4 = pnand %p2400_p3, %p2394_p0 }
   0xb   :  { %2404 = shalt.err (!%p2401_p4)
}
   0xc   :  { %s2491_s22 = smov [#allocation7]   ;;  %s2492_s23 = smov [#allocation2]  }
   0xd   :  { %46 = dma.vmem_to_smem %s44_s20, 16, %s2491_s22, [#allocation8]  }
   0xe   :  { %s20_s24 = sshll.u32 %s2492_s23, 4  ;;  %s21_s24 = int_to_ptr.vmem [resolvable:$true] %s20_s24 }
   0xf   :  { %s2413_s25 = scalar_lea.vmem %s21_s24, 2048  ;;  %p2418_p6 = scmp.lt.s32.totalorder %s21_s24, %s21_s24 }
  0x10   :  { %p2414_p5 = scmp.ne.s32.totalorder %s21_s24, %s2413_s25  ;;  %p2419_p7 = scmp.lt.s32.totalorder %s2413_s25, %s2413_s25 }
  0x12   :  { %p2420_p8 = por %p2419_p7, %p2418_p6 }
  0x14   :  { %p2421_p9 = pnand %p2420_p8, %p2414_p5 }
  0x16   :  { %2424 = shalt.err (!%p2421_p9)
}
  0x17   :  { %s2493_s2 = smov 128   ;;  %s2494_s26 = smov 8  }
  0x18   :  { %26 = dma.hbm_to_vmem [thread:$0]  %s3234_s0, 2048, %s21_s24, [#allocation3], %s2493_s2, %s2493_s2, %s2494_s26  }
  0x19   :  { %s33_s6 = sshll.u32 %s3235_s1, 4  ;;  %s53_s9 = sshll.u32 %s3237_s3, 4  ;;  %s34_s6 = int_to_ptr.vmem [resolvable:$true] %s33_s6  ;;  %s54_s9 = int_to_ptr.vmem [resolvable:$true] %s53_s9 }
  0x1a   :  { %s2425_s10 = scalar_lea.vmem %s34_s6, 16  ;;  %p2430_p11 = scmp.lt.s32.totalorder %s34_s6, %s34_s6 }
  0x1b   :  { %p2426_p10 = scmp.ne.s32.totalorder %s34_s6, %s2425_s10  ;;  %p2431_p12 = scmp.lt.s32.totalorder %s2425_s10, %s2425_s10 }
  0x1d   :  { %p2432_p13 = por %p2431_p12, %p2430_p11 }
  0x1f   :  { %p2433_p0 = pnand %p2432_p13, %p2426_p10 }
  0x21   :  { %2436 = shalt.err (!%p2433_p0)
}
  0x22   :  { %s2495_s11 = smov [#allocation6]   ;;  %s2437_s0 = scalar_lea.vmem %s54_s9, 16 }
  0x23   :  { %36 = dma.vmem_to_smem %s34_s6, 16, %s2495_s11, [#allocation5]  }
  0x24   :  { %p2438_p1 = scmp.ne.s32.totalorder %s54_s9, %s2437_s0  ;;  %p2442_p2 = scmp.lt.s32.totalorder %s54_s9, %s54_s9 }
  0x25   :  { %p2443_p3 = scmp.lt.s32.totalorder %s2437_s0, %s2437_s0 }
  0x27   :  { %p2444_p4 = por %p2443_p3, %p2442_p2 }
  0x29   :  { %p2445_p5 = pnand %p2444_p4, %p2438_p1 }
  0x2b   :  { %2448 = shalt.err (!%p2445_p5)
}
  0x2c   :  { %s2496_s1 = smov [#allocation9]   ;;  %s63_s13 = sshll.u32 %s3238_s4, 4  ;;  %s64_s13 = int_to_ptr.vmem [resolvable:$true] %s63_s13 }
  0x2d   :  { %56 = dma.vmem_to_smem %s54_s9, 16, %s2496_s1, [#allocation8]  }
  0x2e   :  { %s2449_s14 = scalar_lea.vmem %s64_s13, 16  ;;  %p2454_p7 = scmp.lt.s32.totalorder %s64_s13, %s64_s13 }
  0x2f   :  { %p2450_p6 = scmp.ne.s32.totalorder %s64_s13, %s2449_s14  ;;  %p2455_p8 = scmp.lt.s32.totalorder %s2449_s14, %s2449_s14 }
  0x31   :  { %p2456_p9 = por %p2455_p8, %p2454_p7 }
  0x33   :  { %p2457_p10 = pnand %p2456_p9, %p2450_p6 }
  0x35   :  { %2460 = shalt.err (!%p2457_p10)
}
  0x36   :  { %s2497_s15 = smov [#allocation10]  }
  0x37   :  { %66 = dma.vmem_to_smem %s64_s13, 16, %s2497_s15, [#allocation11]  }
  0x38   :  { %2481 = dma.done.wait [#allocation3], 2048  }
  0x39   :  { %2482 = vsyncadd [#allocation3], 4294965248 }
  0x3a   :  { %2483 = dma.done.wait [#allocation5], 16  }
  0x3b   :  { %2484 = vsyncadd [#allocation5], 4294967280 }
  0x3c   :  { %2485 = dma.done.wait [#allocation8], 32  }
  0x3d   :  { %2486 = vsyncadd [#allocation8], 4294967264 }
  0x3e   :  { %2487 = dma.done.wait [#allocation11], 16  }
  0x3f   :  { %2488 = vsyncadd [#allocation11], 4294967280 }
  0x40   :  { %82 = sfence }
  0x41   :  { %v83_v0 = vld [vmem:[#allocation2] sm:$0xff]  ;;  %v85_v1 = vld [vmem:[#allocation2 + $0x8] sm:$0xff]  ;;  %v88_v2 = vld [vmem:[#allocation2 + $0x10] sm:$0xff]  ;;  %s1709_s4 = sld [smem:[#allocation9 + $0x4]] }
  0x42   :  { %v86_v3 = vadd.f32 %v85_v1, %v83_v0  ;;  %v91_v4 = vld [vmem:[#allocation2 + $0x18] sm:$0xff]  ;;  %v94_v6 = vld [vmem:[#allocation2 + $0x20] sm:$0xff]  ;;  %v97_v8 = vld [vmem:[#allocation2 + $0x28] sm:$0xff]  ;;  %s221_s16 = sld [smem:[#allocation6]] }
  0x43   :  { %v100_v10 = vld [vmem:[#allocation2 + $0x30] sm:$0xff]  ;;  %v103_v12 = vld [vmem:[#allocation2 + $0x38] sm:$0xff]  ;;  %v106_v14 = vld [vmem:[#allocation2 + $0x40] sm:$0xff]  ;;  %s1710_s17 = sld [smem:[#allocation9 + $0x5]] }
  0x44   :  { %v89_v5 = vadd.f32 %v88_v2, %v86_v3  ;;  %v109_v16 = vld [vmem:[#allocation2 + $0x48] sm:$0xff]  ;;  %v112_v18 = vld [vmem:[#allocation2 + $0x50] sm:$0xff]  ;;  %v115_v20 = vld [vmem:[#allocation2 + $0x58] sm:$0xff]  ;;  %s237_s18 = sld [smem:[#allocation7]] }
  0x45   :  { %v118_v22 = vld [vmem:[#allocation2 + $0x60] sm:$0xff]  ;;  %v121_v24 = vld [vmem:[#allocation2 + $0x68] sm:$0xff]  ;;  %v124_v26 = vld [vmem:[#allocation2 + $0x70] sm:$0xff]  ;;  %s180_s19 = sld [smem:[#allocation9]] }
  0x46   :  { %v92_v7 = vadd.f32 %v91_v4, %v89_v5  ;;  %v127_v28 = vld [vmem:[#allocation2 + $0x78] sm:$0xff]  ;;  %s1706_s20 = sld [smem:[#allocation9 + $0x1]] }
  0x47   :  { %s1708_s21 = sld [smem:[#allocation9 + $0x3]] }
  0x48   :  { %v95_v9 = vadd.f32 %v94_v6, %v92_v7  ;;  %s1713_s22 = sld [smem:[#allocation9 + $0x8]] }
  0x49   :  { %s1714_s23 = sld [smem:[#allocation9 + $0x9]] }
  0x4a   :  { %v98_v11 = vadd.f32 %v97_v8, %v95_v9  ;;  %s1712_s24 = sld [smem:[#allocation9 + $0x7]] }
  0x4b   :  { %s1707_s25 = sld [smem:[#allocation9 + $0x2]] }
  0x4c   :  { %v101_v13 = vadd.f32 %v100_v10, %v98_v11  ;;  %s1711_s2 = sld [smem:[#allocation9 + $0x6]] }
  0x4d   :  { %s1716_s26 = sld [smem:[#allocation9 + $0xb]] }
  0x4e   :  { %v104_v15 = vadd.f32 %v103_v12, %v101_v13  ;;  %s1715_s27 = sld [smem:[#allocation9 + $0xa]] }
  0x4f   :  { %s1745_s28 = sld [smem:[#allocation6 + $0x1]] }
  0x50   :  { %v107_v17 = vadd.f32 %v106_v14, %v104_v15  ;;  %s1760_s29 = sld [smem:[#allocation7 + $0x1]] }
  0x51   :  { %s1721_s30 = sld [smem:[#allocation9 + $0x10]] }
  0x52   :  { %v110_v19 = vadd.f32 %v109_v16, %v107_v17  ;;  %s1722_s6 = sld [smem:[#allocation9 + $0x11]] }
  0x53   :  { %s1717_s7 = sld [smem:[#allocation9 + $0xc]] }
  0x54   :  { %v113_v21 = vadd.f32 %v112_v18, %v110_v19  ;;  %s1718_s8 = sld [smem:[#allocation9 + $0xd]] }
  0x55   :  { %s1720_s9 = sld [smem:[#allocation9 + $0xf]] }
  0x56   :  { %v116_v23 = vadd.f32 %v115_v20, %v113_v21  ;;  %v2607_v21 = vstv %s1709_s4  ;;  %s1725_s10 = sld [smem:[#allocation9 + $0x14]] }
  0x57   :  { %s1726_s11 = sld [smem:[#allocation9 + $0x15]] }
  0x58   :  { %v119_v25 = vadd.f32 %v118_v22, %v116_v23  ;;  %s1724_s0 = sld [smem:[#allocation9 + $0x13]] }
  0x59   :  { %s1719_s1 = sld [smem:[#allocation9 + $0xe]] }
  0x5a   :  { %v122_v27 = vadd.f32 %v121_v24, %v119_v25  ;;  %v2613_v25 = vstv %s1706_s20  ;;  %s1723_s3 = sld [smem:[#allocation9 + $0x12]] }
  0x5b   :  { %s1728_s12 = sld [smem:[#allocation9 + $0x17]] }
  0x5c   :  { %v125_v29 = vadd.f32 %v124_v26, %v122_v27  ;;  %v261_v27 = vmul.f32 0.0, %v2607_v21  ;;  %s1727_s13 = sld [smem:[#allocation9 + $0x16]] }
  0x5d   :  { %s1746_s14 = sld [smem:[#allocation6 + $0x2]] }
  0x5e   :  { %v128_v30 = vadd.f32 %v127_v28, %v125_v29  ;;  %s1761_s15 = sld [smem:[#allocation7 + $0x2]] }
  0x5f   :  { %s1747_s4 = sld [smem:[#allocation6 + $0x3]] }
  0x60   :  { %v129_v31 = vmul.f32 0.0625, %v128_v30  ;;  %s1763_s20 = sld [smem:[#allocation7 + $0x4]] }
  0x62   :  { %v130_v32 = vsub.f32 %v83_v0, %v129_v31  ;;  %v2544_v33 = vsub.f32 %v85_v1, %v129_v31  ;;  %v2546_v34 = vsub.f32 %v88_v2, %v129_v31  ;;  %v2548_v35 = vsub.f32 %v91_v4, %v129_v31 }
  0x63   :  { %v2554_v39 = vsub.f32 %v94_v6, %v129_v31  ;;  %v2558_v42 = vsub.f32 %v97_v8, %v129_v31  ;;  %v2562_v45 = vsub.f32 %v100_v10, %v129_v31  ;;  %v2566_v48 = vsub.f32 %v103_v12, %v129_v31 }
  0x64   :  { %v131_v36 = vmul.f32 %v130_v32, %v130_v32  ;;  %v133_v37 = vmul.f32 %v2544_v33, %v2544_v33  ;;  %v136_v38 = vmul.f32 %v2546_v34, %v2546_v34  ;;  %v139_v41 = vmul.f32 %v2548_v35, %v2548_v35 }
  0x65   :  { %v142_v44 = vmul.f32 %v2554_v39, %v2554_v39  ;;  %v145_v47 = vmul.f32 %v2558_v42, %v2558_v42  ;;  %v148_v50 = vmul.f32 %v2562_v45, %v2562_v45  ;;  %v2570_v51 = vsub.f32 %v106_v14, %v129_v31 }
  0x66   :  { %v134_v40 = vadd.f32 %v133_v37, %v131_v36  ;;  %v151_v53 = vmul.f32 %v2566_v48, %v2566_v48  ;;  %v2574_v54 = vsub.f32 %v109_v16, %v129_v31  ;;  %v2578_v57 = vsub.f32 %v112_v18, %v129_v31 }
  0x67   :  { %v154_v56 = vmul.f32 %v2570_v51, %v2570_v51  ;;  %v2582_v60 = vsub.f32 %v115_v20, %v129_v31  ;;  %v2586_v63 = vsub.f32 %v118_v22, %v129_v31  ;;  %v2590_v2 = vsub.f32 %v121_v24, %v129_v31 }
  0x68   :  { %v137_v43 = vadd.f32 %v136_v38, %v134_v40  ;;  %v157_v59 = vmul.f32 %v2574_v54, %v2574_v54  ;;  %v160_v62 = vmul.f32 %v2578_v57, %v2578_v57  ;;  %v2594_v5 = vsub.f32 %v124_v26, %v129_v31 }
  0x69   :  { %3244 = vst [vmem:[#allocation18_spill] sm:$0xff] %v2586_v63  ;;  %v163_v1 = vmul.f32 %v2582_v60, %v2582_v60  ;;  %3245 = vst [vmem:[#allocation19_spill] sm:$0xff] %v2590_v2  ;;  %v166_v4 = vmul.f32 %v2586_v63, %v2586_v63  ;;  %v169_v7 = vmul.f32 %v2590_v2, %v2590_v2  ;;  %v254_v18 = vstv %s221_s16  ;;  %s204_s16 = sld [smem:[#allocation10]] }
  0x6a   :  { %v140_v46 = vadd.f32 %v139_v41, %v137_v43  ;;  %3246 = vst [vmem:[#allocation20_spill] sm:$0xff] %v2594_v5  ;;  %v2598_v8 = vsub.f32 %v127_v28, %v129_v31  ;;  %v172_v10 = vmul.f32 %v2594_v5, %v2594_v5  ;;  %v256_v20 = vstv %s237_s18  ;;  %s1729_s18 = sld [smem:[#allocation10 + $0x1]] }
  0x6b   :  { %v2609_v22 = vstv %s1710_s17  ;;  %v2611_v24 = vstv %s180_s19  ;;  %v2619_v31 = vstv %s1713_s22  ;;  %v2623_v38 = vstv %s1708_s21  ;;  %s1762_s17 = sld [smem:[#allocation7 + $0x3]] }
  0x6c   :  { %v143_v49 = vadd.f32 %v142_v44, %v140_v46  ;;  %3247 = vst [vmem:[#allocation21_spill] sm:$0xff] %v2598_v8  ;;  %v175_v12 = vmul.f32 %v2598_v8, %v2598_v8  ;;  %v274_v28 = vmul.f32 0.0, %v2609_v22  ;;  %v2625_v40 = vstv %s1712_s24  ;;  %s1748_s19 = sld [smem:[#allocation6 + $0x4]] }
  0x6d   :  { %v295_v46 = vmul.f32 0.0, %v2625_v40  ;;  %s1730_s21 = sld [smem:[#allocation10 + $0x2]] }
  0x6e   :  { %v146_v52 = vadd.f32 %v145_v47, %v143_v49  ;;  %s1749_s22 = sld [smem:[#allocation6 + $0x5]] }
  0x6f   :  { %s1731_s24 = sld [smem:[#allocation10 + $0x3]] }
  0x70   :  { %v149_v55 = vadd.f32 %v148_v50, %v146_v52  ;;  %v2631_v50 = vstv %s1707_s25  ;;  %v2633_v52 = vstv %s1711_s2  ;;  %s1750_s25 = sld [smem:[#allocation6 + $0x6]] }
  0x71   :  { %s1765_s2 = sld [smem:[#allocation7 + $0x6]] }
  0x72   :  { %v152_v58 = vadd.f32 %v151_v53, %v149_v55 }
  0x74   :  { %v155_v61 = vadd.f32 %v154_v56, %v152_v58  ;;  %v287_v56 = vmul.f32 0.0, %v2633_v52  ;;  %v2637_v58 = vstv %s1716_s26  ;;  %s1732_s26 = sld [smem:[#allocation10 + $0x4]] }
  0x76   :  { %v158_v0 = vadd.f32 %v157_v59, %v155_v61 }
  0x78   :  { %v161_v3 = vadd.f32 %v160_v62, %v158_v0  ;;  %v2640_v62 = vstv %s1715_s27  ;;  %s1751_s27 = sld [smem:[#allocation6 + $0x7]] }
  0x7a   :  { %v164_v6 = vadd.f32 %v163_v1, %v161_v3 }
  0x7c   :  { %v167_v9 = vadd.f32 %v166_v4, %v164_v6 }
  0x7e   :  { %v170_v11 = vadd.f32 %v169_v7, %v167_v9 }
  0x80   :  { %v173_v13 = vadd.f32 %v172_v10, %v170_v11 }
  0x82   :  { %v176_v14 = vadd.f32 %v175_v12, %v173_v13 }
  0x84   :  { %v177_v15 = vmul.f32 0.0625, %v176_v14 }
  0x86   :  { %v178_v16 = vadd.f32 1e-05, %v177_v15 }
  0x88   :  { %1879 = vrsqrt.f32 %v178_v16 }
  0x95   :  { %v2604_v17 = vpop.eup %1879 }
  0x96   :  { %v253_v19 = vmul.f32 %v2604_v17, %v130_v32  ;;  %v2621_v32 = vstv %s1714_s23  ;;  %s1764_s23 = sld [smem:[#allocation7 + $0x5]] }
  0x98   :  { %v255_v23 = vmul.f32 %v254_v18, %v253_v19  ;;  %v365_v18 = vmul.f32 %v2604_v17, %v2544_v33  ;;  %v366_v19 = vstv %s1745_s28  ;;  %v2654_v33 = vstv %s1718_s8  ;;  %s1766_s28 = sld [smem:[#allocation7 + $0x7]] }
  0x99   :  { %s1753_s8 = sld [smem:[#allocation6 + $0x9]] }
  0x9a   :  { %v257_v26 = vadd.f32 %v256_v20, %v255_v23  ;;  %v367_v20 = vmul.f32 %v366_v19, %v365_v18  ;;  %v368_v23 = vstv %s1760_s29  ;;  %s1733_s29 = sld [smem:[#allocation10 + $0x5]] }
  0x9c   :  { %v259_v29 = vmul.f32 %v2611_v24, %v257_v26  ;;  %v272_v30 = vmul.f32 %v2613_v25, %v257_v26  ;;  %v293_v44 = vmul.f32 %v2623_v38, %v257_v26  ;;  %v285_v55 = vmul.f32 %v2631_v50, %v257_v26 }
  0x9e   :  { %v262_v36 = vadd.f32 %v261_v27, %v259_v29  ;;  %v275_v37 = vadd.f32 %v274_v28, %v272_v30  ;;  %v296_v53 = vadd.f32 %v295_v46, %v293_v44  ;;  %v288_v61 = vadd.f32 %v287_v56, %v285_v55 }
  0x9f   :  { %v2648_v27 = vstv %s1721_s30  ;;  %v2650_v28 = vstv %s1722_s6  ;;  %v369_v29 = vadd.f32 %v368_v23, %v367_v20  ;;  %v2664_v55 = vstv %s1726_s11  ;;  %s1752_s30 = sld [smem:[#allocation6 + $0x8]] }
  0xa0   :  { %v264_v41 = vadd.f32 %v2619_v31, %v262_v36  ;;  %v277_v43 = vadd.f32 %v2621_v32, %v275_v37  ;;  %v298_v59 = vadd.f32 %v2637_v58, %v296_v53  ;;  %v290_v1 = vadd.f32 %v2640_v62, %v288_v61  ;;  %s1767_s6 = sld [smem:[#allocation7 + $0x8]] }
  0xa1   :  { %v2652_v36 = vstv %s1717_s7  ;;  %v370_v44 = vmul.f32 %v369_v29, %v2611_v24  ;;  %v380_v46 = vmul.f32 %v369_v29, %v2613_v25  ;;  %v2662_v53 = vstv %s1725_s10  ;;  %s1734_s7 = sld [smem:[#allocation10 + $0x6]] }
  0xa2   :  { %v1775_v47 = vmul.f32 -1.442695, %v264_v41  ;;  %v1776_v49 = vmul.f32 -1.442695, %v277_v43  ;;  %v1777_v0 = vmul.f32 -1.442695, %v298_v59  ;;  %v395_v23 = vmul.f32 %v369_v29, %v2623_v38 }
  0xa3   :  { %v313_v41 = vmul.f32 0.0, %v2648_v27  ;;  %v326_v43 = vmul.f32 0.0, %v2650_v28  ;;  %s1735_s10 = sld [smem:[#allocation10 + $0x7]] }
  0xa4   :  { %1881 = vpow2.f32 %v1775_v47  ;;  %s1754_s11 = sld [smem:[#allocation6 + $0xa]] }
  0xa5   :  { %1883 = vpow2.f32 %v1776_v49 }
  0xa6   :  { %1885 = vpow2.f32 %v1777_v0 }
  0xa7   :  { %1887 = vtanh.f32 %v290_v1  ;;  %v2668_v1 = vstv %s1720_s9  ;;  %s1768_s9 = sld [smem:[#allocation7 + $0x9]] }
  0xb1   :  { %v1882_v3 = vpop.eup %1881 }
  0xb2   :  { %v1884_v4 = vpop.eup %1883  ;;  %v268_v6 = vadd.f32 1.0, %v1882_v3  ;;  %v2670_v3 = vstv %s1724_s0  ;;  %s1769_s0 = sld [smem:[#allocation7 + $0xa]] }
  0xb3   :  { %v281_v7 = vadd.f32 1.0, %v1884_v4  ;;  %v1886_v9 = vpop.eup %1885 }
  0xb4   :  { %1889 = vrcp.f32 %v268_v6  ;;  %v1888_v10 = vpop.eup %1887  ;;  %v302_v12 = vadd.f32 1.0, %v1886_v9 }
  0xb5   :  { %1891 = vrcp.f32 %v281_v7 }
  0xb6   :  { %1893 = vrcp.f32 %v302_v12 }
  0xc1   :  { %v1890_v11 = vpop.eup %1889 }
  0xc2   :  { %v1892_v13 = vpop.eup %1891  ;;  %v306_v14 = vmul.f32 %v1890_v11, %v1888_v10  ;;  %v2674_v10 = vstv %s1719_s1  ;;  %v2676_v11 = vstv %s1723_s3  ;;  %s1736_s1 = sld [smem:[#allocation10 + $0x8]] }
  0xc3   :  { %v305_v15 = vmul.f32 0.0, %v1892_v13  ;;  %v1894_v26 = vpop.eup %1893  ;;  %v347_v13 = vmul.f32 0.0, %v2670_v3  ;;  %s1755_s3 = sld [smem:[#allocation6 + $0xb]] }
  0xc5   :  { %v2643_v16 = vadd.f32 %v306_v14, %v305_v15 }
  0xc7   :  { %1895 = vtanh.f32 %v2643_v16 }
  0xd4   :  { %v1896_v30 = vpop.eup %1895 }
  0xd5   :  { %v309_v37 = vmul.f32 %v1896_v30, %v1894_v26 }
  0xd7   :  { %v311_v47 = vmul.f32 %v2652_v36, %v309_v37  ;;  %v324_v49 = vmul.f32 %v2654_v33, %v309_v37  ;;  %v371_v56 = vmul.f32 %v309_v37, %v2607_v21  ;;  %v381_v59 = vmul.f32 %v309_v37, %v2609_v22 }
  0xd8   :  { %v345_v12 = vmul.f32 %v2668_v1, %v309_v37  ;;  %v396_v26 = vmul.f32 %v309_v37, %v2625_v40  ;;  %v337_v30 = vmul.f32 %v2674_v10, %v309_v37 }
  0xd9   :  { %v314_v61 = vadd.f32 %v313_v41, %v311_v47  ;;  %v327_v0 = vadd.f32 %v326_v43, %v324_v49  ;;  %v372_v4 = vadd.f32 %v371_v56, %v370_v44  ;;  %v382_v6 = vadd.f32 %v381_v59, %v380_v46 }
  0xda   :  { %v339_v41 = vmul.f32 0.0, %v2676_v11  ;;  %v348_v44 = vadd.f32 %v347_v13, %v345_v12  ;;  %v2686_v46 = vstv %s1728_s12  ;;  %v390_v47 = vmul.f32 %v369_v29, %v2631_v50  ;;  %s1770_s12 = sld [smem:[#allocation7 + $0xb]] }
  0xdb   :  { %v316_v7 = vadd.f32 %v2662_v53, %v314_v61  ;;  %v329_v9 = vadd.f32 %v2664_v55, %v327_v0  ;;  %v373_v14 = vadd.f32 %v372_v4, %v2619_v31  ;;  %v383_v15 = vadd.f32 %v382_v6, %v2621_v32 }
  0xdc   :  { %v391_v49 = vmul.f32 %v309_v37, %v2633_v52  ;;  %v397_v56 = vadd.f32 %v396_v26, %v395_v23  ;;  %v340_v59 = vadd.f32 %v339_v41, %v337_v30  ;;  %v2690_v61 = vstv %s1727_s13  ;;  %s1737_s13 = sld [smem:[#allocation10 + $0x9]] }
  0xdd   :  { %v1778_v18 = vmul.f32 -1.442695, %v316_v7  ;;  %v1779_v19 = vmul.f32 -1.442695, %v329_v9  ;;  %v1781_v20 = vmul.f32 -1.442695, %v373_v14  ;;  %v350_v0 = vadd.f32 %v2686_v46, %v348_v44 }
  0xde   :  { %v1782_v43 = vmul.f32 -1.442695, %v383_v15  ;;  %v392_v4 = vadd.f32 %v391_v49, %v390_v47  ;;  %v398_v6 = vadd.f32 %v397_v56, %v2637_v58  ;;  %v342_v7 = vadd.f32 %v2690_v61, %v340_v59 }
  0xdf   :  { %1897 = vpow2.f32 %v1778_v18  ;;  %v1780_v9 = vmul.f32 -1.442695, %v350_v0 }
  0xe0   :  { %1899 = vpow2.f32 %v1779_v19  ;;  %v393_v12 = vadd.f32 %v392_v4, %v2640_v62  ;;  %v1783_v13 = vmul.f32 -1.442695, %v398_v6 }
  0xe1   :  { %1901 = vpow2.f32 %v1781_v20 }
  0xe2   :  { %1903 = vpow2.f32 %v1782_v43 }
  0xe3   :  { %1905 = vtanh.f32 %v342_v7 }
  0xe4   :  { %1907 = vpow2.f32 %v1780_v9 }
  0xe5   :  { %1909 = vtanh.f32 %v393_v12 }
  0xe6   :  { %1911 = vpow2.f32 %v1783_v13 }
  0xec   :  { %v1898_v29 = vpop.eup %1897 }
  0xed   :  { %v1900_v37 = vpop.eup %1899  ;;  %v320_v14 = vadd.f32 1.0, %v1898_v29  ;;  %v453_v29 = vmul.f32 %v2604_v17, %v2546_v34 }
  0xee   :  { %v333_v15 = vadd.f32 1.0, %v1900_v37  ;;  %v1902_v18 = vpop.eup %1901  ;;  %v454_v37 = vstv %s1746_s14  ;;  %s1756_s14 = sld [smem:[#allocation6 + $0xc]] }
  0xef   :  { %1913 = vrcp.f32 %v320_v14  ;;  %v1904_v19 = vpop.eup %1903  ;;  %v377_v20 = vadd.f32 1.0, %v1902_v18  ;;  %v455_v14 = vmul.f32 %v454_v37, %v453_v29  ;;  %v456_v18 = vstv %s1761_s15  ;;  %s1771_s15 = sld [smem:[#allocation7 + $0xc]] }
  0xf0   :  { %1915 = vrcp.f32 %v333_v15  ;;  %v387_v23 = vadd.f32 1.0, %v1904_v19  ;;  %v1906_v26 = vpop.eup %1905 }
  0xf1   :  { %1917 = vrcp.f32 %v377_v20  ;;  %v1908_v30 = vpop.eup %1907 }
  0xf2   :  { %1919 = vrcp.f32 %v387_v23  ;;  %v1910_v41 = vpop.eup %1909  ;;  %v354_v47 = vadd.f32 1.0, %v1908_v30 }
  0xf3   :  { %v1912_v43 = vpop.eup %1911 }
  0xf4   :  { %v402_v4 = vadd.f32 1.0, %v1912_v43  ;;  %1921 = vrcp.f32 %v354_v47 }
  0xfc   :  { %v1914_v44 = vpop.eup %1913 }
  0xfd   :  { %v1916_v49 = vpop.eup %1915  ;;  %v358_v56 = vmul.f32 %v1914_v44, %v1906_v26 }
  0xfe   :  { %v357_v59 = vmul.f32 0.0, %v1916_v49  ;;  %v1918_v0 = vpop.eup %1917 }
  0xff   :  { %v1920_v6 = vpop.eup %1919  ;;  %v406_v9 = vmul.f32 %v1918_v0, %v1910_v41 }
 0x100   :  { %v2696_v7 = vadd.f32 %v358_v56, %v357_v59  ;;  %v405_v12 = vmul.f32 %v1920_v6, %v2643_v16  ;;  %v457_v16 = vadd.f32 %v456_v18, %v455_v14 }
 0x101   :  { %v1922_v15 = vpop.eup %1921 }
 0x102   :  { %1923 = vtanh.f32 %v2696_v7  ;;  %v2700_v13 = vadd.f32 %v406_v9, %v405_v12  ;;  %v458_v44 = vmul.f32 %v457_v16, %v2611_v24  ;;  %v468_v34 = vmul.f32 %v457_v16, %v2613_v25 }
 0x103   :  { %1925 = vrcp.f32 %v402_v4  ;;  %v478_v47 = vmul.f32 %v457_v16, %v2631_v50  ;;  %v483_v49 = vmul.f32 %v457_v16, %v2623_v38 }
 0x104   :  { %1927 = vtanh.f32 %v2700_v13 }
 0x10f   :  { %v1924_v19 = vpop.eup %1923 }
 0x110   :  { %v1926_v20 = vpop.eup %1925  ;;  %v2705_v23 = vmul.f32 %v1924_v19, %v1922_v15 }
 0x111   :  { %v1928_v26 = vpop.eup %1927 }
 0x112   :  { %v409_v30 = vmul.f32 %v1928_v26, %v1926_v20  ;;  %v411_v41 = vmul.f32 %v2705_v23, %v2648_v27  ;;  %v421_v43 = vmul.f32 %v2705_v23, %v2650_v28  ;;  %v436_v26 = vmul.f32 %v2705_v23, %v2670_v3 }
 0x114   :  { %v410_v56 = vmul.f32 %v409_v30, %v2652_v36  ;;  %v420_v59 = vmul.f32 %v409_v30, %v2654_v33  ;;  %v459_v0 = vmul.f32 %v409_v30, %v2607_v21  ;;  %v469_v4 = vmul.f32 %v409_v30, %v2609_v22 }
 0x115   :  { %v479_v6 = vmul.f32 %v409_v30, %v2633_v52  ;;  %v484_v9 = vmul.f32 %v409_v30, %v2625_v40  ;;  %v435_v16 = vmul.f32 %v409_v30, %v2668_v1 }
 0x116   :  { %v412_v12 = vadd.f32 %v411_v41, %v410_v56  ;;  %v422_v29 = vadd.f32 %v421_v43, %v420_v59  ;;  %v460_v37 = vadd.f32 %v459_v0, %v458_v44  ;;  %v470_v14 = vadd.f32 %v469_v4, %v468_v34 }
 0x117   :  { %v480_v15 = vadd.f32 %v479_v6, %v478_v47  ;;  %v485_v18 = vadd.f32 %v484_v9, %v483_v49  ;;  %v430_v44 = vmul.f32 %v409_v30, %v2674_v10  ;;  %v431_v34 = vmul.f32 %v2705_v23, %v2676_v11 }
 0x118   :  { %v413_v19 = vadd.f32 %v412_v12, %v2662_v53  ;;  %v423_v20 = vadd.f32 %v422_v29, %v2664_v55  ;;  %v461_v8 = vadd.f32 %v460_v37, %v2619_v31  ;;  %v471_v5 = vadd.f32 %v470_v14, %v2621_v32 }
 0x119   :  { %v437_v49 = vadd.f32 %v436_v26, %v435_v16  ;;  %v432_v56 = vadd.f32 %v431_v34, %v430_v44  ;;  %v486_v0 = vadd.f32 %v485_v18, %v2637_v58 }
 0x11a   :  { %v1784_v2 = vmul.f32 -1.442695, %v413_v19  ;;  %v1785_v41 = vmul.f32 -1.442695, %v423_v20  ;;  %v1787_v43 = vmul.f32 -1.442695, %v461_v8 }
 0x11b   :  { %v1788_v47 = vmul.f32 -1.442695, %v471_v5  ;;  %v438_v59 = vadd.f32 %v437_v49, %v2686_v46  ;;  %v433_v4 = vadd.f32 %v432_v56, %v2690_v61  ;;  %v1789_v8 = vmul.f32 -1.442695, %v486_v0 }
 0x11c   :  { %1929 = vpow2.f32 %v1784_v2  ;;  %v481_v2 = vadd.f32 %v480_v15, %v2640_v62 }
 0x11d   :  { %1931 = vpow2.f32 %v1785_v41  ;;  %v1786_v6 = vmul.f32 -1.442695, %v438_v59 }
 0x11e   :  { %1933 = vpow2.f32 %v1787_v43 }
 0x11f   :  { %1935 = vpow2.f32 %v1788_v47 }
 0x120   :  { %1937 = vtanh.f32 %v433_v4 }
 0x121   :  { %1939 = vpow2.f32 %v1786_v6 }
 0x122   :  { %1941 = vtanh.f32 %v481_v2  ;;  %v542_v2 = vstv %s1747_s4  ;;  %s1738_s4 = sld [smem:[#allocation10 + $0xa]] }
 0x123   :  { %1943 = vpow2.f32 %v1789_v8 }
 0x129   :  { %v1930_v30 = vpop.eup %1929 }
 0x12a   :  { %v1932_v9 = vpop.eup %1931  ;;  %v417_v5 = vadd.f32 1.0, %v1930_v30 }
 0x12b   :  { %v427_v12 = vadd.f32 1.0, %v1932_v9  ;;  %v1934_v29 = vpop.eup %1933  ;;  %v362_v9 = vstv %s204_s16  ;;  %s1757_s16 = sld [smem:[#allocation6 + $0xd]] }
 0x12c   :  { %1945 = vrcp.f32 %v417_v5  ;;  %v1936_v37 = vpop.eup %1935  ;;  %v465_v14 = vadd.f32 1.0, %v1934_v29  ;;  %v544_v5 = vstv %s1762_s17  ;;  %s1772_s17 = sld [smem:[#allocation7 + $0xd]] }
 0x12d   :  { %1947 = vrcp.f32 %v427_v12  ;;  %v475_v18 = vadd.f32 1.0, %v1936_v37  ;;  %v1938_v19 = vpop.eup %1937  ;;  %v363_v37 = vmul.f32 %v362_v9, %v2705_v23 }
 0x12e   :  { %1949 = vrcp.f32 %v465_v14  ;;  %v1940_v20 = vpop.eup %1939 }
 0x12f   :  { %1951 = vrcp.f32 %v475_v18  ;;  %v1942_v15 = vpop.eup %1941  ;;  %v442_v41 = vadd.f32 1.0, %v1940_v20 }
 0x130   :  { %v1944_v16 = vpop.eup %1943 }
 0x131   :  { %v490_v49 = vadd.f32 1.0, %v1944_v16  ;;  %1953 = vrcp.f32 %v442_v41 }
 0x139   :  { %v1946_v26 = vpop.eup %1945 }
 0x13a   :  { %v1948_v43 = vpop.eup %1947  ;;  %v446_v44 = vmul.f32 %v1946_v26, %v1938_v19 }
 0x13b   :  { %v445_v34 = vmul.f32 %v1948_v43, %v2696_v7  ;;  %v1950_v47 = vpop.eup %1949  ;;  %v541_v7 = vmul.f32 %v2604_v17, %v2548_v35 }
 0x13c   :  { %v1952_v56 = vpop.eup %1951  ;;  %v494_v0 = vmul.f32 %v1950_v47, %v1942_v15 }
 0x13d   :  { %v2736_v59 = vadd.f32 %v446_v44, %v445_v34  ;;  %v493_v4 = vmul.f32 %v1952_v56, %v2700_v13  ;;  %v543_v8 = vmul.f32 %v542_v2, %v541_v7  ;;  %v450_v13 = vstv %s1729_s18  ;;  %s1739_s18 = sld [smem:[#allocation10 + $0xb]] }
 0x13e   :  { %v1954_v30 = vpop.eup %1953 }
 0x13f   :  { %1955 = vtanh.f32 %v2736_v59  ;;  %v2740_v6 = vadd.f32 %v494_v0, %v493_v4  ;;  %v545_v18 = vadd.f32 %v544_v5, %v543_v8 }
 0x140   :  { %1957 = vrcp.f32 %v490_v49 }
 0x141   :  { %1959 = vtanh.f32 %v2740_v6  ;;  %v546_v44 = vmul.f32 %v545_v18, %v2611_v24  ;;  %v556_v34 = vmul.f32 %v545_v18, %v2613_v25  ;;  %v571_v63 = vmul.f32 %v545_v18, %v2623_v38 }
 0x14c   :  { %v1956_v12 = vpop.eup %1955 }
 0x14d   :  { %v1958_v29 = vpop.eup %1957  ;;  %v449_v14 = vmul.f32 %v1956_v12, %v1954_v30 }
 0x14e   :  { %v1960_v19 = vpop.eup %1959 }
 0x14f   :  { %v451_v20 = vmul.f32 %v450_v13, %v449_v14  ;;  %v499_v15 = vmul.f32 %v449_v14, %v2648_v27  ;;  %v497_v16 = vmul.f32 %v1960_v19, %v1958_v29  ;;  %v509_v26 = vmul.f32 %v449_v14, %v2650_v28 }
 0x150   :  { %v519_v35 = vmul.f32 %v449_v14, %v2676_v11  ;;  %v524_v41 = vmul.f32 %v449_v14, %v2670_v3 }
 0x151   :  { %v2750_v43 = vadd.f32 %v451_v20, %v363_v37  ;;  %v498_v23 = vmul.f32 %v497_v16, %v2652_v36  ;;  %v508_v47 = vmul.f32 %v497_v16, %v2654_v33  ;;  %v518_v49 = vmul.f32 %v497_v16, %v2674_v10 }
 0x152   :  { %v523_v56 = vmul.f32 %v497_v16, %v2668_v1  ;;  %v547_v0 = vmul.f32 %v497_v16, %v2607_v21  ;;  %v557_v4 = vmul.f32 %v497_v16, %v2609_v22 }
 0x153   :  { %v500_v7 = vadd.f32 %v499_v15, %v498_v23  ;;  %v510_v2 = vadd.f32 %v509_v26, %v508_v47  ;;  %v520_v8 = vadd.f32 %v519_v35, %v518_v49  ;;  %v572_v15 = vmul.f32 %v497_v16, %v2625_v40 }
 0x154   :  { %v525_v30 = vadd.f32 %v524_v41, %v523_v56  ;;  %v548_v9 = vadd.f32 %v547_v0, %v546_v44  ;;  %v558_v5 = vadd.f32 %v557_v4, %v556_v34  ;;  %v566_v35 = vmul.f32 %v545_v18, %v2631_v50 }
 0x155   :  { %v501_v12 = vadd.f32 %v500_v7, %v2662_v53  ;;  %v511_v13 = vadd.f32 %v510_v2, %v2664_v55  ;;  %v567_v41 = vmul.f32 %v497_v16, %v2633_v52  ;;  %v573_v44 = vadd.f32 %v572_v15, %v571_v63 }
 0x156   :  { %v549_v29 = vadd.f32 %v548_v9, %v2619_v31  ;;  %v559_v37 = vadd.f32 %v558_v5, %v2621_v32  ;;  %v526_v34 = vadd.f32 %v525_v30, %v2686_v46  ;;  %v521_v49 = vadd.f32 %v520_v8, %v2690_v61 }
 0x157   :  { %v1790_v14 = vmul.f32 -1.442695, %v501_v12  ;;  %v1791_v19 = vmul.f32 -1.442695, %v511_v13  ;;  %v568_v23 = vadd.f32 %v567_v41, %v566_v35  ;;  %v574_v47 = vadd.f32 %v573_v44, %v2637_v58 }
 0x158   :  { %v1793_v20 = vmul.f32 -1.442695, %v549_v29  ;;  %v1794_v26 = vmul.f32 -1.442695, %v559_v37  ;;  %v1792_v56 = vmul.f32 -1.442695, %v526_v34 }
 0x159   :  { %1961 = vpow2.f32 %v1790_v14  ;;  %v569_v0 = vadd.f32 %v568_v23, %v2640_v62  ;;  %v1795_v4 = vmul.f32 -1.442695, %v574_v47 }
 0x15a   :  { %1963 = vpow2.f32 %v1791_v19 }
 0x15b   :  { %1965 = vpow2.f32 %v1793_v20 }
 0x15c   :  { %1967 = vpow2.f32 %v1794_v26 }
 0x15d   :  { %1969 = vtanh.f32 %v521_v49  ;;  %v630_v49 = vstv %s1748_s19  ;;  %s1758_s19 = sld [smem:[#allocation6 + $0xe]] }
 0x15e   :  { %1971 = vpow2.f32 %v1792_v56 }
 0x15f   :  { %1973 = vtanh.f32 %v569_v0 }
 0x160   :  { %1975 = vpow2.f32 %v1795_v4  ;;  %v632_v4 = vstv %s1763_s20  ;;  %s1773_s20 = sld [smem:[#allocation7 + $0xe]] }
 0x166   :  { %v1962_v7 = vpop.eup %1961 }
 0x167   :  { %v1964_v18 = vpop.eup %1963  ;;  %v505_v2 = vadd.f32 1.0, %v1962_v7 }
 0x168   :  { %v515_v16 = vadd.f32 1.0, %v1964_v18  ;;  %v1966_v63 = vpop.eup %1965  ;;  %v538_v18 = vstv %s1730_s21  ;;  %s1740_s21 = sld [smem:[#allocation10 + $0xc]] }
 0x169   :  { %1977 = vrcp.f32 %v505_v2  ;;  %v1968_v30 = vpop.eup %1967  ;;  %v553_v9 = vadd.f32 1.0, %v1966_v63 }
 0x16a   :  { %1979 = vrcp.f32 %v515_v16  ;;  %v563_v5 = vadd.f32 1.0, %v1968_v30  ;;  %v1970_v8 = vpop.eup %1969 }
 0x16b   :  { %1981 = vrcp.f32 %v553_v9  ;;  %v1972_v12 = vpop.eup %1971 }
 0x16c   :  { %1983 = vrcp.f32 %v563_v5  ;;  %v1974_v13 = vpop.eup %1973  ;;  %v530_v14 = vadd.f32 1.0, %v1972_v12 }
 0x16d   :  { %v1976_v29 = vpop.eup %1975 }
 0x16e   :  { %v578_v35 = vadd.f32 1.0, %v1976_v29  ;;  %1985 = vrcp.f32 %v530_v14 }
 0x176   :  { %v1978_v37 = vpop.eup %1977 }
 0x177   :  { %v1980_v19 = vpop.eup %1979  ;;  %v534_v20 = vmul.f32 %v1978_v37, %v1970_v8 }
 0x178   :  { %v533_v15 = vmul.f32 %v1980_v19, %v2736_v59  ;;  %v1982_v26 = vpop.eup %1981  ;;  %v629_v59 = vmul.f32 %v2604_v17, %v2554_v39 }
 0x179   :  { %v1984_v41 = vpop.eup %1983  ;;  %v582_v34 = vmul.f32 %v1982_v26, %v1974_v13 }
 0x17a   :  { %v2773_v44 = vadd.f32 %v534_v20, %v533_v15  ;;  %v581_v23 = vmul.f32 %v1984_v41, %v2740_v6  ;;  %v631_v56 = vmul.f32 %v630_v49, %v629_v59 }
 0x17b   :  { %v1986_v0 = vpop.eup %1985 }
 0x17c   :  { %1987 = vtanh.f32 %v2773_v44  ;;  %v2777_v47 = vadd.f32 %v582_v34, %v581_v23  ;;  %v633_v16 = vadd.f32 %v632_v4, %v631_v56 }
 0x17d   :  { %1989 = vrcp.f32 %v578_v35 }
 0x17e   :  { %1991 = vtanh.f32 %v2777_v47  ;;  %v634_v29 = vmul.f32 %v633_v16, %v2611_v24  ;;  %v644_v37 = vmul.f32 %v633_v16, %v2613_v25 }
 0x189   :  { %v1988_v7 = vpop.eup %1987 }
 0x18a   :  { %v1990_v2 = vpop.eup %1989  ;;  %v537_v6 = vmul.f32 %v1988_v7, %v1986_v0 }
 0x18b   :  { %v1992_v63 = vpop.eup %1991 }
 0x18c   :  { %v539_v30 = vmul.f32 %v538_v18, %v537_v6  ;;  %v587_v9 = vmul.f32 %v537_v6, %v2648_v27  ;;  %v585_v5 = vmul.f32 %v1992_v63, %v1990_v2  ;;  %v597_v8 = vmul.f32 %v537_v6, %v2650_v28 }
 0x18d   :  { %v607_v12 = vmul.f32 %v537_v6, %v2676_v11  ;;  %v612_v39 = vmul.f32 %v537_v6, %v2670_v3  ;;  %v659_v63 = vmul.f32 %v633_v16, %v2623_v38 }
 0x18e   :  { %v2787_v13 = vadd.f32 %v539_v30, %v2750_v43  ;;  %v586_v14 = vmul.f32 %v585_v5, %v2652_v36  ;;  %v596_v19 = vmul.f32 %v585_v5, %v2654_v33  ;;  %v606_v20 = vmul.f32 %v585_v5, %v2674_v10 }
 0x18f   :  { %v611_v15 = vmul.f32 %v585_v5, %v2668_v1  ;;  %v635_v26 = vmul.f32 %v585_v5, %v2607_v21  ;;  %v645_v35 = vmul.f32 %v585_v5, %v2609_v22  ;;  %v660_v30 = vmul.f32 %v585_v5, %v2625_v40 }
 0x190   :  { %v588_v41 = vadd.f32 %v587_v9, %v586_v14  ;;  %v598_v34 = vadd.f32 %v597_v8, %v596_v19  ;;  %v608_v43 = vadd.f32 %v607_v12, %v606_v20  ;;  %v654_v8 = vmul.f32 %v633_v16, %v2631_v50 }
 0x191   :  { %v613_v23 = vadd.f32 %v612_v39, %v611_v15  ;;  %v636_v59 = vadd.f32 %v635_v26, %v634_v29  ;;  %v646_v49 = vadd.f32 %v645_v35, %v644_v37  ;;  %v655_v12 = vmul.f32 %v585_v5, %v2633_v52 }
 0x192   :  { %v589_v56 = vadd.f32 %v588_v41, %v2662_v53  ;;  %v599_v0 = vadd.f32 %v598_v34, %v2664_v55  ;;  %v661_v39 = vadd.f32 %v660_v30, %v659_v63  ;;  %v609_v19 = vadd.f32 %v608_v43, %v2690_v61 }
 0x193   :  { %v637_v4 = vadd.f32 %v636_v59, %v2619_v31  ;;  %v647_v7 = vadd.f32 %v646_v49, %v2621_v32  ;;  %v614_v29 = vadd.f32 %v613_v23, %v2686_v46  ;;  %v656_v37 = vadd.f32 %v655_v12, %v654_v8 }
 0x194   :  { %v1796_v18 = vmul.f32 -1.442695, %v589_v56  ;;  %v1797_v2 = vmul.f32 -1.442695, %v599_v0  ;;  %v662_v14 = vadd.f32 %v661_v39, %v2637_v58 }
 0x195   :  { %v1799_v6 = vmul.f32 -1.442695, %v637_v4  ;;  %v1800_v9 = vmul.f32 -1.442695, %v647_v7  ;;  %v1798_v20 = vmul.f32 -1.442695, %v614_v29  ;;  %v657_v15 = vadd.f32 %v656_v37, %v2640_v62 }
 0x196   :  { %1993 = vpow2.f32 %v1796_v18  ;;  %v1801_v26 = vmul.f32 -1.442695, %v662_v14  ;;  %v718_v14 = vstv %s1749_s22  ;;  %s1759_s22 = sld [smem:[#allocation6 + $0xf]] }
 0x197   :  { %1995 = vpow2.f32 %v1797_v2 }
 0x198   :  { %1997 = vpow2.f32 %v1799_v6 }
 0x199   :  { %1999 = vpow2.f32 %v1800_v9 }
 0x19a   :  { %2001 = vtanh.f32 %v609_v19 }
 0x19b   :  { %2003 = vpow2.f32 %v1798_v20 }
 0x19c   :  { %2005 = vtanh.f32 %v657_v15  ;;  %v720_v15 = vstv %s1764_s23  ;;  %s1774_s23 = sld [smem:[#allocation7 + $0xf]] }
 0x19d   :  { %2007 = vpow2.f32 %v1801_v26 }
 0x1a3   :  { %v1994_v35 = vpop.eup %1993 }
 0x1a4   :  { %v1996_v16 = vpop.eup %1995  ;;  %v593_v41 = vadd.f32 1.0, %v1994_v35  ;;  %v626_v35 = vstv %s1731_s24  ;;  %s1741_s24 = sld [smem:[#allocation10 + $0xd]] }
 0x1a5   :  { %v603_v5 = vadd.f32 1.0, %v1996_v16  ;;  %v1998_v34 = vpop.eup %1997 }
 0x1a6   :  { %2009 = vrcp.f32 %v593_v41  ;;  %v2000_v23 = vpop.eup %1999  ;;  %v641_v59 = vadd.f32 1.0, %v1998_v34 }
 0x1a7   :  { %2011 = vrcp.f32 %v603_v5  ;;  %v651_v49 = vadd.f32 1.0, %v2000_v23  ;;  %v2002_v43 = vpop.eup %2001 }
 0x1a8   :  { %2013 = vrcp.f32 %v641_v59  ;;  %v2004_v56 = vpop.eup %2003 }
 0x1a9   :  { %2015 = vrcp.f32 %v651_v49  ;;  %v2006_v0 = vpop.eup %2005  ;;  %v618_v18 = vadd.f32 1.0, %v2004_v56 }
 0x1aa   :  { %v2008_v4 = vpop.eup %2007 }
 0x1ab   :  { %v666_v9 = vadd.f32 1.0, %v2008_v4  ;;  %2017 = vrcp.f32 %v618_v18 }
 0x1b3   :  { %v2010_v7 = vpop.eup %2009 }
 0x1b4   :  { %v2012_v2 = vpop.eup %2011  ;;  %v622_v6 = vmul.f32 %v2010_v7, %v2002_v43 }
 0x1b5   :  { %v621_v63 = vmul.f32 %v2012_v2, %v2773_v44  ;;  %v2014_v30 = vpop.eup %2013  ;;  %v717_v44 = vmul.f32 %v2604_v17, %v2558_v42 }
 0x1b6   :  { %v2016_v8 = vpop.eup %2015  ;;  %v670_v39 = vmul.f32 %v2014_v30, %v2006_v0 }
 0x1b7   :  { %v2810_v12 = vadd.f32 %v622_v6, %v621_v63  ;;  %v669_v29 = vmul.f32 %v2016_v8, %v2777_v47  ;;  %v719_v19 = vmul.f32 %v718_v14, %v717_v44 }
 0x1b8   :  { %v2018_v20 = vpop.eup %2017 }
 0x1b9   :  { %2019 = vtanh.f32 %v2810_v12  ;;  %v2814_v37 = vadd.f32 %v670_v39, %v669_v29  ;;  %v721_v41 = vadd.f32 %v720_v15, %v719_v19 }
 0x1ba   :  { %2021 = vrcp.f32 %v666_v9 }
 0x1bb   :  { %2023 = vtanh.f32 %v2814_v37  ;;  %v722_v0 = vmul.f32 %v721_v41, %v2611_v24  ;;  %v732_v4 = vmul.f32 %v721_v41, %v2613_v25 }
 0x1c6   :  { %v2020_v26 = vpop.eup %2019 }
 0x1c7   :  { %v2022_v16 = vpop.eup %2021  ;;  %v625_v47 = vmul.f32 %v2020_v26, %v2018_v20 }
 0x1c8   :  { %v2024_v5 = vpop.eup %2023 }
 0x1c9   :  { %v627_v34 = vmul.f32 %v626_v35, %v625_v47  ;;  %v675_v23 = vmul.f32 %v625_v47, %v2648_v27  ;;  %v673_v59 = vmul.f32 %v2024_v5, %v2022_v16  ;;  %v685_v49 = vmul.f32 %v625_v47, %v2650_v28 }
 0x1ca   :  { %v695_v43 = vmul.f32 %v625_v47, %v2676_v11  ;;  %v700_v42 = vmul.f32 %v625_v47, %v2670_v3  ;;  %v747_v47 = vmul.f32 %v721_v41, %v2623_v38 }
 0x1cb   :  { %v2824_v56 = vadd.f32 %v627_v34, %v2787_v13  ;;  %v674_v7 = vmul.f32 %v673_v59, %v2652_v36  ;;  %v684_v18 = vmul.f32 %v673_v59, %v2654_v33  ;;  %v694_v2 = vmul.f32 %v673_v59, %v2674_v10 }
 0x1cc   :  { %v699_v6 = vmul.f32 %v673_v59, %v2668_v1  ;;  %v723_v63 = vmul.f32 %v673_v59, %v2607_v21  ;;  %v733_v30 = vmul.f32 %v673_v59, %v2609_v22  ;;  %v748_v5 = vmul.f32 %v673_v59, %v2625_v40 }
 0x1cd   :  { %v676_v9 = vadd.f32 %v675_v23, %v674_v7  ;;  %v686_v8 = vadd.f32 %v685_v49, %v684_v18  ;;  %v696_v13 = vadd.f32 %v695_v43, %v694_v2  ;;  %v742_v23 = vmul.f32 %v721_v41, %v2631_v50 }
 0x1ce   :  { %v701_v39 = vadd.f32 %v700_v42, %v699_v6  ;;  %v724_v29 = vadd.f32 %v723_v63, %v722_v0  ;;  %v734_v44 = vadd.f32 %v733_v30, %v732_v4  ;;  %v743_v49 = vmul.f32 %v673_v59, %v2633_v52 }
 0x1cf   :  { %v677_v14 = vadd.f32 %v676_v9, %v2662_v53  ;;  %v687_v19 = vadd.f32 %v686_v8, %v2664_v55  ;;  %v749_v43 = vadd.f32 %v748_v5, %v747_v47  ;;  %v697_v7 = vadd.f32 %v696_v13, %v2690_v61 }
 0x1d0   :  { %v725_v20 = vadd.f32 %v724_v29, %v2619_v31  ;;  %v735_v15 = vadd.f32 %v734_v44, %v2621_v32  ;;  %v702_v42 = vadd.f32 %v701_v39, %v2686_v46  ;;  %v744_v0 = vadd.f32 %v743_v49, %v742_v23 }
 0x1d1   :  { %v1802_v26 = vmul.f32 -1.442695, %v677_v14  ;;  %v1803_v35 = vmul.f32 -1.442695, %v687_v19  ;;  %v750_v4 = vadd.f32 %v749_v43, %v2637_v58 }
 0x1d2   :  { %v1805_v16 = vmul.f32 -1.442695, %v725_v20  ;;  %v1806_v34 = vmul.f32 -1.442695, %v735_v15  ;;  %v1804_v18 = vmul.f32 -1.442695, %v702_v42  ;;  %v745_v2 = vadd.f32 %v744_v0, %v2640_v62 }
 0x1d3   :  { %2025 = vpow2.f32 %v1802_v26  ;;  %v1807_v6 = vmul.f32 -1.442695, %v750_v4  ;;  %v806_v0 = vstv %s1750_s25  ;;  %s1742_s25 = sld [smem:[#allocation10 + $0xe]] }
 0x1d4   :  { %2027 = vpow2.f32 %v1803_v35 }
 0x1d5   :  { %2029 = vpow2.f32 %v1805_v16 }
 0x1d6   :  { %2031 = vpow2.f32 %v1806_v34 }
 0x1d7   :  { %2033 = vtanh.f32 %v697_v7 }
 0x1d8   :  { %2035 = vpow2.f32 %v1804_v18  ;;  %v808_v18 = vstv %s1765_s2  ;;  %s1743_s2 = sld [smem:[#allocation10 + $0xf]] }
 0x1d9   :  { %2037 = vtanh.f32 %v745_v2 }
 0x1da   :  { %2039 = vpow2.f32 %v1807_v6  ;;  %v714_v6 = vstv %s1732_s26  ;;  %s1744_s26 = sld [smem:[#allocation10 + $0x10]] }
 0x1e0   :  { %v2026_v63 = vpop.eup %2025 }
 0x1e1   :  { %v2028_v41 = vpop.eup %2027  ;;  %v681_v30 = vadd.f32 1.0, %v2026_v63 }
 0x1e2   :  { %v691_v59 = vadd.f32 1.0, %v2028_v41  ;;  %v2030_v9 = vpop.eup %2029 }
 0x1e3   :  { %2041 = vrcp.f32 %v681_v30  ;;  %v2032_v8 = vpop.eup %2031  ;;  %v729_v39 = vadd.f32 1.0, %v2030_v9 }
 0x1e4   :  { %2043 = vrcp.f32 %v691_v59  ;;  %v739_v29 = vadd.f32 1.0, %v2032_v8  ;;  %v2034_v13 = vpop.eup %2033 }
 0x1e5   :  { %2045 = vrcp.f32 %v729_v39  ;;  %v2036_v44 = vpop.eup %2035 }
 0x1e6   :  { %2047 = vrcp.f32 %v739_v29  ;;  %v2038_v14 = vpop.eup %2037  ;;  %v706_v15 = vadd.f32 1.0, %v2036_v44 }
 0x1e7   :  { %v2040_v19 = vpop.eup %2039 }
 0x1e8   :  { %v754_v5 = vadd.f32 1.0, %v2040_v19  ;;  %2049 = vrcp.f32 %v706_v15 }
 0x1f0   :  { %v2042_v20 = vpop.eup %2041 }
 0x1f1   :  { %v2044_v26 = vpop.eup %2043  ;;  %v710_v35 = vmul.f32 %v2042_v20, %v2034_v13 }
 0x1f2   :  { %v709_v16 = vmul.f32 %v2044_v26, %v2810_v12  ;;  %v2046_v47 = vpop.eup %2045  ;;  %v805_v12 = vmul.f32 %v2604_v17, %v2562_v45 }
 0x1f3   :  { %v2048_v34 = vpop.eup %2047  ;;  %v758_v49 = vmul.f32 %v2046_v47, %v2038_v14 }
 0x1f4   :  { %v2847_v23 = vadd.f32 %v710_v35, %v709_v16  ;;  %v757_v43 = vmul.f32 %v2048_v34, %v2814_v37  ;;  %v807_v4 = vmul.f32 %v806_v0, %v805_v12 }
 0x1f5   :  { %v2050_v7 = vpop.eup %2049 }
 0x1f6   :  { %2051 = vtanh.f32 %v2847_v23  ;;  %v2851_v42 = vadd.f32 %v758_v49, %v757_v43  ;;  %v809_v41 = vadd.f32 %v808_v18, %v807_v4 }
 0x1f7   :  { %2053 = vrcp.f32 %v754_v5 }
 0x1f8   :  { %2055 = vtanh.f32 %v2851_v42  ;;  %v810_v44 = vmul.f32 %v809_v41, %v2611_v24  ;;  %v820_v14 = vmul.f32 %v809_v41, %v2613_v25 }
 0x203   :  { %v2052_v2 = vpop.eup %2051 }
 0x204   :  { %v2054_v63 = vpop.eup %2053  ;;  %v713_v37 = vmul.f32 %v2052_v2, %v2050_v7 }
 0x205   :  { %v2056_v30 = vpop.eup %2055 }
 0x206   :  { %v715_v59 = vmul.f32 %v714_v6, %v713_v37  ;;  %v763_v9 = vmul.f32 %v713_v37, %v2648_v27  ;;  %v761_v8 = vmul.f32 %v2056_v30, %v2054_v63  ;;  %v773_v39 = vmul.f32 %v713_v37, %v2650_v28 }
 0x207   :  { %v783_v29 = vmul.f32 %v713_v37, %v2676_v11  ;;  %v788_v45 = vmul.f32 %v713_v37, %v2670_v3  ;;  %v835_v63 = vmul.f32 %v809_v41, %v2623_v38 }
 0x208   :  { %v2861_v13 = vadd.f32 %v715_v59, %v2824_v56  ;;  %v762_v19 = vmul.f32 %v761_v8, %v2652_v36  ;;  %v772_v20 = vmul.f32 %v761_v8, %v2654_v33  ;;  %v782_v15 = vmul.f32 %v761_v8, %v2674_v10 }
 0x209   :  { %v787_v26 = vmul.f32 %v761_v8, %v2668_v1  ;;  %v811_v35 = vmul.f32 %v761_v8, %v2607_v21  ;;  %v821_v16 = vmul.f32 %v761_v8, %v2609_v22  ;;  %v836_v37 = vmul.f32 %v761_v8, %v2625_v40 }
 0x20a   :  { %v764_v47 = vadd.f32 %v763_v9, %v762_v19  ;;  %v774_v5 = vadd.f32 %v773_v39, %v772_v20  ;;  %v784_v56 = vadd.f32 %v783_v29, %v782_v15  ;;  %v830_v59 = vmul.f32 %v809_v41, %v2631_v50 }
 0x20b   :  { %v789_v34 = vadd.f32 %v788_v45, %v787_v26  ;;  %v812_v49 = vadd.f32 %v811_v35, %v810_v44  ;;  %v822_v43 = vadd.f32 %v821_v16, %v820_v14  ;;  %v831_v9 = vmul.f32 %v761_v8, %v2633_v52 }
 0x20c   :  { %v765_v12 = vadd.f32 %v764_v47, %v2662_v53  ;;  %v775_v0 = vadd.f32 %v774_v5, %v2664_v55  ;;  %v837_v39 = vadd.f32 %v836_v37, %v835_v63  ;;  %v785_v14 = vadd.f32 %v784_v56, %v2690_v61 }
 0x20d   :  { %v813_v4 = vadd.f32 %v812_v49, %v2619_v31  ;;  %v823_v7 = vadd.f32 %v822_v43, %v2621_v32  ;;  %v790_v29 = vadd.f32 %v789_v34, %v2686_v46  ;;  %v832_v45 = vadd.f32 %v831_v9, %v830_v59 }
 0x20e   :  { %v1808_v18 = vmul.f32 -1.442695, %v765_v12  ;;  %v1809_v2 = vmul.f32 -1.442695, %v775_v0  ;;  %v838_v44 = vadd.f32 %v837_v39, %v2637_v58 }
 0x20f   :  { %v1811_v6 = vmul.f32 -1.442695, %v813_v4  ;;  %v1812_v30 = vmul.f32 -1.442695, %v823_v7  ;;  %v1810_v19 = vmul.f32 -1.442695, %v790_v29  ;;  %v833_v20 = vadd.f32 %v832_v45, %v2640_v62 }
 0x210   :  { %2057 = vpow2.f32 %v1808_v18  ;;  %v1813_v15 = vmul.f32 -1.442695, %v838_v44  ;;  %v894_v29 = vstv %s1751_s27  ;;  %s2498_s27 = smov [#allocation12]  }
 0x211   :  { %2059 = vpow2.f32 %v1809_v2 }
 0x212   :  { %2061 = vpow2.f32 %v1811_v6 }
 0x213   :  { %2063 = vpow2.f32 %v1812_v30 }
 0x214   :  { %2065 = vtanh.f32 %v785_v14  ;;  %v896_v14 = vstv %s1766_s28  ;;  %s1694_s28 = sshll.u32 %s2498_s27, 4  ;;  %s1695_s28 = int_to_ptr.vmem [resolvable:$true] %s1694_s28 }
 0x215   :  { %2067 = vpow2.f32 %v1810_v19  ;;  %p2466_p12 = scmp.lt.s32.totalorder %s1695_s28, %s1695_s28 }
 0x216   :  { %2069 = vtanh.f32 %v833_v20  ;;  %v802_v20 = vstv %s1733_s29  ;;  %s2461_s29 = scalar_lea.vmem %s1695_s28, 128 }
 0x217   :  { %2071 = vpow2.f32 %v1813_v15  ;;  %p2462_p11 = scmp.ne.s32.totalorder %s1695_s28, %s2461_s29  ;;  %p2467_p13 = scmp.lt.s32.totalorder %s2461_s29, %s2461_s29 }
 0x219   :  { %p2468_p0 = por %p2467_p13, %p2466_p12 }
 0x21b   :  { %p2469_p1 = pnand %p2468_p0, %p2462_p11 }
 0x21d   :  { %v2058_v26 = vpop.eup %2057 }
 0x21e   :  { %v2060_v41 = vpop.eup %2059  ;;  %v769_v35 = vadd.f32 1.0, %v2058_v26 }
 0x21f   :  { %v779_v8 = vadd.f32 1.0, %v2060_v41  ;;  %v2062_v16 = vpop.eup %2061 }
 0x220   :  { %2073 = vrcp.f32 %v769_v35  ;;  %v2064_v47 = vpop.eup %2063  ;;  %v817_v5 = vadd.f32 1.0, %v2062_v16 }
 0x221   :  { %2075 = vrcp.f32 %v779_v8  ;;  %v827_v34 = vadd.f32 1.0, %v2064_v47  ;;  %v2066_v56 = vpop.eup %2065 }
 0x222   :  { %2077 = vrcp.f32 %v817_v5  ;;  %v2068_v49 = vpop.eup %2067 }
 0x223   :  { %2079 = vrcp.f32 %v827_v34  ;;  %v2070_v43 = vpop.eup %2069  ;;  %v794_v4 = vadd.f32 1.0, %v2068_v49 }
 0x224   :  { %v2072_v12 = vpop.eup %2071 }
 0x225   :  { %v842_v63 = vadd.f32 1.0, %v2072_v12  ;;  %2081 = vrcp.f32 %v794_v4 }
 0x22d   :  { %v2074_v0 = vpop.eup %2073 }
 0x22e   :  { %v2076_v7 = vpop.eup %2075  ;;  %v798_v18 = vmul.f32 %v2074_v0, %v2066_v56 }
 0x22f   :  { %v797_v2 = vmul.f32 %v2076_v7, %v2847_v23  ;;  %v2078_v6 = vpop.eup %2077  ;;  %v893_v23 = vmul.f32 %v2604_v17, %v2566_v48 }
 0x230   :  { %v2080_v37 = vpop.eup %2079  ;;  %v846_v59 = vmul.f32 %v2078_v6, %v2070_v43 }
 0x231   :  { %v2884_v30 = vadd.f32 %v798_v18, %v797_v2  ;;  %v845_v9 = vmul.f32 %v2080_v37, %v2851_v42  ;;  %v895_v45 = vmul.f32 %v894_v29, %v893_v23 }
 0x232   :  { %v2082_v44 = vpop.eup %2081 }
 0x233   :  { %2083 = vtanh.f32 %v2884_v30  ;;  %v2888_v39 = vadd.f32 %v846_v59, %v845_v9  ;;  %v897_v26 = vadd.f32 %v896_v14, %v895_v45 }
 0x234   :  { %2085 = vrcp.f32 %v842_v63 }
 0x235   :  { %2087 = vtanh.f32 %v2888_v39  ;;  %v898_v56 = vmul.f32 %v897_v26, %v2611_v24  ;;  %v908_v49 = vmul.f32 %v897_v26, %v2613_v25 }
 0x240   :  { %v2084_v19 = vpop.eup %2083 }
 0x241   :  { %v2086_v15 = vpop.eup %2085  ;;  %v801_v42 = vmul.f32 %v2084_v19, %v2082_v44 }
 0x242   :  { %v2088_v41 = vpop.eup %2087 }
 0x243   :  { %v803_v35 = vmul.f32 %v802_v20, %v801_v42  ;;  %v851_v8 = vmul.f32 %v801_v42, %v2648_v27  ;;  %v849_v16 = vmul.f32 %v2088_v41, %v2086_v15  ;;  %v861_v47 = vmul.f32 %v801_v42, %v2650_v28 }
 0x244   :  { %v871_v5 = vmul.f32 %v801_v42, %v2676_v11  ;;  %v876_v48 = vmul.f32 %v801_v42, %v2670_v3  ;;  %v923_v20 = vmul.f32 %v897_v26, %v2623_v38  ;;  %v918_v41 = vmul.f32 %v897_v26, %v2631_v50 }
 0x245   :  { %v2898_v34 = vadd.f32 %v803_v35, %v2861_v13  ;;  %v850_v43 = vmul.f32 %v849_v16, %v2652_v36  ;;  %v860_v12 = vmul.f32 %v849_v16, %v2654_v33  ;;  %v870_v0 = vmul.f32 %v849_v16, %v2674_v10 }
 0x246   :  { %v875_v4 = vmul.f32 %v849_v16, %v2668_v1  ;;  %v899_v7 = vmul.f32 %v849_v16, %v2607_v21  ;;  %v909_v18 = vmul.f32 %v849_v16, %v2609_v22  ;;  %v924_v15 = vmul.f32 %v849_v16, %v2625_v40 }
 0x247   :  { %v852_v2 = vadd.f32 %v851_v8, %v850_v43  ;;  %v862_v6 = vadd.f32 %v861_v47, %v860_v12  ;;  %v872_v13 = vadd.f32 %v871_v5, %v870_v0  ;;  %v919_v35 = vmul.f32 %v849_v16, %v2633_v52 }
 0x248   :  { %v877_v63 = vadd.f32 %v876_v48, %v875_v4  ;;  %v900_v37 = vadd.f32 %v899_v7, %v898_v56  ;;  %v910_v59 = vadd.f32 %v909_v18, %v908_v49  ;;  %v925_v8 = vadd.f32 %v924_v15, %v923_v20 }
 0x249   :  { %v853_v9 = vadd.f32 %v852_v2, %v2662_v53  ;;  %v863_v23 = vadd.f32 %v862_v6, %v2664_v55  ;;  %v920_v5 = vadd.f32 %v919_v35, %v918_v41  ;;  %v873_v56 = vadd.f32 %v872_v13, %v2690_v61 }
 0x24a   :  { %v901_v29 = vadd.f32 %v900_v37, %v2619_v31  ;;  %v911_v45 = vadd.f32 %v910_v59, %v2621_v32  ;;  %v878_v47 = vadd.f32 %v877_v63, %v2686_v46  ;;  %v926_v48 = vadd.f32 %v925_v8, %v2637_v58 }
 0x24b   :  { %v1814_v44 = vmul.f32 -1.442695, %v853_v9  ;;  %v1815_v14 = vmul.f32 -1.442695, %v863_v23  ;;  %v921_v43 = vadd.f32 %v920_v5, %v2640_v62  ;;  %v982_v8 = vstv %s1752_s30 }
 0x24c   :  { %v1817_v19 = vmul.f32 -1.442695, %v901_v29  ;;  %v1818_v42 = vmul.f32 -1.442695, %v911_v45  ;;  %v1816_v49 = vmul.f32 -1.442695, %v878_v47 }
 0x24d   :  { %2089 = vpow2.f32 %v1814_v44  ;;  %v1819_v12 = vmul.f32 -1.442695, %v926_v48  ;;  %v984_v48 = vstv %s1767_s6 }
 0x24e   :  { %2091 = vpow2.f32 %v1815_v14 }
 0x24f   :  { %2093 = vpow2.f32 %v1817_v19 }
 0x250   :  { %2095 = vpow2.f32 %v1818_v42 }
 0x251   :  { %2097 = vtanh.f32 %v873_v56 }
 0x252   :  { %2099 = vpow2.f32 %v1816_v49  ;;  %v890_v49 = vstv %s1734_s7 }
 0x253   :  { %2101 = vtanh.f32 %v921_v43 }
 0x254   :  { %2103 = vpow2.f32 %v1819_v12 }
 0x25a   :  { %v2090_v0 = vpop.eup %2089 }
 0x25b   :  { %v2092_v26 = vpop.eup %2091  ;;  %v857_v4 = vadd.f32 1.0, %v2090_v0 }
 0x25c   :  { %v867_v16 = vadd.f32 1.0, %v2092_v26  ;;  %v2094_v7 = vpop.eup %2093 }
 0x25d   :  { %2105 = vrcp.f32 %v857_v4  ;;  %v2096_v18 = vpop.eup %2095  ;;  %v905_v2 = vadd.f32 1.0, %v2094_v7 }
 0x25e   :  { %2107 = vrcp.f32 %v867_v16  ;;  %v915_v6 = vadd.f32 1.0, %v2096_v18  ;;  %v2098_v13 = vpop.eup %2097 }
 0x25f   :  { %2109 = vrcp.f32 %v905_v2  ;;  %v2100_v63 = vpop.eup %2099 }
 0x260   :  { %2111 = vrcp.f32 %v915_v6  ;;  %v2102_v37 = vpop.eup %2101  ;;  %v882_v23 = vadd.f32 1.0, %v2100_v63 }
 0x261   :  { %v2104_v59 = vpop.eup %2103 }
 0x262   :  { %v930_v19 = vadd.f32 1.0, %v2104_v59  ;;  %2113 = vrcp.f32 %v882_v23 }
 0x26a   :  { %v2106_v9 = vpop.eup %2105 }
 0x26b   :  { %v2108_v29 = vpop.eup %2107  ;;  %v886_v45 = vmul.f32 %v2106_v9, %v2098_v13 }
 0x26c   :  { %v885_v44 = vmul.f32 %v2108_v29, %v2884_v30  ;;  %v2110_v14 = vpop.eup %2109  ;;  %v981_v30 = vmul.f32 %v2604_v17, %v2570_v51 }
 0x26d   :  { %v2112_v20 = vpop.eup %2111  ;;  %v934_v42 = vmul.f32 %v2110_v14, %v2102_v37 }
 0x26e   :  { %v2921_v15 = vadd.f32 %v886_v45, %v885_v44  ;;  %v933_v41 = vmul.f32 %v2112_v20, %v2888_v39  ;;  %v983_v47 = vmul.f32 %v982_v8, %v981_v30 }
 0x26f   :  { %v2114_v5 = vpop.eup %2113 }
 0x270   :  { %2115 = vtanh.f32 %v2921_v15  ;;  %v2925_v35 = vadd.f32 %v934_v42, %v933_v41  ;;  %v985_v12 = vadd.f32 %v984_v48, %v983_v47 }
 0x271   :  { %2117 = vrcp.f32 %v930_v19 }
 0x272   :  { %2119 = vtanh.f32 %v2925_v35  ;;  %v986_v6 = vmul.f32 %v985_v12, %v2611_v24  ;;  %v996_v13 = vmul.f32 %v985_v12, %v2613_v25 }
 0x27d   :  { %v2116_v56 = vpop.eup %2115 }
 0x27e   :  { %v2118_v43 = vpop.eup %2117  ;;  %v889_v39 = vmul.f32 %v2116_v56, %v2114_v5  ;;  %v1011_v56 = vmul.f32 %v985_v12, %v2623_v38 }
 0x27f   :  { %v2120_v0 = vpop.eup %2119 }
 0x280   :  { %v891_v26 = vmul.f32 %v890_v49, %v889_v39  ;;  %v939_v4 = vmul.f32 %v889_v39, %v2648_v27  ;;  %v937_v16 = vmul.f32 %v2120_v0, %v2118_v43  ;;  %v949_v7 = vmul.f32 %v889_v39, %v2650_v28 }
 0x281   :  { %v959_v18 = vmul.f32 %v889_v39, %v2676_v11  ;;  %v964_v51 = vmul.f32 %v889_v39, %v2670_v3  ;;  %v1006_v39 = vmul.f32 %v985_v12, %v2631_v50 }
 0x282   :  { %v2935_v2 = vadd.f32 %v891_v26, %v2898_v34  ;;  %v938_v63 = vmul.f32 %v937_v16, %v2652_v36  ;;  %v948_v37 = vmul.f32 %v937_v16, %v2654_v33  ;;  %v958_v59 = vmul.f32 %v937_v16, %v2674_v10 }
 0x283   :  { %v963_v9 = vmul.f32 %v937_v16, %v2668_v1  ;;  %v987_v23 = vmul.f32 %v937_v16, %v2607_v21  ;;  %v997_v29 = vmul.f32 %v937_v16, %v2609_v22  ;;  %v1012_v49 = vmul.f32 %v937_v16, %v2625_v40 }
 0x284   :  { %v940_v45 = vadd.f32 %v939_v4, %v938_v63  ;;  %v950_v44 = vadd.f32 %v949_v7, %v948_v37  ;;  %v960_v34 = vadd.f32 %v959_v18, %v958_v59  ;;  %v1007_v0 = vmul.f32 %v937_v16, %v2633_v52 }
 0x285   :  { %v965_v14 = vadd.f32 %v964_v51, %v963_v9  ;;  %v988_v19 = vadd.f32 %v987_v23, %v986_v6  ;;  %v998_v20 = vadd.f32 %v997_v29, %v996_v13  ;;  %v1013_v26 = vadd.f32 %v1012_v49, %v1011_v56 }
 0x286   :  { %v941_v42 = vadd.f32 %v940_v45, %v2662_v53  ;;  %v951_v41 = vadd.f32 %v950_v44, %v2664_v55  ;;  %v1008_v7 = vadd.f32 %v1007_v0, %v1006_v39  ;;  %v961_v51 = vadd.f32 %v960_v34, %v2690_v61 }
 0x287   :  { %v989_v30 = vadd.f32 %v988_v19, %v2619_v31  ;;  %v999_v8 = vadd.f32 %v998_v20, %v2621_v32  ;;  %v966_v4 = vadd.f32 %v965_v14, %v2686_v46  ;;  %v1014_v18 = vadd.f32 %v1013_v26, %v2637_v58 }
 0x288   :  { %v1820_v47 = vmul.f32 -1.442695, %v941_v42  ;;  %v1821_v5 = vmul.f32 -1.442695, %v951_v41  ;;  %v1009_v13 = vadd.f32 %v1008_v7, %v2640_v62  ;;  %v1070_v0 = vstv %s1753_s8 }
 0x289   :  { %v1823_v48 = vmul.f32 -1.442695, %v989_v30  ;;  %v1824_v43 = vmul.f32 -1.442695, %v999_v8  ;;  %v1822_v6 = vmul.f32 -1.442695, %v966_v4  ;;  %v1072_v7 = vstv %s1768_s9 }
 0x28a   :  { %2121 = vpow2.f32 %v1820_v47  ;;  %v1825_v63 = vmul.f32 -1.442695, %v1014_v18 }
 0x28b   :  { %2123 = vpow2.f32 %v1821_v5 }
 0x28c   :  { %2125 = vpow2.f32 %v1823_v48 }
 0x28d   :  { %2127 = vpow2.f32 %v1824_v43 }
 0x28e   :  { %2129 = vtanh.f32 %v961_v51  ;;  %v978_v51 = vstv %s1735_s10 }
 0x28f   :  { %2131 = vpow2.f32 %v1822_v6 }
 0x290   :  { %2133 = vtanh.f32 %v1009_v13 }
 0x291   :  { %2135 = vpow2.f32 %v1825_v63 }
 0x297   :  { %v2122_v37 = vpop.eup %2121 }
 0x298   :  { %v2124_v12 = vpop.eup %2123  ;;  %v945_v59 = vadd.f32 1.0, %v2122_v37 }
 0x299   :  { %v955_v16 = vadd.f32 1.0, %v2124_v12  ;;  %v2126_v9 = vpop.eup %2125 }
 0x29a   :  { %2137 = vrcp.f32 %v945_v59  ;;  %v2128_v23 = vpop.eup %2127  ;;  %v993_v29 = vadd.f32 1.0, %v2126_v9 }
 0x29b   :  { %2139 = vrcp.f32 %v955_v16  ;;  %v1003_v45 = vadd.f32 1.0, %v2128_v23  ;;  %v2130_v44 = vpop.eup %2129 }
 0x29c   :  { %2141 = vrcp.f32 %v993_v29  ;;  %v2132_v34 = vpop.eup %2131 }
 0x29d   :  { %2143 = vrcp.f32 %v1003_v45  ;;  %v2134_v14 = vpop.eup %2133  ;;  %v970_v42 = vadd.f32 1.0, %v2132_v34 }
 0x29e   :  { %v2136_v19 = vpop.eup %2135 }
 0x29f   :  { %v1018_v5 = vadd.f32 1.0, %v2136_v19  ;;  %2145 = vrcp.f32 %v970_v42 }
 0x2a7   :  { %v2138_v20 = vpop.eup %2137 }
 0x2a8   :  { %v2140_v41 = vpop.eup %2139  ;;  %v974_v30 = vmul.f32 %v2138_v20, %v2130_v44 }
 0x2a9   :  { %v973_v8 = vmul.f32 %v2140_v41, %v2921_v15  ;;  %v2142_v47 = vpop.eup %2141  ;;  %v1069_v15 = vmul.f32 %v2604_v17, %v2574_v54 }
 0x2aa   :  { %v2144_v48 = vpop.eup %2143  ;;  %v1022_v49 = vmul.f32 %v2142_v47, %v2134_v14 }
 0x2ab   :  { %v2958_v56 = vadd.f32 %v974_v30, %v973_v8  ;;  %v1021_v43 = vmul.f32 %v2144_v48, %v2925_v35  ;;  %v1071_v26 = vmul.f32 %v1070_v0, %v1069_v15 }
 0x2ac   :  { %v2146_v4 = vpop.eup %2145 }
 0x2ad   :  { %2147 = vtanh.f32 %v2958_v56  ;;  %v2962_v39 = vadd.f32 %v1022_v49, %v1021_v43  ;;  %v1073_v13 = vadd.f32 %v1072_v7, %v1071_v26 }
 0x2ae   :  { %2149 = vrcp.f32 %v1018_v5 }
 0x2af   :  { %2151 = vtanh.f32 %v2962_v39  ;;  %v1074_v29 = vmul.f32 %v1073_v13, %v2611_v24  ;;  %v1084_v45 = vmul.f32 %v1073_v13, %v2613_v25  ;;  %v1099_v7 = vmul.f32 %v1073_v13, %v2623_v38 }
 0x2ba   :  { %v2148_v18 = vpop.eup %2147 }
 0x2bb   :  { %v2150_v6 = vpop.eup %2149  ;;  %v977_v35 = vmul.f32 %v2148_v18, %v2146_v4 }
 0x2bc   :  { %v2152_v63 = vpop.eup %2151 }
 0x2bd   :  { %v979_v37 = vmul.f32 %v978_v51, %v977_v35  ;;  %v1027_v12 = vmul.f32 %v977_v35, %v2648_v27  ;;  %v1025_v59 = vmul.f32 %v2152_v63, %v2150_v6  ;;  %v1037_v16 = vmul.f32 %v977_v35, %v2650_v28 }
 0x2be   :  { %v1047_v9 = vmul.f32 %v977_v35, %v2676_v11  ;;  %v1052_v54 = vmul.f32 %v977_v35, %v2670_v3  ;;  %v1094_v6 = vmul.f32 %v1073_v13, %v2631_v50 }
 0x2bf   :  { %v2972_v23 = vadd.f32 %v979_v37, %v2935_v2  ;;  %v1026_v44 = vmul.f32 %v1025_v59, %v2652_v36  ;;  %v1036_v34 = vmul.f32 %v1025_v59, %v2654_v33  ;;  %v1046_v14 = vmul.f32 %v1025_v59, %v2674_v10 }
 0x2c0   :  { %v1051_v19 = vmul.f32 %v1025_v59, %v2668_v1  ;;  %v1075_v20 = vmul.f32 %v1025_v59, %v2607_v21  ;;  %v1085_v42 = vmul.f32 %v1025_v59, %v2609_v22  ;;  %v1100_v18 = vmul.f32 %v1025_v59, %v2625_v40 }
 0x2c1   :  { %v1028_v41 = vadd.f32 %v1027_v12, %v1026_v44  ;;  %v1038_v30 = vadd.f32 %v1037_v16, %v1036_v34  ;;  %v1048_v2 = vadd.f32 %v1047_v9, %v1046_v14  ;;  %v1095_v35 = vmul.f32 %v1025_v59, %v2633_v52 }
 0x2c2   :  { %v1053_v8 = vadd.f32 %v1052_v54, %v1051_v19  ;;  %v1076_v47 = vadd.f32 %v1075_v20, %v1074_v29  ;;  %v1086_v5 = vadd.f32 %v1085_v42, %v1084_v45  ;;  %v1101_v63 = vadd.f32 %v1100_v18, %v1099_v7 }
 0x2c3   :  { %v1029_v48 = vadd.f32 %v1028_v41, %v2662_v53  ;;  %v1039_v49 = vadd.f32 %v1038_v30, %v2664_v55  ;;  %v1096_v12 = vadd.f32 %v1095_v35, %v1094_v6  ;;  %v1049_v9 = vadd.f32 %v1048_v2, %v2690_v61 }
 0x2c4   :  { %v1077_v43 = vadd.f32 %v1076_v47, %v2619_v31  ;;  %v1087_v15 = vadd.f32 %v1086_v5, %v2621_v32  ;;  %v1054_v37 = vadd.f32 %v1053_v8, %v2686_v46  ;;  %v1102_v16 = vadd.f32 %v1101_v63, %v2637_v58 }
 0x2c5   :  { %v1826_v0 = vmul.f32 -1.442695, %v1029_v48  ;;  %v1827_v26 = vmul.f32 -1.442695, %v1039_v49  ;;  %v1097_v29 = vadd.f32 %v1096_v12, %v2640_v62  ;;  %v1158_v6 = vstv %s1754_s11 }
 0x2c6   :  { %v1829_v4 = vmul.f32 -1.442695, %v1077_v43  ;;  %v1830_v51 = vmul.f32 -1.442695, %v1087_v15  ;;  %v1828_v54 = vmul.f32 -1.442695, %v1054_v37  ;;  %v1160_v37 = vstv %s1769_s0 }
 0x2c7   :  { %2153 = vpow2.f32 %v1826_v0  ;;  %v1831_v45 = vmul.f32 -1.442695, %v1102_v16  ;;  %v1066_v16 = vstv %s1736_s1 }
 0x2c8   :  { %2155 = vpow2.f32 %v1827_v26 }
 0x2c9   :  { %2157 = vpow2.f32 %v1829_v4 }
 0x2ca   :  { %2159 = vpow2.f32 %v1830_v51 }
 0x2cb   :  { %2161 = vtanh.f32 %v1049_v9 }
 0x2cc   :  { %2163 = vpow2.f32 %v1828_v54 }
 0x2cd   :  { %2165 = vtanh.f32 %v1097_v29 }
 0x2ce   :  { %2167 = vpow2.f32 %v1831_v45 }
 0x2d4   :  { %v2154_v44 = vpop.eup %2153 }
 0x2d5   :  { %v2156_v13 = vpop.eup %2155  ;;  %v1033_v34 = vadd.f32 1.0, %v2154_v44 }
 0x2d6   :  { %v1043_v59 = vadd.f32 1.0, %v2156_v13  ;;  %v2158_v14 = vpop.eup %2157 }
 0x2d7   :  { %2169 = vrcp.f32 %v1033_v34  ;;  %v2160_v19 = vpop.eup %2159  ;;  %v1081_v20 = vadd.f32 1.0, %v2158_v14 }
 0x2d8   :  { %2171 = vrcp.f32 %v1043_v59  ;;  %v1091_v42 = vadd.f32 1.0, %v2160_v19  ;;  %v2162_v41 = vpop.eup %2161 }
 0x2d9   :  { %2173 = vrcp.f32 %v1081_v20  ;;  %v2164_v30 = vpop.eup %2163 }
 0x2da   :  { %2175 = vrcp.f32 %v1091_v42  ;;  %v2166_v2 = vpop.eup %2165  ;;  %v1058_v5 = vadd.f32 1.0, %v2164_v30 }
 0x2db   :  { %v2168_v8 = vpop.eup %2167 }
 0x2dc   :  { %v1106_v0 = vadd.f32 1.0, %v2168_v8  ;;  %2177 = vrcp.f32 %v1058_v5 }
 0x2e4   :  { %v2170_v47 = vpop.eup %2169 }
 0x2e5   :  { %v2172_v48 = vpop.eup %2171  ;;  %v1062_v49 = vmul.f32 %v2170_v47, %v2162_v41 }
 0x2e6   :  { %v1061_v43 = vmul.f32 %v2172_v48, %v2958_v56  ;;  %v2174_v15 = vpop.eup %2173  ;;  %v1157_v56 = vmul.f32 %v2604_v17, %v2578_v57 }
 0x2e7   :  { %v2176_v26 = vpop.eup %2175  ;;  %v1110_v7 = vmul.f32 %v2174_v15, %v2166_v2 }
 0x2e8   :  { %v2995_v4 = vadd.f32 %v1062_v49, %v1061_v43  ;;  %v1109_v18 = vmul.f32 %v2176_v26, %v2962_v39  ;;  %v1159_v35 = vmul.f32 %v1158_v6, %v1157_v56 }
 0x2e9   :  { %v2178_v63 = vpop.eup %2177 }
 0x2ea   :  { %2179 = vtanh.f32 %v2995_v4  ;;  %v2999_v51 = vadd.f32 %v1110_v7, %v1109_v18  ;;  %v1161_v54 = vadd.f32 %v1160_v37, %v1159_v35 }
 0x2eb   :  { %2181 = vrcp.f32 %v1106_v0 }
 0x2ec   :  { %2183 = vtanh.f32 %v2999_v51  ;;  %v1162_v19 = vmul.f32 %v1161_v54, %v2611_v24  ;;  %v1172_v20 = vmul.f32 %v1161_v54, %v2613_v25 }
 0x2f7   :  { %v2180_v12 = vpop.eup %2179 }
 0x2f8   :  { %v2182_v9 = vpop.eup %2181  ;;  %v1065_v39 = vmul.f32 %v2180_v12, %v2178_v63  ;;  %v1187_v63 = vmul.f32 %v1161_v54, %v2623_v38 }
 0x2f9   :  { %v2184_v29 = vpop.eup %2183 }
 0x2fa   :  { %v1067_v45 = vmul.f32 %v1066_v16, %v1065_v39  ;;  %v1115_v44 = vmul.f32 %v1065_v39, %v2648_v27  ;;  %v1113_v13 = vmul.f32 %v2184_v29, %v2182_v9  ;;  %v1125_v34 = vmul.f32 %v1065_v39, %v2650_v28 }
 0x2fb   :  { %v1135_v59 = vmul.f32 %v1065_v39, %v2676_v11  ;;  %v1140_v57 = vmul.f32 %v1065_v39, %v2670_v3  ;;  %v1182_v16 = vmul.f32 %v1161_v54, %v2631_v50 }
 0x2fc   :  { %v3009_v14 = vadd.f32 %v1067_v45, %v2972_v23  ;;  %v1114_v42 = vmul.f32 %v1113_v13, %v2652_v36  ;;  %v1124_v41 = vmul.f32 %v1113_v13, %v2654_v33  ;;  %v1134_v30 = vmul.f32 %v1113_v13, %v2674_v10 }
 0x2fd   :  { %v1139_v2 = vmul.f32 %v1113_v13, %v2668_v1  ;;  %v1163_v8 = vmul.f32 %v1113_v13, %v2607_v21  ;;  %v1173_v47 = vmul.f32 %v1113_v13, %v2609_v22  ;;  %v1188_v37 = vmul.f32 %v1113_v13, %v2625_v40 }
 0x2fe   :  { %v1116_v5 = vadd.f32 %v1115_v44, %v1114_v42  ;;  %v1126_v48 = vadd.f32 %v1125_v34, %v1124_v41  ;;  %v1136_v23 = vadd.f32 %v1135_v59, %v1134_v30  ;;  %v1183_v9 = vmul.f32 %v1113_v13, %v2633_v52 }
 0x2ff   :  { %v1141_v49 = vadd.f32 %v1140_v57, %v1139_v2  ;;  %v1164_v43 = vadd.f32 %v1163_v8, %v1162_v19  ;;  %v1174_v15 = vadd.f32 %v1173_v47, %v1172_v20  ;;  %v1189_v39 = vadd.f32 %v1188_v37, %v1187_v63 }
 0x300   :  { %v1117_v0 = vadd.f32 %v1116_v5, %v2662_v53  ;;  %v1127_v26 = vadd.f32 %v1126_v48, %v2664_v55  ;;  %v1184_v45 = vadd.f32 %v1183_v9, %v1182_v16  ;;  %v1137_v34 = vadd.f32 %v1136_v23, %v2690_v61 }
 0x301   :  { %v1165_v7 = vadd.f32 %v1164_v43, %v2619_v31  ;;  %v1175_v18 = vadd.f32 %v1174_v15, %v2621_v32  ;;  %v1142_v29 = vadd.f32 %v1141_v49, %v2686_v46  ;;  %v1190_v44 = vadd.f32 %v1189_v39, %v2637_v58 }
 0x302   :  { %v1832_v56 = vmul.f32 -1.442695, %v1117_v0  ;;  %v1833_v6 = vmul.f32 -1.442695, %v1127_v26  ;;  %v1185_v57 = vadd.f32 %v1184_v45, %v2640_v62  ;;  %v1248_v39 = vstv %s1770_s12 }
 0x303   :  { %v1835_v35 = vmul.f32 -1.442695, %v1165_v7  ;;  %v1836_v12 = vmul.f32 -1.442695, %v1175_v18  ;;  %v1834_v59 = vmul.f32 -1.442695, %v1142_v29  ;;  %v1154_v45 = vstv %s1737_s13 }
 0x304   :  { %2185 = vpow2.f32 %v1832_v56  ;;  %v1837_v19 = vmul.f32 -1.442695, %v1190_v44 }
 0x305   :  { %2187 = vpow2.f32 %v1833_v6 }
 0x306   :  { %2189 = vpow2.f32 %v1835_v35 }
 0x307   :  { %2191 = vpow2.f32 %v1836_v12  ;;  %v1246_v12 = vstv %s1755_s3 }
 0x308   :  { %2193 = vtanh.f32 %v1137_v34 }
 0x309   :  { %2195 = vpow2.f32 %v1834_v59 }
 0x30a   :  { %2197 = vtanh.f32 %v1185_v57 }
 0x30b   :  { %2199 = vpow2.f32 %v1837_v19 }
 0x311   :  { %v2186_v20 = vpop.eup %2185 }
 0x312   :  { %v2188_v54 = vpop.eup %2187  ;;  %v1121_v42 = vadd.f32 1.0, %v2186_v20 }
 0x313   :  { %v1131_v13 = vadd.f32 1.0, %v2188_v54  ;;  %v2190_v41 = vpop.eup %2189 }
 0x314   :  { %2201 = vrcp.f32 %v1121_v42  ;;  %v2192_v30 = vpop.eup %2191  ;;  %v1169_v2 = vadd.f32 1.0, %v2190_v41 }
 0x315   :  { %2203 = vrcp.f32 %v1131_v13  ;;  %v1179_v8 = vadd.f32 1.0, %v2192_v30  ;;  %v2194_v47 = vpop.eup %2193 }
 0x316   :  { %2205 = vrcp.f32 %v1169_v2  ;;  %v2196_v5 = vpop.eup %2195 }
 0x317   :  { %2207 = vrcp.f32 %v1179_v8  ;;  %v2198_v48 = vpop.eup %2197  ;;  %v1146_v43 = vadd.f32 1.0, %v2196_v5 }
 0x318   :  { %v2200_v23 = vpop.eup %2199 }
 0x319   :  { %v1194_v18 = vadd.f32 1.0, %v2200_v23  ;;  %2209 = vrcp.f32 %v1146_v43 }
 0x321   :  { %v2202_v49 = vpop.eup %2201 }
 0x322   :  { %v2204_v15 = vpop.eup %2203  ;;  %v1150_v0 = vmul.f32 %v2202_v49, %v2194_v47 }
 0x323   :  { %v1149_v26 = vmul.f32 %v2204_v15, %v2995_v4  ;;  %v2206_v7 = vpop.eup %2205  ;;  %v1245_v4 = vmul.f32 %v2604_v17, %v2582_v60 }
 0x324   :  { %v2208_v56 = vpop.eup %2207  ;;  %v1198_v35 = vmul.f32 %v2206_v7, %v2198_v48 }
 0x325   :  { %v3032_v6 = vadd.f32 %v1150_v0, %v1149_v26  ;;  %v1197_v63 = vmul.f32 %v2208_v56, %v2999_v51  ;;  %v1247_v16 = vmul.f32 %v1246_v12, %v1245_v4 }
 0x326   :  { %v2210_v9 = vpop.eup %2209 }
 0x327   :  { %2211 = vtanh.f32 %v3032_v6  ;;  %v3036_v37 = vadd.f32 %v1198_v35, %v1197_v63  ;;  %v1249_v34 = vadd.f32 %v1248_v39, %v1247_v16 }
 0x328   :  { %2213 = vrcp.f32 %v1194_v18 }
 0x329   :  { %2215 = vtanh.f32 %v3036_v37  ;;  %v1250_v41 = vmul.f32 %v1249_v34, %v2611_v24  ;;  %v1260_v30 = vmul.f32 %v1249_v34, %v2613_v25  ;;  %v1275_v16 = vmul.f32 %v1249_v34, %v2623_v38 }
 0x334   :  { %v2212_v29 = vpop.eup %2211 }
 0x335   :  { %v2214_v44 = vpop.eup %2213  ;;  %v1153_v51 = vmul.f32 %v2212_v29, %v2210_v9  ;;  %v1270_v29 = vmul.f32 %v1249_v34, %v2631_v50 }
 0x336   :  { %v2216_v59 = vpop.eup %2215 }
 0x337   :  { %v1155_v57 = vmul.f32 %v1154_v45, %v1153_v51  ;;  %v1203_v19 = vmul.f32 %v1153_v51, %v2648_v27  ;;  %v1201_v20 = vmul.f32 %v2216_v59, %v2214_v44  ;;  %v1213_v54 = vmul.f32 %v1153_v51, %v2650_v28 }
 0x338   :  { %v1223_v42 = vmul.f32 %v1153_v51, %v2676_v11  ;;  %v1228_v60 = vmul.f32 %v1153_v51, %v2670_v3 }
 0x339   :  { %v3046_v13 = vadd.f32 %v1155_v57, %v3009_v14  ;;  %v1202_v2 = vmul.f32 %v1201_v20, %v2652_v36  ;;  %v1212_v8 = vmul.f32 %v1201_v20, %v2654_v33  ;;  %v1222_v47 = vmul.f32 %v1201_v20, %v2674_v10 }
 0x33a   :  { %v1227_v5 = vmul.f32 %v1201_v20, %v2668_v1  ;;  %v1251_v48 = vmul.f32 %v1201_v20, %v2607_v21  ;;  %v1261_v23 = vmul.f32 %v1201_v20, %v2609_v22  ;;  %v1276_v9 = vmul.f32 %v1201_v20, %v2625_v40 }
 0x33b   :  { %v1204_v49 = vadd.f32 %v1203_v19, %v1202_v2  ;;  %v1214_v43 = vadd.f32 %v1213_v54, %v1212_v8  ;;  %v1224_v14 = vadd.f32 %v1223_v42, %v1222_v47  ;;  %v1271_v45 = vmul.f32 %v1201_v20, %v2633_v52 }
 0x33c   :  { %v1229_v15 = vadd.f32 %v1228_v60, %v1227_v5  ;;  %v1252_v0 = vadd.f32 %v1251_v48, %v1250_v41  ;;  %v1262_v26 = vadd.f32 %v1261_v23, %v1260_v30  ;;  %v1277_v44 = vadd.f32 %v1276_v9, %v1275_v16 }
 0x33d   :  { %v1205_v7 = vadd.f32 %v1204_v49, %v2662_v53  ;;  %v1215_v18 = vadd.f32 %v1214_v43, %v2664_v55  ;;  %v1272_v59 = vadd.f32 %v1271_v45, %v1270_v29  ;;  %v1225_v19 = vadd.f32 %v1224_v14, %v2690_v61 }
 0x33e   :  { %v1253_v56 = vadd.f32 %v1252_v0, %v2619_v31  ;;  %v1263_v35 = vadd.f32 %v1262_v26, %v2621_v32  ;;  %v1230_v51 = vadd.f32 %v1229_v15, %v2686_v46  ;;  %v1278_v57 = vadd.f32 %v1277_v44, %v2637_v58 }
 0x33f   :  { %v1838_v63 = vmul.f32 -1.442695, %v1205_v7  ;;  %v1839_v4 = vmul.f32 -1.442695, %v1215_v18  ;;  %v1273_v42 = vadd.f32 %v1272_v59, %v2640_v62  ;;  %v1336_v44 = vstv %s1771_s15 }
 0x340   :  { %v1841_v12 = vmul.f32 -1.442695, %v1253_v56  ;;  %v1842_v39 = vmul.f32 -1.442695, %v1263_v35  ;;  %v1840_v54 = vmul.f32 -1.442695, %v1230_v51  ;;  %v1242_v59 = vstv %s1738_s4 }
 0x341   :  { %2217 = vpow2.f32 %v1838_v63  ;;  %v1843_v60 = vmul.f32 -1.442695, %v1278_v57 }
 0x342   :  { %2219 = vpow2.f32 %v1839_v4 }
 0x343   :  { %2221 = vpow2.f32 %v1841_v12 }
 0x344   :  { %2223 = vpow2.f32 %v1842_v39  ;;  %v1334_v39 = vstv %s1756_s14 }
 0x345   :  { %2225 = vtanh.f32 %v1225_v19 }
 0x346   :  { %2227 = vpow2.f32 %v1840_v54 }
 0x347   :  { %2229 = vtanh.f32 %v1273_v42 }
 0x348   :  { %2231 = vpow2.f32 %v1843_v60 }
 0x34e   :  { %v2218_v41 = vpop.eup %2217 }
 0x34f   :  { %v2220_v34 = vpop.eup %2219  ;;  %v1209_v30 = vadd.f32 1.0, %v2218_v41 }
 0x350   :  { %v1219_v20 = vadd.f32 1.0, %v2220_v34  ;;  %v2222_v2 = vpop.eup %2221 }
 0x351   :  { %2233 = vrcp.f32 %v1209_v30  ;;  %v2224_v8 = vpop.eup %2223  ;;  %v1257_v47 = vadd.f32 1.0, %v2222_v2 }
 0x352   :  { %2235 = vrcp.f32 %v1219_v20  ;;  %v1267_v5 = vadd.f32 1.0, %v2224_v8  ;;  %v2226_v48 = vpop.eup %2225 }
 0x353   :  { %2237 = vrcp.f32 %v1257_v47  ;;  %v2228_v23 = vpop.eup %2227 }
 0x354   :  { %2239 = vrcp.f32 %v1267_v5  ;;  %v2230_v49 = vpop.eup %2229  ;;  %v1234_v15 = vadd.f32 1.0, %v2228_v23 }
 0x355   :  { %v2232_v43 = vpop.eup %2231 }
 0x356   :  { %v1282_v56 = vadd.f32 1.0, %v2232_v43  ;;  %2241 = vrcp.f32 %v1234_v15 }
 0x35e   :  { %v2234_v14 = vpop.eup %2233 }
 0x35f   :  { %v2236_v0 = vpop.eup %2235  ;;  %v1238_v26 = vmul.f32 %v2234_v14, %v2226_v48 }
 0x360   :  { %v1237_v7 = vmul.f32 %v2236_v0, %v3032_v6  ;;  %v2238_v18 = vpop.eup %2237  ;;  %v3248_v6 = vld [vmem:[#allocation18_spill] sm:$0xff] }
 0x361   :  { %v2240_v35 = vpop.eup %2239  ;;  %v1286_v4 = vmul.f32 %v2238_v18, %v2230_v49  ;;  %v1333_v9 = vmul.f32 %v2604_v17, %v3248_v6 }
 0x362   :  { %v3069_v63 = vadd.f32 %v1238_v26, %v1237_v7  ;;  %v1285_v12 = vmul.f32 %v2240_v35, %v3036_v37 }
 0x363   :  { %v1335_v29 = vmul.f32 %v1334_v39, %v1333_v9  ;;  %v2242_v45 = vpop.eup %2241 }
 0x364   :  { %2243 = vtanh.f32 %v3069_v63  ;;  %v3073_v16 = vadd.f32 %v1286_v4, %v1285_v12 }
 0x365   :  { %2245 = vrcp.f32 %v1282_v56  ;;  %v1337_v19 = vadd.f32 %v1336_v44, %v1335_v29 }
 0x366   :  { %2247 = vtanh.f32 %v3073_v16 }
 0x367   :  { %v1338_v8 = vmul.f32 %v1337_v19, %v2611_v24  ;;  %v1348_v47 = vmul.f32 %v1337_v19, %v2613_v25  ;;  %v1363_v29 = vmul.f32 %v1337_v19, %v2623_v38 }
 0x371   :  { %v2244_v51 = vpop.eup %2243 }
 0x372   :  { %v2246_v57 = vpop.eup %2245  ;;  %v1241_v37 = vmul.f32 %v2244_v51, %v2242_v45  ;;  %v1358_v51 = vmul.f32 %v1337_v19, %v2631_v50 }
 0x373   :  { %v2248_v54 = vpop.eup %2247 }
 0x374   :  { %v1243_v42 = vmul.f32 %v1242_v59, %v1241_v37  ;;  %v1291_v60 = vmul.f32 %v1241_v37, %v2648_v27  ;;  %v1289_v41 = vmul.f32 %v2248_v54, %v2246_v57  ;;  %v1301_v34 = vmul.f32 %v1241_v37, %v2650_v28 }
 0x375   :  { %v1311_v30 = vmul.f32 %v1241_v37, %v2676_v11  ;;  %v1316_v20 = vmul.f32 %v1241_v37, %v2670_v3 }
 0x376   :  { %v3083_v2 = vadd.f32 %v1243_v42, %v3046_v13  ;;  %v1290_v5 = vmul.f32 %v1289_v41, %v2652_v36  ;;  %v1300_v48 = vmul.f32 %v1289_v41, %v2654_v33  ;;  %v1310_v23 = vmul.f32 %v1289_v41, %v2674_v10 }
 0x377   :  { %v1315_v49 = vmul.f32 %v1289_v41, %v2668_v1  ;;  %v1339_v43 = vmul.f32 %v1289_v41, %v2607_v21  ;;  %v1349_v14 = vmul.f32 %v1289_v41, %v2609_v22  ;;  %v1364_v45 = vmul.f32 %v1289_v41, %v2625_v40 }
 0x378   :  { %v1292_v15 = vadd.f32 %v1291_v60, %v1290_v5  ;;  %v1302_v0 = vadd.f32 %v1301_v34, %v1300_v48  ;;  %v1312_v13 = vadd.f32 %v1311_v30, %v1310_v23  ;;  %v1359_v59 = vmul.f32 %v1289_v41, %v2633_v52 }
 0x379   :  { %v1317_v26 = vadd.f32 %v1316_v20, %v1315_v49  ;;  %v1340_v7 = vadd.f32 %v1339_v43, %v1338_v8  ;;  %v1350_v18 = vadd.f32 %v1349_v14, %v1348_v47  ;;  %v1365_v57 = vadd.f32 %v1364_v45, %v1363_v29 }
 0x37a   :  { %v1293_v56 = vadd.f32 %v1292_v15, %v2662_v53  ;;  %v1303_v35 = vadd.f32 %v1302_v0, %v2664_v55  ;;  %v1360_v54 = vadd.f32 %v1359_v59, %v1358_v51  ;;  %v1313_v60 = vadd.f32 %v1312_v13, %v2690_v61 }
 0x37b   :  { %v1341_v4 = vadd.f32 %v1340_v7, %v2619_v31  ;;  %v1351_v12 = vadd.f32 %v1350_v18, %v2621_v32  ;;  %v1318_v37 = vadd.f32 %v1317_v26, %v2686_v46  ;;  %v1366_v42 = vadd.f32 %v1365_v57, %v2637_v58 }
 0x37c   :  { %v1844_v6 = vmul.f32 -1.442695, %v1293_v56  ;;  %v1845_v9 = vmul.f32 -1.442695, %v1303_v35  ;;  %v1361_v30 = vadd.f32 %v1360_v54, %v2640_v62  ;;  %v1424_v57 = vstv %s1772_s17 }
 0x37d   :  { %v1847_v39 = vmul.f32 -1.442695, %v1341_v4  ;;  %v1848_v44 = vmul.f32 -1.442695, %v1351_v12  ;;  %v1846_v34 = vmul.f32 -1.442695, %v1318_v37  ;;  %v1330_v54 = vstv %s1739_s18 }
 0x37e   :  { %2249 = vpow2.f32 %v1844_v6  ;;  %v1849_v20 = vmul.f32 -1.442695, %v1366_v42 }
 0x37f   :  { %2251 = vpow2.f32 %v1845_v9 }
 0x380   :  { %2253 = vpow2.f32 %v1847_v39 }
 0x381   :  { %2255 = vpow2.f32 %v1848_v44  ;;  %v1422_v44 = vstv %s1757_s16 }
 0x382   :  { %2257 = vtanh.f32 %v1313_v60 }
 0x383   :  { %2259 = vpow2.f32 %v1846_v34 }
 0x384   :  { %2261 = vtanh.f32 %v1361_v30 }
 0x385   :  { %2263 = vpow2.f32 %v1849_v20 }
 0x38b   :  { %v2250_v8 = vpop.eup %2249 }
 0x38c   :  { %v2252_v19 = vpop.eup %2251  ;;  %v1297_v47 = vadd.f32 1.0, %v2250_v8 }
 0x38d   :  { %v1307_v41 = vadd.f32 1.0, %v2252_v19  ;;  %v2254_v5 = vpop.eup %2253 }
 0x38e   :  { %2265 = vrcp.f32 %v1297_v47  ;;  %v2256_v48 = vpop.eup %2255  ;;  %v1345_v23 = vadd.f32 1.0, %v2254_v5 }
 0x38f   :  { %2267 = vrcp.f32 %v1307_v41  ;;  %v1355_v49 = vadd.f32 1.0, %v2256_v48  ;;  %v2258_v43 = vpop.eup %2257 }
 0x390   :  { %2269 = vrcp.f32 %v1345_v23  ;;  %v2260_v14 = vpop.eup %2259 }
 0x391   :  { %2271 = vrcp.f32 %v1355_v49  ;;  %v2262_v15 = vpop.eup %2261  ;;  %v1322_v26 = vadd.f32 1.0, %v2260_v14 }
 0x392   :  { %v2264_v0 = vpop.eup %2263 }
 0x393   :  { %v1370_v4 = vadd.f32 1.0, %v2264_v0  ;;  %2273 = vrcp.f32 %v1322_v26 }
 0x39b   :  { %v2266_v13 = vpop.eup %2265 }
 0x39c   :  { %v2268_v7 = vpop.eup %2267  ;;  %v1326_v18 = vmul.f32 %v2266_v13, %v2258_v43 }
 0x39d   :  { %v1325_v56 = vmul.f32 %v2268_v7, %v3069_v63  ;;  %v2270_v35 = vpop.eup %2269  ;;  %v3249_v63 = vld [vmem:[#allocation19_spill] sm:$0xff] }
 0x39e   :  { %v2272_v12 = vpop.eup %2271  ;;  %v1374_v9 = vmul.f32 %v2270_v35, %v2262_v15  ;;  %v1421_v45 = vmul.f32 %v2604_v17, %v3249_v63 }
 0x39f   :  { %v3106_v6 = vadd.f32 %v1326_v18, %v1325_v56  ;;  %v1373_v39 = vmul.f32 %v2272_v12, %v3073_v16 }
 0x3a0   :  { %v1423_v51 = vmul.f32 %v1422_v44, %v1421_v45  ;;  %v2274_v59 = vpop.eup %2273 }
 0x3a1   :  { %2275 = vtanh.f32 %v3106_v6  ;;  %v3110_v29 = vadd.f32 %v1374_v9, %v1373_v39 }
 0x3a2   :  { %2277 = vrcp.f32 %v1370_v4  ;;  %v1425_v60 = vadd.f32 %v1424_v57, %v1423_v51 }
 0x3a3   :  { %2279 = vtanh.f32 %v3110_v29 }
 0x3a4   :  { %v1426_v48 = vmul.f32 %v1425_v60, %v2611_v24  ;;  %v1436_v23 = vmul.f32 %v1425_v60, %v2613_v25  ;;  %v1451_v51 = vmul.f32 %v1425_v60, %v2623_v38 }
 0x3ae   :  { %v2276_v37 = vpop.eup %2275 }
 0x3af   :  { %v2278_v42 = vpop.eup %2277  ;;  %v1329_v16 = vmul.f32 %v2276_v37, %v2274_v59  ;;  %v1446_v37 = vmul.f32 %v1425_v60, %v2631_v50 }
 0x3b0   :  { %v2280_v34 = vpop.eup %2279 }
 0x3b1   :  { %v1331_v30 = vmul.f32 %v1330_v54, %v1329_v16  ;;  %v1379_v20 = vmul.f32 %v1329_v16, %v2648_v27  ;;  %v1377_v8 = vmul.f32 %v2280_v34, %v2278_v42  ;;  %v1389_v19 = vmul.f32 %v1329_v16, %v2650_v28 }
 0x3b2   :  { %v1399_v47 = vmul.f32 %v1329_v16, %v2676_v11  ;;  %v1404_v41 = vmul.f32 %v1329_v16, %v2670_v3 }
 0x3b3   :  { %v3120_v5 = vadd.f32 %v1331_v30, %v3083_v2  ;;  %v1378_v49 = vmul.f32 %v1377_v8, %v2652_v36  ;;  %v1388_v43 = vmul.f32 %v1377_v8, %v2654_v33  ;;  %v1398_v14 = vmul.f32 %v1377_v8, %v2674_v10 }
 0x3b4   :  { %v1403_v15 = vmul.f32 %v1377_v8, %v2668_v1  ;;  %v1427_v0 = vmul.f32 %v1377_v8, %v2607_v21  ;;  %v1437_v13 = vmul.f32 %v1377_v8, %v2609_v22  ;;  %v1452_v59 = vmul.f32 %v1377_v8, %v2625_v40 }
 0x3b5   :  { %v1380_v26 = vadd.f32 %v1379_v20, %v1378_v49  ;;  %v1390_v7 = vadd.f32 %v1389_v19, %v1388_v43  ;;  %v1400_v2 = vadd.f32 %v1399_v47, %v1398_v14  ;;  %v1447_v54 = vmul.f32 %v1377_v8, %v2633_v52 }
 0x3b6   :  { %v1405_v18 = vadd.f32 %v1404_v41, %v1403_v15  ;;  %v1428_v56 = vadd.f32 %v1427_v0, %v1426_v48  ;;  %v1438_v35 = vadd.f32 %v1437_v13, %v1436_v23  ;;  %v1453_v42 = vadd.f32 %v1452_v59, %v1451_v51 }
 0x3b7   :  { %v1381_v4 = vadd.f32 %v1380_v26, %v2662_v53  ;;  %v1391_v12 = vadd.f32 %v1390_v7, %v2664_v55  ;;  %v1448_v34 = vadd.f32 %v1447_v54, %v1446_v37  ;;  %v1401_v20 = vadd.f32 %v1400_v2, %v2690_v61 }
 0x3b8   :  { %v1429_v9 = vadd.f32 %v1428_v56, %v2619_v31  ;;  %v1439_v39 = vadd.f32 %v1438_v35, %v2621_v32  ;;  %v1406_v16 = vadd.f32 %v1405_v18, %v2686_v46  ;;  %v1454_v30 = vadd.f32 %v1453_v42, %v2637_v58 }
 0x3b9   :  { %v1850_v63 = vmul.f32 -1.442695, %v1381_v4  ;;  %v1851_v45 = vmul.f32 -1.442695, %v1391_v12  ;;  %v1449_v47 = vadd.f32 %v1448_v34, %v2640_v62  ;;  %v1512_v42 = vstv %s1773_s20 }
 0x3ba   :  { %v1853_v44 = vmul.f32 -1.442695, %v1429_v9  ;;  %v1854_v57 = vmul.f32 -1.442695, %v1439_v39  ;;  %v1852_v19 = vmul.f32 -1.442695, %v1406_v16  ;;  %v1418_v34 = vstv %s1740_s21 }
 0x3bb   :  { %2281 = vpow2.f32 %v1850_v63  ;;  %v1855_v41 = vmul.f32 -1.442695, %v1454_v30 }
 0x3bc   :  { %2283 = vpow2.f32 %v1851_v45 }
 0x3bd   :  { %2285 = vpow2.f32 %v1853_v44 }
 0x3be   :  { %2287 = vpow2.f32 %v1854_v57  ;;  %v1510_v57 = vstv %s1758_s19 }
 0x3bf   :  { %2289 = vtanh.f32 %v1401_v20 }
 0x3c0   :  { %2291 = vpow2.f32 %v1852_v19 }
 0x3c1   :  { %2293 = vtanh.f32 %v1449_v47 }
 0x3c2   :  { %2295 = vpow2.f32 %v1855_v41 }
 0x3c8   :  { %v2282_v48 = vpop.eup %2281 }
 0x3c9   :  { %v2284_v60 = vpop.eup %2283  ;;  %v1385_v23 = vadd.f32 1.0, %v2282_v48 }
 0x3ca   :  { %v1395_v8 = vadd.f32 1.0, %v2284_v60  ;;  %v2286_v49 = vpop.eup %2285 }
 0x3cb   :  { %2297 = vrcp.f32 %v1385_v23  ;;  %v2288_v43 = vpop.eup %2287  ;;  %v1433_v14 = vadd.f32 1.0, %v2286_v49 }
 0x3cc   :  { %2299 = vrcp.f32 %v1395_v8  ;;  %v1443_v15 = vadd.f32 1.0, %v2288_v43  ;;  %v2290_v0 = vpop.eup %2289 }
 0x3cd   :  { %2301 = vrcp.f32 %v1433_v14  ;;  %v2292_v13 = vpop.eup %2291 }
 0x3ce   :  { %2303 = vrcp.f32 %v1443_v15  ;;  %v2294_v26 = vpop.eup %2293  ;;  %v1410_v18 = vadd.f32 1.0, %v2292_v13 }
 0x3cf   :  { %v2296_v7 = vpop.eup %2295 }
 0x3d0   :  { %v1458_v9 = vadd.f32 1.0, %v2296_v7  ;;  %2305 = vrcp.f32 %v1410_v18 }
 0x3d8   :  { %v2298_v2 = vpop.eup %2297 }
 0x3d9   :  { %v2300_v56 = vpop.eup %2299  ;;  %v1414_v35 = vmul.f32 %v2298_v2, %v2290_v0 }
 0x3da   :  { %v1413_v4 = vmul.f32 %v2300_v56, %v3106_v6  ;;  %v2302_v12 = vpop.eup %2301  ;;  %v3250_v6 = vld [vmem:[#allocation20_spill] sm:$0xff] }
 0x3db   :  { %v2304_v39 = vpop.eup %2303  ;;  %v1462_v45 = vmul.f32 %v2302_v12, %v2294_v26  ;;  %v1509_v59 = vmul.f32 %v2604_v17, %v3250_v6 }
 0x3dc   :  { %v3143_v63 = vadd.f32 %v1414_v35, %v1413_v4  ;;  %v1461_v44 = vmul.f32 %v2304_v39, %v3110_v29 }
 0x3dd   :  { %v1511_v37 = vmul.f32 %v1510_v57, %v1509_v59  ;;  %v2306_v54 = vpop.eup %2305 }
 0x3de   :  { %2307 = vtanh.f32 %v3143_v63  ;;  %v3147_v51 = vadd.f32 %v1462_v45, %v1461_v44 }
 0x3df   :  { %2309 = vrcp.f32 %v1458_v9  ;;  %v1513_v20 = vadd.f32 %v1512_v42, %v1511_v37 }
 0x3e0   :  { %2311 = vtanh.f32 %v3147_v51 }
 0x3e1   :  { %v1514_v43 = vmul.f32 %v1513_v20, %v2611_v24  ;;  %v1524_v14 = vmul.f32 %v1513_v20, %v2613_v25  ;;  %v1539_v37 = vmul.f32 %v1513_v20, %v2623_v38 }
 0x3eb   :  { %v2308_v16 = vpop.eup %2307 }
 0x3ec   :  { %v2310_v30 = vpop.eup %2309  ;;  %v1417_v29 = vmul.f32 %v2308_v16, %v2306_v54  ;;  %v1534_v16 = vmul.f32 %v1513_v20, %v2631_v50 }
 0x3ed   :  { %v2312_v19 = vpop.eup %2311 }
 0x3ee   :  { %v1419_v47 = vmul.f32 %v1418_v34, %v1417_v29  ;;  %v1467_v41 = vmul.f32 %v1417_v29, %v2648_v27  ;;  %v1465_v48 = vmul.f32 %v2312_v19, %v2310_v30  ;;  %v1477_v60 = vmul.f32 %v1417_v29, %v2650_v28 }
 0x3ef   :  { %v1487_v23 = vmul.f32 %v1417_v29, %v2676_v11  ;;  %v1492_v8 = vmul.f32 %v1417_v29, %v2670_v3 }
 0x3f0   :  { %v3157_v49 = vadd.f32 %v1419_v47, %v3120_v5  ;;  %v1466_v15 = vmul.f32 %v1465_v48, %v2652_v36  ;;  %v1476_v0 = vmul.f32 %v1465_v48, %v2654_v33  ;;  %v1486_v13 = vmul.f32 %v1465_v48, %v2674_v10 }
 0x3f1   :  { %v1491_v26 = vmul.f32 %v1465_v48, %v2668_v1  ;;  %v1515_v7 = vmul.f32 %v1465_v48, %v2607_v21  ;;  %v1525_v2 = vmul.f32 %v1465_v48, %v2609_v22  ;;  %v1540_v54 = vmul.f32 %v1465_v48, %v2625_v40 }
 0x3f2   :  { %v1468_v18 = vadd.f32 %v1467_v41, %v1466_v15  ;;  %v1478_v56 = vadd.f32 %v1477_v60, %v1476_v0  ;;  %v1488_v5 = vadd.f32 %v1487_v23, %v1486_v13  ;;  %v1535_v34 = vmul.f32 %v1465_v48, %v2633_v52 }
 0x3f3   :  { %v1493_v35 = vadd.f32 %v1492_v8, %v1491_v26  ;;  %v1516_v4 = vadd.f32 %v1515_v7, %v1514_v43  ;;  %v1526_v12 = vadd.f32 %v1525_v2, %v1524_v14  ;;  %v1541_v30 = vadd.f32 %v1540_v54, %v1539_v37 }
 0x3f4   :  { %v1469_v9 = vadd.f32 %v1468_v18, %v2662_v53  ;;  %v1479_v39 = vadd.f32 %v1478_v56, %v2664_v55  ;;  %v1536_v19 = vadd.f32 %v1535_v34, %v1534_v16  ;;  %v1489_v41 = vadd.f32 %v1488_v5, %v2690_v61 }
 0x3f5   :  { %v1517_v45 = vadd.f32 %v1516_v4, %v2619_v31  ;;  %v1527_v44 = vadd.f32 %v1526_v12, %v2621_v32  ;;  %v1494_v29 = vadd.f32 %v1493_v35, %v2686_v46  ;;  %v1542_v47 = vadd.f32 %v1541_v30, %v2637_v58 }
 0x3f6   :  { %v1856_v6 = vmul.f32 -1.442695, %v1469_v9  ;;  %v1857_v59 = vmul.f32 -1.442695, %v1479_v39  ;;  %v1537_v23 = vadd.f32 %v1536_v19, %v2640_v62  ;;  %v1600_v30 = vstv %s1774_s23 }
 0x3f7   :  { %v1859_v57 = vmul.f32 -1.442695, %v1517_v45  ;;  %v1860_v42 = vmul.f32 -1.442695, %v1527_v44  ;;  %v1858_v60 = vmul.f32 -1.442695, %v1494_v29  ;;  %v1506_v19 = vstv %s1741_s24 }
 0x3f8   :  { %2313 = vpow2.f32 %v1856_v6  ;;  %v1861_v8 = vmul.f32 -1.442695, %v1542_v47 }
 0x3f9   :  { %2315 = vpow2.f32 %v1857_v59 }
 0x3fa   :  { %2317 = vpow2.f32 %v1859_v57 }
 0x3fb   :  { %2319 = vpow2.f32 %v1860_v42  ;;  %v1598_v42 = vstv %s1759_s22 }
 0x3fc   :  { %2321 = vtanh.f32 %v1489_v41 }
 0x3fd   :  { %2323 = vpow2.f32 %v1858_v60 }
 0x3fe   :  { %2325 = vtanh.f32 %v1537_v23 }
 0x3ff   :  { %2327 = vpow2.f32 %v1861_v8 }
 0x405   :  { %v2314_v43 = vpop.eup %2313 }
 0x406   :  { %v2316_v20 = vpop.eup %2315  ;;  %v1473_v14 = vadd.f32 1.0, %v2314_v43 }
 0x407   :  { %v1483_v48 = vadd.f32 1.0, %v2316_v20  ;;  %v2318_v15 = vpop.eup %2317 }
 0x408   :  { %2329 = vrcp.f32 %v1473_v14  ;;  %v2320_v0 = vpop.eup %2319  ;;  %v1521_v13 = vadd.f32 1.0, %v2318_v15 }
 0x409   :  { %2331 = vrcp.f32 %v1483_v48  ;;  %v1531_v26 = vadd.f32 1.0, %v2320_v0  ;;  %v2322_v7 = vpop.eup %2321 }
 0x40a   :  { %2333 = vrcp.f32 %v1521_v13  ;;  %v2324_v2 = vpop.eup %2323 }
 0x40b   :  { %2335 = vrcp.f32 %v1531_v26  ;;  %v2326_v18 = vpop.eup %2325  ;;  %v1498_v35 = vadd.f32 1.0, %v2324_v2 }
 0x40c   :  { %v2328_v56 = vpop.eup %2327 }
 0x40d   :  { %v1546_v45 = vadd.f32 1.0, %v2328_v56  ;;  %2337 = vrcp.f32 %v1498_v35 }
 0x415   :  { %v2330_v5 = vpop.eup %2329 }
 0x416   :  { %v2332_v4 = vpop.eup %2331  ;;  %v1502_v12 = vmul.f32 %v2330_v5, %v2322_v7 }
 0x417   :  { %v1501_v9 = vmul.f32 %v2332_v4, %v3143_v63  ;;  %v2334_v39 = vpop.eup %2333  ;;  %v3251_v63 = vld [vmem:[#allocation21_spill] sm:$0xff] }
 0x418   :  { %v2336_v44 = vpop.eup %2335  ;;  %v1550_v59 = vmul.f32 %v2334_v39, %v2326_v18  ;;  %v1597_v54 = vmul.f32 %v2604_v17, %v3251_v63 }
 0x419   :  { %v3180_v6 = vadd.f32 %v1502_v12, %v1501_v9  ;;  %v1549_v57 = vmul.f32 %v2336_v44, %v3147_v51 }
 0x41a   :  { %v1599_v16 = vmul.f32 %v1598_v42, %v1597_v54  ;;  %v2338_v34 = vpop.eup %2337 }
 0x41b   :  { %2339 = vtanh.f32 %v3180_v6  ;;  %v3184_v37 = vadd.f32 %v1550_v59, %v1549_v57 }
 0x41c   :  { %2341 = vrcp.f32 %v1546_v45  ;;  %v1601_v41 = vadd.f32 %v1600_v30, %v1599_v16 }
 0x41d   :  { %2343 = vtanh.f32 %v3184_v37 }
 0x41e   :  { %v1602_v15 = vmul.f32 %v1601_v41, %v2611_v24  ;;  %v1612_v0 = vmul.f32 %v1601_v41, %v2613_v25  ;;  %v1622_v54 = vmul.f32 %v1601_v41, %v2631_v50 }
 0x428   :  { %v2340_v29 = vpop.eup %2339 }
 0x429   :  { %v2342_v47 = vpop.eup %2341  ;;  %v1505_v51 = vmul.f32 %v2340_v29, %v2338_v34 }
 0x42a   :  { %v2344_v60 = vpop.eup %2343 }
 0x42b   :  { %v1507_v23 = vmul.f32 %v1506_v19, %v1505_v51  ;;  %v1555_v8 = vmul.f32 %v1505_v51, %v2648_v27  ;;  %v1553_v43 = vmul.f32 %v2344_v60, %v2342_v47  ;;  %v1565_v20 = vmul.f32 %v1505_v51, %v2650_v28 }
 0x42c   :  { %v1575_v14 = vmul.f32 %v1505_v51, %v2676_v11  ;;  %v1580_v17 = vmul.f32 %v1505_v51, %v2670_v3 }
 0x42d   :  { %v3194_v48 = vadd.f32 %v1507_v23, %v3157_v49  ;;  %v1554_v13 = vmul.f32 %v1553_v43, %v2652_v36  ;;  %v1564_v26 = vmul.f32 %v1553_v43, %v2654_v33  ;;  %v1574_v7 = vmul.f32 %v1553_v43, %v2674_v10 }
 0x42e   :  { %v1579_v2 = vmul.f32 %v1553_v43, %v2668_v1  ;;  %v1603_v18 = vmul.f32 %v1553_v43, %v2607_v21  ;;  %v1613_v56 = vmul.f32 %v1553_v43, %v2609_v22  ;;  %v1627_v21 = vmul.f32 %v1601_v41, %v2623_v38 }
 0x42f   :  { %v1556_v5 = vadd.f32 %v1555_v8, %v1554_v13  ;;  %v1566_v35 = vadd.f32 %v1565_v20, %v1564_v26  ;;  %v1576_v49 = vadd.f32 %v1575_v14, %v1574_v7  ;;  %v1628_v22 = vmul.f32 %v1553_v43, %v2625_v40 }
 0x430   :  { %v1581_v4 = vadd.f32 %v1580_v17, %v1579_v2  ;;  %v1604_v12 = vadd.f32 %v1603_v18, %v1602_v15  ;;  %v1614_v24 = vadd.f32 %v1613_v56, %v1612_v0  ;;  %v1623_v42 = vmul.f32 %v1553_v43, %v2633_v52 }
 0x431   :  { %v1557_v25 = vadd.f32 %v1556_v5, %v2662_v53  ;;  %v1567_v9 = vadd.f32 %v1566_v35, %v2664_v55  ;;  %v1629_v16 = vadd.f32 %v1628_v22, %v1627_v21  ;;  %v1577_v30 = vadd.f32 %v1576_v49, %v2690_v61 }
 0x432   :  { %v1605_v39 = vadd.f32 %v1604_v12, %v2619_v31  ;;  %v1615_v45 = vadd.f32 %v1614_v24, %v2621_v32  ;;  %v1582_v31 = vadd.f32 %v1581_v4, %v2686_v46  ;;  %v1624_v32 = vadd.f32 %v1623_v42, %v1622_v54 }
 0x433   :  { %v1862_v44 = vmul.f32 -1.442695, %v1557_v25  ;;  %v1863_v59 = vmul.f32 -1.442695, %v1567_v9  ;;  %v1630_v34 = vadd.f32 %v1629_v16, %v2637_v58  ;;  %v1594_v4 = vstv %s1742_s25 }
 0x434   :  { %v1865_v57 = vmul.f32 -1.442695, %v1605_v39  ;;  %v1866_v63 = vmul.f32 -1.442695, %v1615_v45  ;;  %v1864_v38 = vmul.f32 -1.442695, %v1582_v31  ;;  %v1625_v40 = vadd.f32 %v1624_v32, %v2640_v62 }
 0x435   :  { %2345 = vpow2.f32 %v1862_v44  ;;  %v1867_v29 = vmul.f32 -1.442695, %v1630_v34 }
 0x436   :  { %2347 = vpow2.f32 %v1863_v59 }
 0x437   :  { %2349 = vpow2.f32 %v1865_v57 }
 0x438   :  { %2351 = vpow2.f32 %v1866_v63 }
 0x439   :  { %2353 = vtanh.f32 %v1577_v30 }
 0x43a   :  { %2355 = vpow2.f32 %v1864_v38 }
 0x43b   :  { %2357 = vtanh.f32 %v1625_v40 }
 0x43c   :  { %2359 = vpow2.f32 %v1867_v29 }
 0x442   :  { %v2346_v19 = vpop.eup %2345 }
 0x443   :  { %v2348_v50 = vpop.eup %2347  ;;  %v1561_v47 = vadd.f32 1.0, %v2346_v19 }
 0x444   :  { %v1571_v52 = vadd.f32 1.0, %v2348_v50  ;;  %v2350_v51 = vpop.eup %2349 }
 0x445   :  { %2361 = vrcp.f32 %v1561_v47  ;;  %v2352_v41 = vpop.eup %2351  ;;  %v1609_v60 = vadd.f32 1.0, %v2350_v51  ;;  %v1682_v47 = vstv %s1743_s2 }
 0x446   :  { %2363 = vrcp.f32 %v1571_v52  ;;  %v1619_v58 = vadd.f32 1.0, %v2352_v41  ;;  %v2354_v23 = vpop.eup %2353  ;;  %v1685_v41 = vstv %s1744_s26 }
 0x447   :  { %2365 = vrcp.f32 %v1609_v60  ;;  %v2356_v8 = vpop.eup %2355 }
 0x448   :  { %2367 = vrcp.f32 %v1619_v58  ;;  %v2358_v62 = vpop.eup %2357  ;;  %v1586_v14 = vadd.f32 1.0, %v2356_v8 }
 0x449   :  { %v2360_v43 = vpop.eup %2359 }
 0x44a   :  { %v1634_v26 = vadd.f32 1.0, %v2360_v43  ;;  %2369 = vrcp.f32 %v1586_v14 }
 0x452   :  { %v2362_v20 = vpop.eup %2361 }
 0x453   :  { %v2364_v17 = vpop.eup %2363  ;;  %v1590_v15 = vmul.f32 %v2362_v20, %v2354_v23 }
 0x454   :  { %v1589_v0 = vmul.f32 %v2364_v17, %v3180_v6  ;;  %v2366_v13 = vpop.eup %2365 }
 0x455   :  { %v2368_v7 = vpop.eup %2367  ;;  %v1638_v18 = vmul.f32 %v2366_v13, %v2358_v62 }
 0x456   :  { %v1591_v2 = vadd.f32 %v1590_v15, %v1589_v0  ;;  %v1637_v56 = vmul.f32 %v2368_v7, %v3184_v37 }
 0x457   :  { %v2370_v35 = vpop.eup %2369 }
 0x458   :  { %2371 = vtanh.f32 %v1591_v2  ;;  %v1639_v5 = vadd.f32 %v1638_v18, %v1637_v56 }
 0x459   :  { %2373 = vrcp.f32 %v1634_v26 }
 0x45a   :  { %2375 = vtanh.f32 %v1639_v5 }
 0x465   :  { %v2372_v49 = vpop.eup %2371 }
 0x466   :  { %v2374_v12 = vpop.eup %2373  ;;  %v1593_v24 = vmul.f32 %v2372_v49, %v2370_v35 }
 0x467   :  { %v2376_v25 = vpop.eup %2375 }
 0x468   :  { %v1595_v6 = vmul.f32 %v1594_v4, %v1593_v24  ;;  %v1643_v9 = vmul.f32 %v1593_v24, %v2648_v27  ;;  %v1641_v39 = vmul.f32 %v2376_v25, %v2374_v12  ;;  %v1653_v45 = vmul.f32 %v1593_v24, %v2650_v28 }
 0x469   :  { %v1663_v44 = vmul.f32 %v1593_v24, %v2676_v11  ;;  %v1668_v37 = vmul.f32 %v1593_v24, %v2670_v3 }
 0x46a   :  { %v1596_v59 = vadd.f32 %v1595_v6, %v3194_v48  ;;  %v1642_v57 = vmul.f32 %v1641_v39, %v2652_v36  ;;  %v1652_v21 = vmul.f32 %v1641_v39, %v2654_v33  ;;  %v1662_v22 = vmul.f32 %v1641_v39, %v2674_v10 }
 0x46b   :  { %v1667_v63 = vmul.f32 %v1641_v39, %v2668_v1 }
 0x46c   :  { %v1644_v54 = vadd.f32 %v1643_v9, %v1642_v57  ;;  %v1654_v42 = vadd.f32 %v1653_v45, %v1652_v21  ;;  %v1664_v27 = vadd.f32 %v1663_v44, %v1662_v22 }
 0x46d   :  { %v1669_v16 = vadd.f32 %v1668_v37, %v1667_v63 }
 0x46e   :  { %v1645_v28 = vadd.f32 %v1644_v54, %v2662_v53  ;;  %v1655_v11 = vadd.f32 %v1654_v42, %v2664_v55  ;;  %v1665_v33 = vadd.f32 %v1664_v27, %v2690_v61 }
 0x46f   :  { %v1670_v36 = vadd.f32 %v1669_v16, %v2686_v46 }
 0x470   :  { %v1868_v31 = vmul.f32 -1.442695, %v1645_v28  ;;  %v1869_v3 = vmul.f32 -1.442695, %v1655_v11 }
 0x471   :  { %v1870_v48 = vmul.f32 -1.442695, %v1670_v36 }
 0x472   :  { %2377 = vpow2.f32 %v1868_v31 }
 0x473   :  { %2379 = vpow2.f32 %v1869_v3 }
 0x474   :  { %2381 = vpow2.f32 %v1870_v48 }
 0x475   :  { %2383 = vtanh.f32 %v1665_v33 }
 0x47f   :  { %v2378_v10 = vpop.eup %2377 }
 0x480   :  { %v2380_v1 = vpop.eup %2379  ;;  %v1649_v32 = vadd.f32 1.0, %v2378_v10 }
 0x481   :  { %v1659_v34 = vadd.f32 1.0, %v2380_v1  ;;  %v2382_v53 = vpop.eup %2381 }
 0x482   :  { %2385 = vrcp.f32 %v1649_v32  ;;  %v2384_v30 = vpop.eup %2383  ;;  %v1674_v38 = vadd.f32 1.0, %v2382_v53 }
 0x483   :  { %2387 = vrcp.f32 %v1659_v34 }
 0x484   :  { %2389 = vrcp.f32 %v1674_v38 }
 0x48f   :  { %v2386_v55 = vpop.eup %2385 }
 0x490   :  { %v2388_v40 = vpop.eup %2387  ;;  %v1678_v29 = vmul.f32 %v2386_v55, %v2384_v30 }
 0x491   :  { %v1677_v19 = vmul.f32 %v2388_v40, %v1591_v2  ;;  %v2390_v61 = vpop.eup %2389 }
 0x493   :  { %v1679_v46 = vadd.f32 %v1678_v29, %v1677_v19 }
 0x495   :  { %2391 = vtanh.f32 %v1679_v46 }
 0x4a2   :  { %v2392_v50 = vpop.eup %2391 }
 0x4a3   :  { %v1681_v52 = vmul.f32 %v2392_v50, %v2390_v61 }
 0x4a5   :  { %v1683_v51 = vmul.f32 %v1682_v47, %v1681_v52 }
 0x4a7   :  { %v1684_v60 = vadd.f32 %v1683_v51, %v1596_v59 }
 0x4a9   :  { %v1686_v58 = vadd.f32 %v1685_v41, %v1684_v60 }
 0x4ab   :  { %1687 = vst [vmem:[#allocation12] sm:$0xff] %v1686_v58 }
 0x4ac   :  { %2472 = shalt.err (!%p2469_p1)
}
 0x4ad   :  { %1697 = dma.vmem_to_hbm [thread:$0]  %s1695_s28, 128, %s3239_s5, [#allocation4]  }
 0x4ae   :  { %2489 = dma.done.wait [#allocation4], 128  }
 0x4af   :  { %2490 = vsyncadd [#allocation4], 4294967168 }
 0x4b0   :  { %1701 = vsyncpa [#allocation3], 1 }
 0x4b1   :  { %1702 = vsyncpa [#allocation4], 1 }
 0x4b2   :  { %1703 = vsyncpa [#allocation5], 1 }
 0x4b3   :  { %1704 = vsyncpa [#allocation8], 1 }
 0x4b4   :  { %1705 = vsyncpa [#allocation11], 1 }

</bundles_post_ra>
